<compile_context>
chip_gen: v6e
topology: v6e:2x2x1
jax: 0.10.0
libtpu: 0.0.40
codegen_flags: <defaults>
</compile_context>

<pallas_src>
import jax
import jax.numpy as jnp
from jax.experimental import pallas as pl
from jax.experimental.pallas import tpu as pltpu

BN_EPS = 1e-5
# Explicit scoped-VMEM budget (v5e default is only 16 MiB; v7x physical is 64 MiB).
VMEM_LIMIT_BYTES = 32 * 1024 * 1024
# Rows per grid step. Per-step VMEM ~= 2*(TM*K*2 + TM*F*4 + TM*F*out_bytes) which is
# well under 1 MiB at these channel widths; raise for larger problems.
DEFAULT_TILE_M = 256


# ----------------------------------------------------------------------------
# Pass A kernel: tiled matmul (bf16 -> f32 MXU) + stable BN-stats accumulation
# ----------------------------------------------------------------------------
def _make_stats_kernel(tile_m, f, m_real, m_pad):
    needs_mask = (m_real != m_pad)

    def kernel(x_ref, w_ref, y_ref, stats_ref):
        i = pl.program_id(0)
        # conv-as-matmul hot path: bf16 operands, f32 accumulation on the MXU.
        y = jnp.dot(x_ref[...], w_ref[...], preferred_element_type=jnp.float32)
        y_ref[...] = y

        @pl.when(i == 0)
        def _init():
            # Per-channel shift (mean of the first tile). Using shifted sums keeps
            # the variance computation numerically stable (no E[x^2]-E[x]^2
            # cancellation); the formula below is exact for any finite shift.
            c0 = jnp.sum(y, axis=0, keepdims=True) * (1.0 / tile_m)
            stats_ref[0] = jnp.broadcast_to(c0, (8, f))
            stats_ref[1] = jnp.zeros((8, f), jnp.float32)
            stats_ref[2] = jnp.zeros((8, f), jnp.float32)

        c = stats_ref[0][0:1, :]                 # (1, f) shift, same for all tiles
        d = y - c
        if needs_mask:
            # Zero out padded rows so batch statistics only see the real M rows.
            rows = i * tile_m + jax.lax.broadcasted_iota(jnp.int32, (tile_m, 1), 0)
            d = d * (rows < m_real).astype(jnp.float32)
        d2 = d * d

        # Sublane-partial accumulation: VALU-only adds of (8, f) chunks; the
        # single cross-sublane collapse to (1, f) happens outside the kernel.
        ps = jnp.zeros((8, f), jnp.float32)
        ps2 = jnp.zeros((8, f), jnp.float32)
        for r in range(0, tile_m, 8):
            ps = ps + d[r:r + 8, :]
            ps2 = ps2 + d2[r:r + 8, :]
        stats_ref[1] = stats_ref[1] + ps
        stats_ref[2] = stats_ref[2] + ps2

    return kernel


# ----------------------------------------------------------------------------
# Pass B kernel: per-tile normalize (+ residual) (+ relu) epilogue
# ----------------------------------------------------------------------------
def _make_norm_kernel(apply_relu, has_residual):
    def kernel(*refs):
        if has_residual:
            y_ref, sc_ref, b_ref, r_ref, o_ref = refs
        else:
            y_ref, sc_ref, b_ref, o_ref = refs
        out = y_ref[...] * sc_ref[...] + b_ref[...]
        if has_residual:
            out = out + r_ref[...].astype(jnp.float32)
        if apply_relu:
            out = jnp.maximum(out, 0.0)
        o_ref[...] = out.astype(o_ref.dtype)

    return kernel


# ----------------------------------------------------------------------------
# Two-pass fused conv(as matmul) + BatchNorm(batch stats) [+residual] [+relu]
# ----------------------------------------------------------------------------
def _pad_rows(x2d, tile_m):
    m = x2d.shape[0]
    m_pad = ((m + tile_m - 1) // tile_m) * tile_m
    if m_pad == m:
        return x2d
    return jnp.pad(x2d, ((0, m_pad - m), (0, 0)))


def conv_bn(x2d, w, gamma, beta, *, residual=None, apply_relu=True,
            out_dtype=jnp.float32, tile_m=DEFAULT_TILE_M):
    """Fused (X @ W) -> BatchNorm(batch stats over real rows) -> [+res] -> [ReLU]."""
    assert tile_m % 8 == 0
    m_real, k = x2d.shape
    f = w.shape[1]

    xp = _pad_rows(x2d, tile_m).astype(jnp.bfloat16)       # bf16 MXU operands
    wp = w.astype(jnp.bfloat16)
    m_pad = xp.shape[0]
    grid = (m_pad // tile_m,)
    cparams_acc = pltpu.CompilerParams(
        dimension_semantics=("arbitrary",),                 # stats accumulate over M
        vmem_limit_bytes=VMEM_LIMIT_BYTES)
    cparams_par = pltpu.CompilerParams(
        dimension_semantics=("parallel",),                  # independent tiles
        vmem_limit_bytes=VMEM_LIMIT_BYTES)

    # ---- pass A: tiled matmul + stats accumulation (double-buffered by BlockSpec)
    y, stats = pl.pallas_call(
        _make_stats_kernel(tile_m, f, m_real, m_pad),
        grid=grid,
        in_specs=(
            pl.BlockSpec((tile_m, k), lambda i: (i, 0)),
            pl.BlockSpec((k, f), lambda i: (0, 0)),
        ),
        out_specs=(
            pl.BlockSpec((tile_m, f), lambda i: (i, 0)),
            pl.BlockSpec((3, 8, f), lambda i: (0, 0, 0)),   # resident accumulator
        ),
        out_shape=(
            jax.ShapeDtypeStruct((m_pad, f), jnp.float32),
            jax.ShapeDtypeStruct((3, 8, f), jnp.float32),
        ),
        compiler_params=cparams_acc,
    )(xp, wp)

    # ---- tiny per-channel finalization (F elements; plain JAX glue)
    c = stats[0, 0]                          # (f,) shift
    s = jnp.sum(stats[1], axis=0)            # (f,) sum of (y - c) over real rows
    ss = jnp.sum(stats[2], axis=0)           # (f,) sum of (y - c)^2 over real rows
    mu = c + s / m_real
    var = (ss - s * s / m_real) / m_real     # biased variance, shifted (stable) form
    inv = jax.lax.rsqrt(var + BN_EPS)
    scale = (gamma * inv).astype(jnp.float32).reshape(1, f)
    bias = (beta - mu * gamma * inv).astype(jnp.float32).reshape(1, f)

    # ---- pass B: normalize + residual + relu per tile
    in_arrays = [y, scale, bias]
    in_specs = [
        pl.BlockSpec((tile_m, f), lambda i: (i, 0)),
        pl.BlockSpec((1, f), lambda i: (0, 0)),
        pl.BlockSpec((1, f), lambda i: (0, 0)),
    ]
    if residual is not None:
        in_arrays.append(_pad_rows(residual, tile_m))
        in_specs.append(pl.BlockSpec((tile_m, f), lambda i: (i, 0)))

    out = pl.pallas_call(
        _make_norm_kernel(apply_relu, residual is not None),
        grid=grid,
        in_specs=in_specs,
        out_specs=pl.BlockSpec((tile_m, f), lambda i: (i, 0)),
        out_shape=jax.ShapeDtypeStruct((m_pad, f), out_dtype),
        compiler_params=cparams_par,
    )(*in_arrays)
    return out[:m_real]


# ----------------------------------------------------------------------------
# Glue: im2col patch extraction (layout plumbing only; matmul happens in kernel)
# TODO(synk): replace the JAX-side im2col with in-kernel shifted-tap accumulation
#             over a halo'd row tile (and fuse conv1 into it) to remove the
#             kh*kw HBM blow-up entirely.
# ----------------------------------------------------------------------------
def im2col(x_nhwc, kh, kw, pad):
    N, H, W, C = x_nhwc.shape
    xp = jnp.pad(x_nhwc, ((0, 0), (pad, pad), (pad, pad), (0, 0)))
    Ho = H + 2 * pad - kh + 1
    Wo = W + 2 * pad - kw + 1
    patches = [xp[:, i:i + Ho, j:j + Wo, :] for i in range(kh) for j in range(kw)]
    cols = jnp.concatenate(patches, axis=-1)              # (N, Ho, Wo, kh*kw*C)
    return cols.reshape(N * Ho * Wo, kh * kw * C), (N, Ho, Wo)


# ----------------------------------------------------------------------------
# Parameters (deterministic, PyTorch shapes: conv weight (cout, cin, kh, kw))
# ----------------------------------------------------------------------------
def init_params(key, in_nodes, nodes):
    ks = jax.random.split(key, 4)

    def conv_w(k, cin, cout, kh, kw):
        w = jax.random.normal(k, (cout, cin, kh, kw), jnp.float32) * 0.05
        # (cout,cin,kh,kw) -> matmul layout (kh*kw*cin, cout), matching im2col order
        return jnp.transpose(w, (2, 3, 1, 0)).reshape(kh * kw * cin, cout)

    p = {}
    p['w1'] = conv_w(ks[0], in_nodes, nodes, 1, 1)
    p['g1'] = jnp.ones((nodes,), jnp.float32); p['b1'] = jnp.zeros((nodes,), jnp.float32)
    p['w2'] = conv_w(ks[1], nodes, nodes, 4, 4)
    p['g2'] = jnp.ones((nodes,), jnp.float32); p['b2'] = jnp.zeros((nodes,), jnp.float32)
    p['w3'] = conv_w(ks[2], nodes, nodes * 4, 1, 1)
    p['g3'] = jnp.ones((nodes * 4,), jnp.float32); p['b3'] = jnp.zeros((nodes * 4,), jnp.float32)
    # `sample` residual branch (see header note): Conv2d(in_nodes, nodes*4, k=2) + BN
    p['ws'] = conv_w(ks[3], in_nodes, nodes * 4, 2, 2)
    p['gs'] = jnp.ones((nodes * 4,), jnp.float32); p['bs'] = jnp.zeros((nodes * 4,), jnp.float32)
    return p


# ----------------------------------------------------------------------------
# Forward pass (wrapper accepts NCHW like PyTorch)
# ----------------------------------------------------------------------------
def bottleneck_forward(x_nchw, params, in_nodes, nodes, tile_m=DEFAULT_TILE_M):
    x = jnp.transpose(x_nchw, (0, 2, 3, 1)).astype(jnp.float32)      # -> NHWC
    N, H, W, Cin = x.shape

    # conv1 (1x1) + bn1 + relu  (bf16 output: it only feeds the conv2 matmul)
    h1 = conv_bn(x.reshape(N * H * W, Cin), params['w1'], params['g1'], params['b1'],
                 out_dtype=jnp.bfloat16, tile_m=tile_m)
    h1 = h1.reshape(N, H, W, nodes)

    # conv2 (4x4, stride 1, pad 1) + bn2 + relu   (output spatial = H-1, W-1)
    cols2, (_, Ho, Wo) = im2col(h1, 4, 4, 1)
    h2 = conv_bn(cols2, params['w2'], params['g2'], params['b2'],
                 out_dtype=jnp.bfloat16, tile_m=tile_m)

    # sample(x): conv (2x2) + bn, no relu  -> residual (kept f32 for the epilogue add)
    cols_s, _ = im2col(x.astype(jnp.bfloat16), 2, 2, 0)
    res = conv_bn(cols_s, params['ws'], params['gs'], params['bs'],
                  apply_relu=False, out_dtype=jnp.float32, tile_m=tile_m)

    # conv3 (1x1) + bn3 + residual add + relu (residual fused into pass-B epilogue)
    out = conv_bn(h2, params['w3'], params['g3'], params['b3'],
                  residual=res, apply_relu=True, out_dtype=jnp.float32, tile_m=tile_m)
    out = out.reshape(N, Ho, Wo, nodes * 4)
    return jnp.transpose(out, (0, 3, 1, 2))                          # -> NCHW


# ----------------------------------------------------------------------------
# Pure-JAX reference (mirrors the bf16-matmul / f32-BN numerics of the kernels)
# ----------------------------------------------------------------------------
def _ref_conv_bn(x2d, w, g, b, residual=None, apply_relu=True, eps=BN_EPS):
    y = jnp.dot(x2d.astype(jnp.bfloat16), w.astype(jnp.bfloat16),
                preferred_element_type=jnp.float32)
    mu = jnp.mean(y, axis=0, keepdims=True)
    var = jnp.mean((y - mu) ** 2, axis=0, keepdims=True)
    out = (y - mu) * jax.lax.rsqrt(var + eps) * g.reshape(1, -1) + b.reshape(1, -1)
    if residual is not None:
        out = out + residual
    return jnp.maximum(out, 0.0) if apply_relu else out


def _ref_forward(x_nchw, p, in_nodes, nodes):
    x = jnp.transpose(x_nchw, (0, 2, 3, 1)).astype(jnp.float32)
    N, H, W, Cin = x.shape
    h1 = _ref_conv_bn(x.reshape(-1, Cin), p['w1'], p['g1'], p['b1'])
    h1 = h1.astype(jnp.bfloat16).reshape(N, H, W, nodes)
    c2, (_, Ho, Wo) = im2col(h1, 4, 4, 1)
    h2 = _ref_conv_bn(c2, p['w2'], p['g2'], p['b2']).astype(jnp.bfloat16)
    cs, _ = im2col(x.astype(jnp.bfloat16), 2, 2, 0)
    rs = _ref_conv_bn(cs, p['ws'], p['gs'], p['bs'], apply_relu=False)
    r3 = _ref_conv_bn(h2, p['w3'], p['g3'], p['b3'], residual=rs)
    return jnp.transpose(r3.reshape(N, Ho, Wo, nodes * 4), (0, 3, 1, 2))


if __name__ == "__main__":
    in_nodes, nodes = 16, 4           # residual branch outputs nodes*4 = 16 channels
    key = jax.random.PRNGKey(0)
    kx, kp = jax.random.split(key)
    x = jax.random.normal(kx, (2, in_nodes, 16, 16), jnp.float32)    # NCHW input
    params = init_params(kp, in_nodes, nodes)

    fwd = jax.jit(bottleneck_forward, static_argnames=("in_nodes", "nodes", "tile_m"))
    out = jax.block_until_ready(fwd(x, params, in_nodes=in_nodes, nodes=nodes))
    assert out.shape == (2, nodes * 4, 15, 15), out.shape

    ref = jax.block_until_ready(_ref_forward(x, params, in_nodes, nodes))
    # Tolerance reflects bf16 storage of the h1/h2 intermediates (MXU-native I/O):
    # rare 1-ulp bf16 rounding differences between the fused and reference paths can
    # propagate through BN rescaling; real bugs would be O(0.1-1).
    max_err = float(jnp.max(jnp.abs(out - ref)))
    assert jnp.allclose(out, ref, atol=2e-2, rtol=2e-2), f"mismatch vs ref, max_err={max_err}"

    print("KERNEL_OK")
</pallas_src>

<mosaic_0001>
module attributes {stable_mosaic.version = 11 : i64} {
  func.func @kernel(%arg0: i32, %arg1: memref<256x16xbf16, #tpu.memory_space<vmem>>, %arg2: memref<16x4xbf16, #tpu.memory_space<vmem>>, %arg3: memref<256x4xf32, #tpu.memory_space<vmem>>, %arg4: memref<3x8x4xf32, #tpu.memory_space<vmem>>) attributes {dimension_semantics = [#tpu.dimension_semantics<arbitrary>], iteration_bounds = array<i64: 2>, scalar_prefetch = 0 : i64, scratch_operands = 0 : i64, tpu.core_type = #tpu.core_type<tc>, window_params = [{transform_indices = @transform_0, window_bounds = array<i64: 256, 16>}, {pipeline_mode = #tpu.pipeline_mode<synchronous>, transform_indices = @transform_1, window_bounds = array<i64: 16, 4>}, {transform_indices = @transform_2, window_bounds = array<i64: 256, 4>}, {pipeline_mode = #tpu.pipeline_mode<synchronous>, transform_indices = @transform_3, window_bounds = array<i64: 3, 8, 4>}]} {
    %c0 = arith.constant 0 : index
    %c0_0 = arith.constant 0 : index
    %0 = vector.load %arg1[%c0, %c0_0] : memref<256x16xbf16, #tpu.memory_space<vmem>>, vector<256x16xbf16>
    %c0_1 = arith.constant 0 : index
    %c0_2 = arith.constant 0 : index
    %1 = vector.load %arg2[%c0_1, %c0_2] : memref<16x4xbf16, #tpu.memory_space<vmem>>, vector<16x4xbf16>
    %cst = arith.constant dense<0.000000e+00> : vector<256x4xf32>
    %2 = tpu.matmul %0, %1, %cst {dimension_numbers = #tpu.dot_dimension_numbers<[1], [0], [0], [1], [0, 0, 1, 1], [], []>} : vector<256x16xbf16>, vector<16x4xbf16>, vector<256x4xf32> -> vector<256x4xf32>
    %c0_3 = arith.constant 0 : index
    %c0_4 = arith.constant 0 : index
    %3 = vector.load %arg3[%c0_3, %c0_4] : memref<256x4xf32, #tpu.memory_space<vmem>>, vector<256x4xf32>
    tpu.vector_store %arg3[%c0_3, %c0_4], %2 {strides = array<i32>} : memref<256x4xf32, #tpu.memory_space<vmem>>, vector<256x4xf32>,
    %c0_i32 = arith.constant 0 : i32
    %4 = arith.cmpi eq, %arg0, %c0_i32 : i32
    %5 = arith.extui %4 : i1 to i32
    %c0_i32_5 = arith.constant 0 : i32
    %6 = arith.cmpi ne, %5, %c0_i32_5 : i32
    scf.if %6 {
      %cst_21 = arith.constant dense<0.000000e+00> : vector<4xf32>
      %155 = vector.multi_reduction <add>, %2, %cst_21 [0] : vector<256x4xf32> to vector<4xf32>
      %156 = vector.shape_cast %155 : vector<4xf32> to vector<1x4xf32>
      %cst_22 = arith.constant 3.906250e-03 : f32
      %157 = vector.broadcast %cst_22 : f32 to vector<1x4xf32>
      %158 = arith.mulf %156, %157 : vector<1x4xf32>
      %159 = vector.shape_cast %158 : vector<1x4xf32> to vector<1x4xf32>
      %160 = vector.broadcast %159 : vector<1x4xf32> to vector<8x4xf32>
      %c0_23 = arith.constant 0 : index
      %c0_24 = arith.constant 0 : index
      %c0_25 = arith.constant 0 : index
      %161 = vector.load %arg4[%c0_23, %c0_24, %c0_25] : memref<3x8x4xf32, #tpu.memory_space<vmem>>, vector<1x8x4xf32>
      %162 = vector.shape_cast %161 : vector<1x8x4xf32> to vector<8x4xf32>
      %163 = vector.shape_cast %160 : vector<8x4xf32> to vector<1x8x4xf32>
      tpu.vector_store %arg4[%c0_23, %c0_24, %c0_25], %163 {strides = array<i32>} : memref<3x8x4xf32, #tpu.memory_space<vmem>>, vector<1x8x4xf32>,
      %cst_26 = arith.constant 0.000000e+00 : f32
      %164 = vector.broadcast %cst_26 : f32 to vector<8x4xf32>
      %c1_27 = arith.constant 1 : index
      %c0_28 = arith.constant 0 : index
      %c0_29 = arith.constant 0 : index
      %165 = vector.load %arg4[%c1_27, %c0_28, %c0_29] : memref<3x8x4xf32, #tpu.memory_space<vmem>>, vector<1x8x4xf32>
      %166 = vector.shape_cast %165 : vector<1x8x4xf32> to vector<8x4xf32>
      %167 = vector.shape_cast %164 : vector<8x4xf32> to vector<1x8x4xf32>
      tpu.vector_store %arg4[%c1_27, %c0_28, %c0_29], %167 {strides = array<i32>} : memref<3x8x4xf32, #tpu.memory_space<vmem>>, vector<1x8x4xf32>,
      %cst_30 = arith.constant 0.000000e+00 : f32
      %168 = vector.broadcast %cst_30 : f32 to vector<8x4xf32>
      %c2_31 = arith.constant 2 : index
      %c0_32 = arith.constant 0 : index
      %c0_33 = arith.constant 0 : index
      %169 = vector.load %arg4[%c2_31, %c0_32, %c0_33] : memref<3x8x4xf32, #tpu.memory_space<vmem>>, vector<1x8x4xf32>
      %170 = vector.shape_cast %169 : vector<1x8x4xf32> to vector<8x4xf32>
      %171 = vector.shape_cast %168 : vector<8x4xf32> to vector<1x8x4xf32>
      tpu.vector_store %arg4[%c2_31, %c0_32, %c0_33], %171 {strides = array<i32>} : memref<3x8x4xf32, #tpu.memory_space<vmem>>, vector<1x8x4xf32>,
    } else {
    }
    %c0_6 = arith.constant 0 : index
    %c0_7 = arith.constant 0 : index
    %c0_8 = arith.constant 0 : index
    %7 = vector.load %arg4[%c0_6, %c0_7, %c0_8] : memref<3x8x4xf32, #tpu.memory_space<vmem>>, vector<1x8x4xf32>
    %8 = vector.shape_cast %7 : vector<1x8x4xf32> to vector<8x4xf32>
    %9 = vector.extract_strided_slice %8 {offsets = [0, 0], sizes = [1, 4], strides = [1, 1]} : vector<8x4xf32> to vector<1x4xf32>
    %10 = vector.broadcast %9 : vector<1x4xf32> to vector<256x4xf32>
    %11 = arith.subf %2, %10 : vector<256x4xf32>
    %12 = arith.mulf %11, %11 : vector<256x4xf32>
    %cst_9 = arith.constant 0.000000e+00 : f32
    %13 = vector.broadcast %cst_9 : f32 to vector<8x4xf32>
    %cst_10 = arith.constant 0.000000e+00 : f32
    %14 = vector.broadcast %cst_10 : f32 to vector<8x4xf32>
    %15 = vector.extract_strided_slice %11 {offsets = [0, 0], sizes = [8, 4], strides = [1, 1]} : vector<256x4xf32> to vector<8x4xf32>
    %16 = arith.addf %13, %15 : vector<8x4xf32>
    %17 = vector.extract_strided_slice %12 {offsets = [0, 0], sizes = [8, 4], strides = [1, 1]} : vector<256x4xf32> to vector<8x4xf32>
    %18 = arith.addf %14, %17 : vector<8x4xf32>
    %19 = vector.extract_strided_slice %11 {offsets = [8, 0], sizes = [8, 4], strides = [1, 1]} : vector<256x4xf32> to vector<8x4xf32>
    %20 = arith.addf %16, %19 : vector<8x4xf32>
    %21 = vector.extract_strided_slice %12 {offsets = [8, 0], sizes = [8, 4], strides = [1, 1]} : vector<256x4xf32> to vector<8x4xf32>
    %22 = arith.addf %18, %21 : vector<8x4xf32>
    %23 = vector.extract_strided_slice %11 {offsets = [16, 0], sizes = [8, 4], strides = [1, 1]} : vector<256x4xf32> to vector<8x4xf32>
    %24 = arith.addf %20, %23 : vector<8x4xf32>
    %25 = vector.extract_strided_slice %12 {offsets = [16, 0], sizes = [8, 4], strides = [1, 1]} : vector<256x4xf32> to vector<8x4xf32>
    %26 = arith.addf %22, %25 : vector<8x4xf32>
    %27 = vector.extract_strided_slice %11 {offsets = [24, 0], sizes = [8, 4], strides = [1, 1]} : vector<256x4xf32> to vector<8x4xf32>
    %28 = arith.addf %24, %27 : vector<8x4xf32>
    %29 = vector.extract_strided_slice %12 {offsets = [24, 0], sizes = [8, 4], strides = [1, 1]} : vector<256x4xf32> to vector<8x4xf32>
    %30 = arith.addf %26, %29 : vector<8x4xf32>
    %31 = vector.extract_strided_slice %11 {offsets = [32, 0], sizes = [8, 4], strides = [1, 1]} : vector<256x4xf32> to vector<8x4xf32>
    %32 = arith.addf %28, %31 : vector<8x4xf32>
    %33 = vector.extract_strided_slice %12 {offsets = [32, 0], sizes = [8, 4], strides = [1, 1]} : vector<256x4xf32> to vector<8x4xf32>
    %34 = arith.addf %30, %33 : vector<8x4xf32>
    %35 = vector.extract_strided_slice %11 {offsets = [40, 0], sizes = [8, 4], strides = [1, 1]} : vector<256x4xf32> to vector<8x4xf32>
    %36 = arith.addf %32, %35 : vector<8x4xf32>
    %37 = vector.extract_strided_slice %12 {offsets = [40, 0], sizes = [8, 4], strides = [1, 1]} : vector<256x4xf32> to vector<8x4xf32>
    %38 = arith.addf %34, %37 : vector<8x4xf32>
    %39 = vector.extract_strided_slice %11 {offsets = [48, 0], sizes = [8, 4], strides = [1, 1]} : vector<256x4xf32> to vector<8x4xf32>
    %40 = arith.addf %36, %39 : vector<8x4xf32>
    %41 = vector.extract_strided_slice %12 {offsets = [48, 0], sizes = [8, 4], strides = [1, 1]} : vector<256x4xf32> to vector<8x4xf32>
    %42 = arith.addf %38, %41 : vector<8x4xf32>
    %43 = vector.extract_strided_slice %11 {offsets = [56, 0], sizes = [8, 4], strides = [1, 1]} : vector<256x4xf32> to vector<8x4xf32>
    %44 = arith.addf %40, %43 : vector<8x4xf32>
    %45 = vector.extract_strided_slice %12 {offsets = [56, 0], sizes = [8, 4], strides = [1, 1]} : vector<256x4xf32> to vector<8x4xf32>
    %46 = arith.addf %42, %45 : vector<8x4xf32>
    %47 = vector.extract_strided_slice %11 {offsets = [64, 0], sizes = [8, 4], strides = [1, 1]} : vector<256x4xf32> to vector<8x4xf32>
    %48 = arith.addf %44, %47 : vector<8x4xf32>
    %49 = vector.extract_strided_slice %12 {offsets = [64, 0], sizes = [8, 4], strides = [1, 1]} : vector<256x4xf32> to vector<8x4xf32>
    %50 = arith.addf %46, %49 : vector<8x4xf32>
    %51 = vector.extract_strided_slice %11 {offsets = [72, 0], sizes = [8, 4], strides = [1, 1]} : vector<256x4xf32> to vector<8x4xf32>
    %52 = arith.addf %48, %51 : vector<8x4xf32>
    %53 = vector.extract_strided_slice %12 {offsets = [72, 0], sizes = [8, 4], strides = [1, 1]} : vector<256x4xf32> to vector<8x4xf32>
    %54 = arith.addf %50, %53 : vector<8x4xf32>
    %55 = vector.extract_strided_slice %11 {offsets = [80, 0], sizes = [8, 4], strides = [1, 1]} : vector<256x4xf32> to vector<8x4xf32>
    %56 = arith.addf %52, %55 : vector<8x4xf32>
    %57 = vector.extract_strided_slice %12 {offsets = [80, 0], sizes = [8, 4], strides = [1, 1]} : vector<256x4xf32> to vector<8x4xf32>
    %58 = arith.addf %54, %57 : vector<8x4xf32>
    %59 = vector.extract_strided_slice %11 {offsets = [88, 0], sizes = [8, 4], strides = [1, 1]} : vector<256x4xf32> to vector<8x4xf32>
    %60 = arith.addf %56, %59 : vector<8x4xf32>
    %61 = vector.extract_strided_slice %12 {offsets = [88, 0], sizes = [8, 4], strides = [1, 1]} : vector<256x4xf32> to vector<8x4xf32>
    %62 = arith.addf %58, %61 : vector<8x4xf32>
    %63 = vector.extract_strided_slice %11 {offsets = [96, 0], sizes = [8, 4], strides = [1, 1]} : vector<256x4xf32> to vector<8x4xf32>
    %64 = arith.addf %60, %63 : vector<8x4xf32>
    %65 = vector.extract_strided_slice %12 {offsets = [96, 0], sizes = [8, 4], strides = [1, 1]} : vector<256x4xf32> to vector<8x4xf32>
    %66 = arith.addf %62, %65 : vector<8x4xf32>
    %67 = vector.extract_strided_slice %11 {offsets = [104, 0], sizes = [8, 4], strides = [1, 1]} : vector<256x4xf32> to vector<8x4xf32>
    %68 = arith.addf %64, %67 : vector<8x4xf32>
    %69 = vector.extract_strided_slice %12 {offsets = [104, 0], sizes = [8, 4], strides = [1, 1]} : vector<256x4xf32> to vector<8x4xf32>
    %70 = arith.addf %66, %69 : vector<8x4xf32>
    %71 = vector.extract_strided_slice %11 {offsets = [112, 0], sizes = [8, 4], strides = [1, 1]} : vector<256x4xf32> to vector<8x4xf32>
    %72 = arith.addf %68, %71 : vector<8x4xf32>
    %73 = vector.extract_strided_slice %12 {offsets = [112, 0], sizes = [8, 4], strides = [1, 1]} : vector<256x4xf32> to vector<8x4xf32>
    %74 = arith.addf %70, %73 : vector<8x4xf32>
    %75 = vector.extract_strided_slice %11 {offsets = [120, 0], sizes = [8, 4], strides = [1, 1]} : vector<256x4xf32> to vector<8x4xf32>
    %76 = arith.addf %72, %75 : vector<8x4xf32>
    %77 = vector.extract_strided_slice %12 {offsets = [120, 0], sizes = [8, 4], strides = [1, 1]} : vector<256x4xf32> to vector<8x4xf32>
    %78 = arith.addf %74, %77 : vector<8x4xf32>
    %79 = vector.extract_strided_slice %11 {offsets = [128, 0], sizes = [8, 4], strides = [1, 1]} : vector<256x4xf32> to vector<8x4xf32>
    %80 = arith.addf %76, %79 : vector<8x4xf32>
    %81 = vector.extract_strided_slice %12 {offsets = [128, 0], sizes = [8, 4], strides = [1, 1]} : vector<256x4xf32> to vector<8x4xf32>
    %82 = arith.addf %78, %81 : vector<8x4xf32>
    %83 = vector.extract_strided_slice %11 {offsets = [136, 0], sizes = [8, 4], strides = [1, 1]} : vector<256x4xf32> to vector<8x4xf32>
    %84 = arith.addf %80, %83 : vector<8x4xf32>
    %85 = vector.extract_strided_slice %12 {offsets = [136, 0], sizes = [8, 4], strides = [1, 1]} : vector<256x4xf32> to vector<8x4xf32>
    %86 = arith.addf %82, %85 : vector<8x4xf32>
    %87 = vector.extract_strided_slice %11 {offsets = [144, 0], sizes = [8, 4], strides = [1, 1]} : vector<256x4xf32> to vector<8x4xf32>
    %88 = arith.addf %84, %87 : vector<8x4xf32>
    %89 = vector.extract_strided_slice %12 {offsets = [144, 0], sizes = [8, 4], strides = [1, 1]} : vector<256x4xf32> to vector<8x4xf32>
    %90 = arith.addf %86, %89 : vector<8x4xf32>
    %91 = vector.extract_strided_slice %11 {offsets = [152, 0], sizes = [8, 4], strides = [1, 1]} : vector<256x4xf32> to vector<8x4xf32>
    %92 = arith.addf %88, %91 : vector<8x4xf32>
    %93 = vector.extract_strided_slice %12 {offsets = [152, 0], sizes = [8, 4], strides = [1, 1]} : vector<256x4xf32> to vector<8x4xf32>
    %94 = arith.addf %90, %93 : vector<8x4xf32>
    %95 = vector.extract_strided_slice %11 {offsets = [160, 0], sizes = [8, 4], strides = [1, 1]} : vector<256x4xf32> to vector<8x4xf32>
    %96 = arith.addf %92, %95 : vector<8x4xf32>
    %97 = vector.extract_strided_slice %12 {offsets = [160, 0], sizes = [8, 4], strides = [1, 1]} : vector<256x4xf32> to vector<8x4xf32>
    %98 = arith.addf %94, %97 : vector<8x4xf32>
    %99 = vector.extract_strided_slice %11 {offsets = [168, 0], sizes = [8, 4], strides = [1, 1]} : vector<256x4xf32> to vector<8x4xf32>
    %100 = arith.addf %96, %99 : vector<8x4xf32>
    %101 = vector.extract_strided_slice %12 {offsets = [168, 0], sizes = [8, 4], strides = [1, 1]} : vector<256x4xf32> to vector<8x4xf32>
    %102 = arith.addf %98, %101 : vector<8x4xf32>
    %103 = vector.extract_strided_slice %11 {offsets = [176, 0], sizes = [8, 4], strides = [1, 1]} : vector<256x4xf32> to vector<8x4xf32>
    %104 = arith.addf %100, %103 : vector<8x4xf32>
    %105 = vector.extract_strided_slice %12 {offsets = [176, 0], sizes = [8, 4], strides = [1, 1]} : vector<256x4xf32> to vector<8x4xf32>
    %106 = arith.addf %102, %105 : vector<8x4xf32>
    %107 = vector.extract_strided_slice %11 {offsets = [184, 0], sizes = [8, 4], strides = [1, 1]} : vector<256x4xf32> to vector<8x4xf32>
    %108 = arith.addf %104, %107 : vector<8x4xf32>
    %109 = vector.extract_strided_slice %12 {offsets = [184, 0], sizes = [8, 4], strides = [1, 1]} : vector<256x4xf32> to vector<8x4xf32>
    %110 = arith.addf %106, %109 : vector<8x4xf32>
    %111 = vector.extract_strided_slice %11 {offsets = [192, 0], sizes = [8, 4], strides = [1, 1]} : vector<256x4xf32> to vector<8x4xf32>
    %112 = arith.addf %108, %111 : vector<8x4xf32>
    %113 = vector.extract_strided_slice %12 {offsets = [192, 0], sizes = [8, 4], strides = [1, 1]} : vector<256x4xf32> to vector<8x4xf32>
    %114 = arith.addf %110, %113 : vector<8x4xf32>
    %115 = vector.extract_strided_slice %11 {offsets = [200, 0], sizes = [8, 4], strides = [1, 1]} : vector<256x4xf32> to vector<8x4xf32>
    %116 = arith.addf %112, %115 : vector<8x4xf32>
    %117 = vector.extract_strided_slice %12 {offsets = [200, 0], sizes = [8, 4], strides = [1, 1]} : vector<256x4xf32> to vector<8x4xf32>
    %118 = arith.addf %114, %117 : vector<8x4xf32>
    %119 = vector.extract_strided_slice %11 {offsets = [208, 0], sizes = [8, 4], strides = [1, 1]} : vector<256x4xf32> to vector<8x4xf32>
    %120 = arith.addf %116, %119 : vector<8x4xf32>
    %121 = vector.extract_strided_slice %12 {offsets = [208, 0], sizes = [8, 4], strides = [1, 1]} : vector<256x4xf32> to vector<8x4xf32>
    %122 = arith.addf %118, %121 : vector<8x4xf32>
    %123 = vector.extract_strided_slice %11 {offsets = [216, 0], sizes = [8, 4], strides = [1, 1]} : vector<256x4xf32> to vector<8x4xf32>
    %124 = arith.addf %120, %123 : vector<8x4xf32>
    %125 = vector.extract_strided_slice %12 {offsets = [216, 0], sizes = [8, 4], strides = [1, 1]} : vector<256x4xf32> to vector<8x4xf32>
    %126 = arith.addf %122, %125 : vector<8x4xf32>
    %127 = vector.extract_strided_slice %11 {offsets = [224, 0], sizes = [8, 4], strides = [1, 1]} : vector<256x4xf32> to vector<8x4xf32>
    %128 = arith.addf %124, %127 : vector<8x4xf32>
    %129 = vector.extract_strided_slice %12 {offsets = [224, 0], sizes = [8, 4], strides = [1, 1]} : vector<256x4xf32> to vector<8x4xf32>
    %130 = arith.addf %126, %129 : vector<8x4xf32>
    %131 = vector.extract_strided_slice %11 {offsets = [232, 0], sizes = [8, 4], strides = [1, 1]} : vector<256x4xf32> to vector<8x4xf32>
    %132 = arith.addf %128, %131 : vector<8x4xf32>
    %133 = vector.extract_strided_slice %12 {offsets = [232, 0], sizes = [8, 4], strides = [1, 1]} : vector<256x4xf32> to vector<8x4xf32>
    %134 = arith.addf %130, %133 : vector<8x4xf32>
    %135 = vector.extract_strided_slice %11 {offsets = [240, 0], sizes = [8, 4], strides = [1, 1]} : vector<256x4xf32> to vector<8x4xf32>
    %136 = arith.addf %132, %135 : vector<8x4xf32>
    %137 = vector.extract_strided_slice %12 {offsets = [240, 0], sizes = [8, 4], strides = [1, 1]} : vector<256x4xf32> to vector<8x4xf32>
    %138 = arith.addf %134, %137 : vector<8x4xf32>
    %139 = vector.extract_strided_slice %11 {offsets = [248, 0], sizes = [8, 4], strides = [1, 1]} : vector<256x4xf32> to vector<8x4xf32>
    %140 = arith.addf %136, %139 : vector<8x4xf32>
    %141 = vector.extract_strided_slice %12 {offsets = [248, 0], sizes = [8, 4], strides = [1, 1]} : vector<256x4xf32> to vector<8x4xf32>
    %142 = arith.addf %138, %141 : vector<8x4xf32>
    %c1 = arith.constant 1 : index
    %c0_11 = arith.constant 0 : index
    %c0_12 = arith.constant 0 : index
    %143 = vector.load %arg4[%c1, %c0_11, %c0_12] : memref<3x8x4xf32, #tpu.memory_space<vmem>>, vector<1x8x4xf32>
    %144 = vector.shape_cast %143 : vector<1x8x4xf32> to vector<8x4xf32>
    %145 = arith.addf %144, %140 : vector<8x4xf32>
    %c1_13 = arith.constant 1 : index
    %c0_14 = arith.constant 0 : index
    %c0_15 = arith.constant 0 : index
    %146 = vector.load %arg4[%c1_13, %c0_14, %c0_15] : memref<3x8x4xf32, #tpu.memory_space<vmem>>, vector<1x8x4xf32>
    %147 = vector.shape_cast %146 : vector<1x8x4xf32> to vector<8x4xf32>
    %148 = vector.shape_cast %145 : vector<8x4xf32> to vector<1x8x4xf32>
    tpu.vector_store %arg4[%c1_13, %c0_14, %c0_15], %148 {strides = array<i32>} : memref<3x8x4xf32, #tpu.memory_space<vmem>>, vector<1x8x4xf32>,
    %c2 = arith.constant 2 : index
    %c0_16 = arith.constant 0 : index
    %c0_17 = arith.constant 0 : index
    %149 = vector.load %arg4[%c2, %c0_16, %c0_17] : memref<3x8x4xf32, #tpu.memory_space<vmem>>, vector<1x8x4xf32>
    %150 = vector.shape_cast %149 : vector<1x8x4xf32> to vector<8x4xf32>
    %151 = arith.addf %150, %142 : vector<8x4xf32>
    %c2_18 = arith.constant 2 : index
    %c0_19 = arith.constant 0 : index
    %c0_20 = arith.constant 0 : index
    %152 = vector.load %arg4[%c2_18, %c0_19, %c0_20] : memref<3x8x4xf32, #tpu.memory_space<vmem>>, vector<1x8x4xf32>
    %153 = vector.shape_cast %152 : vector<1x8x4xf32> to vector<8x4xf32>
    %154 = vector.shape_cast %151 : vector<8x4xf32> to vector<1x8x4xf32>
    tpu.vector_store %arg4[%c2_18, %c0_19, %c0_20], %154 {strides = array<i32>} : memref<3x8x4xf32, #tpu.memory_space<vmem>>, vector<1x8x4xf32>,
    return
  }
  func.func @transform_0(%arg0: i32) -> (i32, i32) {
    %c0_i32 = arith.constant 0 : i32
    %c0_i32_0 = arith.constant 0 : i32
    return %arg0, %c0_i32 : i32, i32
  }
  func.func @transform_1(%arg0: i32) -> (i32, i32) {
    %c0_i32 = arith.constant 0 : i32
    %c0_i32_0 = arith.constant 0 : i32
    %c0_i32_1 = arith.constant 0 : i32
    return %c0_i32, %c0_i32_0 : i32, i32
  }
  func.func @transform_2(%arg0: i32) -> (i32, i32) {
    %c0_i32 = arith.constant 0 : i32
    %c0_i32_0 = arith.constant 0 : i32
    return %arg0, %c0_i32 : i32, i32
  }
  func.func @transform_3(%arg0: i32) -> (i32, i32, i32) {
    %c0_i32 = arith.constant 0 : i32
    %c0_i32_0 = arith.constant 0 : i32
    %c0_i32_1 = arith.constant 0 : i32
    %c0_i32_2 = arith.constant 0 : i32
    return %c0_i32, %c0_i32_0, %c0_i32_1 : i32, i32, i32
  }
}

module attributes {stable_mosaic.version = 11 : i64} {
  func.func @kernel(%arg0: i32, %arg1: memref<256x4xf32, #tpu.memory_space<vmem>>, %arg2: memref<1x4xf32, #tpu.memory_space<vmem>>, %arg3: memref<1x4xf32, #tpu.memory_space<vmem>>, %arg4: memref<256x4xbf16, #tpu.memory_space<vmem>>) attributes {dimension_semantics = [#tpu.dimension_semantics<parallel>], iteration_bounds = array<i64: 2>, scalar_prefetch = 0 : i64, scratch_operands = 0 : i64, tpu.core_type = #tpu.core_type<tc>, window_params = [{transform_indices = @transform_0, window_bounds = array<i64: 256, 4>}, {pipeline_mode = #tpu.pipeline_mode<synchronous>, transform_indices = @transform_1, window_bounds = array<i64: 1, 4>}, {pipeline_mode = #tpu.pipeline_mode<synchronous>, transform_indices = @transform_2, window_bounds = array<i64: 1, 4>}, {transform_indices = @transform_3, window_bounds = array<i64: 256, 4>}]} {
    %c0 = arith.constant 0 : index
    %c0_0 = arith.constant 0 : index
    %0 = vector.load %arg1[%c0, %c0_0] : memref<256x4xf32, #tpu.memory_space<vmem>>, vector<256x4xf32>
    %c0_1 = arith.constant 0 : index
    %c0_2 = arith.constant 0 : index
    %1 = vector.load %arg2[%c0_1, %c0_2] : memref<1x4xf32, #tpu.memory_space<vmem>>, vector<1x4xf32>
    %2 = vector.broadcast %1 : vector<1x4xf32> to vector<256x4xf32>
    %3 = arith.mulf %0, %2 : vector<256x4xf32>
    %c0_3 = arith.constant 0 : index
    %c0_4 = arith.constant 0 : index
    %4 = vector.load %arg3[%c0_3, %c0_4] : memref<1x4xf32, #tpu.memory_space<vmem>>, vector<1x4xf32>
    %5 = vector.broadcast %4 : vector<1x4xf32> to vector<256x4xf32>
    %6 = arith.addf %3, %5 : vector<256x4xf32>
    %cst = arith.constant 0.000000e+00 : f32
    %7 = vector.broadcast %cst : f32 to vector<256x4xf32>
    %8 = arith.maximumf %6, %7 : vector<256x4xf32>
    %9 = arith.truncf %8 : vector<256x4xf32> to vector<256x4xbf16>
    %c0_5 = arith.constant 0 : index
    %c0_6 = arith.constant 0 : index
    %10 = vector.load %arg4[%c0_5, %c0_6] : memref<256x4xbf16, #tpu.memory_space<vmem>>, vector<256x4xbf16>
    tpu.vector_store %arg4[%c0_5, %c0_6], %9 {strides = array<i32>} : memref<256x4xbf16, #tpu.memory_space<vmem>>, vector<256x4xbf16>,
    return
  }
  func.func @transform_0(%arg0: i32) -> (i32, i32) {
    %c0_i32 = arith.constant 0 : i32
    %c0_i32_0 = arith.constant 0 : i32
    return %arg0, %c0_i32 : i32, i32
  }
  func.func @transform_1(%arg0: i32) -> (i32, i32) {
    %c0_i32 = arith.constant 0 : i32
    %c0_i32_0 = arith.constant 0 : i32
    %c0_i32_1 = arith.constant 0 : i32
    return %c0_i32, %c0_i32_0 : i32, i32
  }
  func.func @transform_2(%arg0: i32) -> (i32, i32) {
    %c0_i32 = arith.constant 0 : i32
    %c0_i32_0 = arith.constant 0 : i32
    %c0_i32_1 = arith.constant 0 : i32
    return %c0_i32, %c0_i32_0 : i32, i32
  }
  func.func @transform_3(%arg0: i32) -> (i32, i32) {
    %c0_i32 = arith.constant 0 : i32
    %c0_i32_0 = arith.constant 0 : i32
    return %arg0, %c0_i32 : i32, i32
  }
}

module attributes {stable_mosaic.version = 11 : i64} {
  func.func @kernel(%arg0: i32, %arg1: memref<256x64xbf16, #tpu.memory_space<vmem>>, %arg2: memref<64x4xbf16, #tpu.memory_space<vmem>>, %arg3: memref<256x4xf32, #tpu.memory_space<vmem>>, %arg4: memref<3x8x4xf32, #tpu.memory_space<vmem>>) attributes {dimension_semantics = [#tpu.dimension_semantics<arbitrary>], iteration_bounds = array<i64: 2>, scalar_prefetch = 0 : i64, scratch_operands = 0 : i64, tpu.core_type = #tpu.core_type<tc>, window_params = [{transform_indices = @transform_0, window_bounds = array<i64: 256, 64>}, {pipeline_mode = #tpu.pipeline_mode<synchronous>, transform_indices = @transform_1, window_bounds = array<i64: 64, 4>}, {transform_indices = @transform_2, window_bounds = array<i64: 256, 4>}, {pipeline_mode = #tpu.pipeline_mode<synchronous>, transform_indices = @transform_3, window_bounds = array<i64: 3, 8, 4>}]} {
    %c0 = arith.constant 0 : index
    %c0_0 = arith.constant 0 : index
    %0 = vector.load %arg1[%c0, %c0_0] : memref<256x64xbf16, #tpu.memory_space<vmem>>, vector<256x64xbf16>
    %c0_1 = arith.constant 0 : index
    %c0_2 = arith.constant 0 : index
    %1 = vector.load %arg2[%c0_1, %c0_2] : memref<64x4xbf16, #tpu.memory_space<vmem>>, vector<64x4xbf16>
    %cst = arith.constant dense<0.000000e+00> : vector<256x4xf32>
    %2 = tpu.matmul %0, %1, %cst {dimension_numbers = #tpu.dot_dimension_numbers<[1], [0], [0], [1], [0, 0, 1, 1], [], []>} : vector<256x64xbf16>, vector<64x4xbf16>, vector<256x4xf32> -> vector<256x4xf32>
    %c0_3 = arith.constant 0 : index
    %c0_4 = arith.constant 0 : index
    %3 = vector.load %arg3[%c0_3, %c0_4] : memref<256x4xf32, #tpu.memory_space<vmem>>, vector<256x4xf32>
    tpu.vector_store %arg3[%c0_3, %c0_4], %2 {strides = array<i32>} : memref<256x4xf32, #tpu.memory_space<vmem>>, vector<256x4xf32>,
    %c0_i32 = arith.constant 0 : i32
    %4 = arith.cmpi eq, %arg0, %c0_i32 : i32
    %5 = arith.extui %4 : i1 to i32
    %c0_i32_5 = arith.constant 0 : i32
    %6 = arith.cmpi ne, %5, %c0_i32_5 : i32
    scf.if %6 {
      %cst_21 = arith.constant dense<0.000000e+00> : vector<4xf32>
      %165 = vector.multi_reduction <add>, %2, %cst_21 [0] : vector<256x4xf32> to vector<4xf32>
      %166 = vector.shape_cast %165 : vector<4xf32> to vector<1x4xf32>
      %cst_22 = arith.constant 3.906250e-03 : f32
      %167 = vector.broadcast %cst_22 : f32 to vector<1x4xf32>
      %168 = arith.mulf %166, %167 : vector<1x4xf32>
      %169 = vector.shape_cast %168 : vector<1x4xf32> to vector<1x4xf32>
      %170 = vector.broadcast %169 : vector<1x4xf32> to vector<8x4xf32>
      %c0_23 = arith.constant 0 : index
      %c0_24 = arith.constant 0 : index
      %c0_25 = arith.constant 0 : index
      %171 = vector.load %arg4[%c0_23, %c0_24, %c0_25] : memref<3x8x4xf32, #tpu.memory_space<vmem>>, vector<1x8x4xf32>
      %172 = vector.shape_cast %171 : vector<1x8x4xf32> to vector<8x4xf32>
      %173 = vector.shape_cast %170 : vector<8x4xf32> to vector<1x8x4xf32>
      tpu.vector_store %arg4[%c0_23, %c0_24, %c0_25], %173 {strides = array<i32>} : memref<3x8x4xf32, #tpu.memory_space<vmem>>, vector<1x8x4xf32>,
      %cst_26 = arith.constant 0.000000e+00 : f32
      %174 = vector.broadcast %cst_26 : f32 to vector<8x4xf32>
      %c1_27 = arith.constant 1 : index
      %c0_28 = arith.constant 0 : index
      %c0_29 = arith.constant 0 : index
      %175 = vector.load %arg4[%c1_27, %c0_28, %c0_29] : memref<3x8x4xf32, #tpu.memory_space<vmem>>, vector<1x8x4xf32>
      %176 = vector.shape_cast %175 : vector<1x8x4xf32> to vector<8x4xf32>
      %177 = vector.shape_cast %174 : vector<8x4xf32> to vector<1x8x4xf32>
      tpu.vector_store %arg4[%c1_27, %c0_28, %c0_29], %177 {strides = array<i32>} : memref<3x8x4xf32, #tpu.memory_space<vmem>>, vector<1x8x4xf32>,
      %cst_30 = arith.constant 0.000000e+00 : f32
      %178 = vector.broadcast %cst_30 : f32 to vector<8x4xf32>
      %c2_31 = arith.constant 2 : index
      %c0_32 = arith.constant 0 : index
      %c0_33 = arith.constant 0 : index
      %179 = vector.load %arg4[%c2_31, %c0_32, %c0_33] : memref<3x8x4xf32, #tpu.memory_space<vmem>>, vector<1x8x4xf32>
      %180 = vector.shape_cast %179 : vector<1x8x4xf32> to vector<8x4xf32>
      %181 = vector.shape_cast %178 : vector<8x4xf32> to vector<1x8x4xf32>
      tpu.vector_store %arg4[%c2_31, %c0_32, %c0_33], %181 {strides = array<i32>} : memref<3x8x4xf32, #tpu.memory_space<vmem>>, vector<1x8x4xf32>,
    } else {
    }
    %c0_6 = arith.constant 0 : index
    %c0_7 = arith.constant 0 : index
    %c0_8 = arith.constant 0 : index
    %7 = vector.load %arg4[%c0_6, %c0_7, %c0_8] : memref<3x8x4xf32, #tpu.memory_space<vmem>>, vector<1x8x4xf32>
    %8 = vector.shape_cast %7 : vector<1x8x4xf32> to vector<8x4xf32>
    %9 = vector.extract_strided_slice %8 {offsets = [0, 0], sizes = [1, 4], strides = [1, 1]} : vector<8x4xf32> to vector<1x4xf32>
    %10 = vector.broadcast %9 : vector<1x4xf32> to vector<256x4xf32>
    %11 = arith.subf %2, %10 : vector<256x4xf32>
    %c256_i32 = arith.constant 256 : i32
    %12 = arith.muli %arg0, %c256_i32 : i32
    %13 = tpu.iota {dimensions = array<i32: 0>} : vector<256x1xi32>
    %14 = vector.broadcast %12 : i32 to vector<256x1xi32>
    %15 = arith.addi %14, %13 : vector<256x1xi32>
    %c450_i32 = arith.constant 450 : i32
    %16 = vector.broadcast %c450_i32 : i32 to vector<256x1xi32>
    %17 = arith.cmpi slt, %15, %16 : vector<256x1xi32>
    %18 = arith.extui %17 : vector<256x1xi1> to vector<256x1xi32>
    %19 = arith.sitofp %18 : vector<256x1xi32> to vector<256x1xf32>
    %20 = vector.broadcast %19 : vector<256x1xf32> to vector<256x4xf32>
    %21 = arith.mulf %11, %20 : vector<256x4xf32>
    %22 = arith.mulf %21, %21 : vector<256x4xf32>
    %cst_9 = arith.constant 0.000000e+00 : f32
    %23 = vector.broadcast %cst_9 : f32 to vector<8x4xf32>
    %cst_10 = arith.constant 0.000000e+00 : f32
    %24 = vector.broadcast %cst_10 : f32 to vector<8x4xf32>
    %25 = vector.extract_strided_slice %21 {offsets = [0, 0], sizes = [8, 4], strides = [1, 1]} : vector<256x4xf32> to vector<8x4xf32>
    %26 = arith.addf %23, %25 : vector<8x4xf32>
    %27 = vector.extract_strided_slice %22 {offsets = [0, 0], sizes = [8, 4], strides = [1, 1]} : vector<256x4xf32> to vector<8x4xf32>
    %28 = arith.addf %24, %27 : vector<8x4xf32>
    %29 = vector.extract_strided_slice %21 {offsets = [8, 0], sizes = [8, 4], strides = [1, 1]} : vector<256x4xf32> to vector<8x4xf32>
    %30 = arith.addf %26, %29 : vector<8x4xf32>
    %31 = vector.extract_strided_slice %22 {offsets = [8, 0], sizes = [8, 4], strides = [1, 1]} : vector<256x4xf32> to vector<8x4xf32>
    %32 = arith.addf %28, %31 : vector<8x4xf32>
    %33 = vector.extract_strided_slice %21 {offsets = [16, 0], sizes = [8, 4], strides = [1, 1]} : vector<256x4xf32> to vector<8x4xf32>
    %34 = arith.addf %30, %33 : vector<8x4xf32>
    %35 = vector.extract_strided_slice %22 {offsets = [16, 0], sizes = [8, 4], strides = [1, 1]} : vector<256x4xf32> to vector<8x4xf32>
    %36 = arith.addf %32, %35 : vector<8x4xf32>
    %37 = vector.extract_strided_slice %21 {offsets = [24, 0], sizes = [8, 4], strides = [1, 1]} : vector<256x4xf32> to vector<8x4xf32>
    %38 = arith.addf %34, %37 : vector<8x4xf32>
    %39 = vector.extract_strided_slice %22 {offsets = [24, 0], sizes = [8, 4], strides = [1, 1]} : vector<256x4xf32> to vector<8x4xf32>
    %40 = arith.addf %36, %39 : vector<8x4xf32>
    %41 = vector.extract_strided_slice %21 {offsets = [32, 0], sizes = [8, 4], strides = [1, 1]} : vector<256x4xf32> to vector<8x4xf32>
    %42 = arith.addf %38, %41 : vector<8x4xf32>
    %43 = vector.extract_strided_slice %22 {offsets = [32, 0], sizes = [8, 4], strides = [1, 1]} : vector<256x4xf32> to vector<8x4xf32>
    %44 = arith.addf %40, %43 : vector<8x4xf32>
    %45 = vector.extract_strided_slice %21 {offsets = [40, 0], sizes = [8, 4], strides = [1, 1]} : vector<256x4xf32> to vector<8x4xf32>
    %46 = arith.addf %42, %45 : vector<8x4xf32>
    %47 = vector.extract_strided_slice %22 {offsets = [40, 0], sizes = [8, 4], strides = [1, 1]} : vector<256x4xf32> to vector<8x4xf32>
    %48 = arith.addf %44, %47 : vector<8x4xf32>
    %49 = vector.extract_strided_slice %21 {offsets = [48, 0], sizes = [8, 4], strides = [1, 1]} : vector<256x4xf32> to vector<8x4xf32>
    %50 = arith.addf %46, %49 : vector<8x4xf32>
    %51 = vector.extract_strided_slice %22 {offsets = [48, 0], sizes = [8, 4], strides = [1, 1]} : vector<256x4xf32> to vector<8x4xf32>
    %52 = arith.addf %48, %51 : vector<8x4xf32>
    %53 = vector.extract_strided_slice %21 {offsets = [56, 0], sizes = [8, 4], strides = [1, 1]} : vector<256x4xf32> to vector<8x4xf32>
    %54 = arith.addf %50, %53 : vector<8x4xf32>
    %55 = vector.extract_strided_slice %22 {offsets = [56, 0], sizes = [8, 4], strides = [1, 1]} : vector<256x4xf32> to vector<8x4xf32>
    %56 = arith.addf %52, %55 : vector<8x4xf32>
    %57 = vector.extract_strided_slice %21 {offsets = [64, 0], sizes = [8, 4], strides = [1, 1]} : vector<256x4xf32> to vector<8x4xf32>
    %58 = arith.addf %54, %57 : vector<8x4xf32>
    %59 = vector.extract_strided_slice %22 {offsets = [64, 0], sizes = [8, 4], strides = [1, 1]} : vector<256x4xf32> to vector<8x4xf32>
    %60 = arith.addf %56, %59 : vector<8x4xf32>
    %61 = vector.extract_strided_slice %21 {offsets = [72, 0], sizes = [8, 4], strides = [1, 1]} : vector<256x4xf32> to vector<8x4xf32>
    %62 = arith.addf %58, %61 : vector<8x4xf32>
    %63 = vector.extract_strided_slice %22 {offsets = [72, 0], sizes = [8, 4], strides = [1, 1]} : vector<256x4xf32> to vector<8x4xf32>
    %64 = arith.addf %60, %63 : vector<8x4xf32>
    %65 = vector.extract_strided_slice %21 {offsets = [80, 0], sizes = [8, 4], strides = [1, 1]} : vector<256x4xf32> to vector<8x4xf32>
    %66 = arith.addf %62, %65 : vector<8x4xf32>
    %67 = vector.extract_strided_slice %22 {offsets = [80, 0], sizes = [8, 4], strides = [1, 1]} : vector<256x4xf32> to vector<8x4xf32>
    %68 = arith.addf %64, %67 : vector<8x4xf32>
    %69 = vector.extract_strided_slice %21 {offsets = [88, 0], sizes = [8, 4], strides = [1, 1]} : vector<256x4xf32> to vector<8x4xf32>
    %70 = arith.addf %66, %69 : vector<8x4xf32>
    %71 = vector.extract_strided_slice %22 {offsets = [88, 0], sizes = [8, 4], strides = [1, 1]} : vector<256x4xf32> to vector<8x4xf32>
    %72 = arith.addf %68, %71 : vector<8x4xf32>
    %73 = vector.extract_strided_slice %21 {offsets = [96, 0], sizes = [8, 4], strides = [1, 1]} : vector<256x4xf32> to vector<8x4xf32>
    %74 = arith.addf %70, %73 : vector<8x4xf32>
    %75 = vector.extract_strided_slice %22 {offsets = [96, 0], sizes = [8, 4], strides = [1, 1]} : vector<256x4xf32> to vector<8x4xf32>
    %76 = arith.addf %72, %75 : vector<8x4xf32>
    %77 = vector.extract_strided_slice %21 {offsets = [104, 0], sizes = [8, 4], strides = [1, 1]} : vector<256x4xf32> to vector<8x4xf32>
    %78 = arith.addf %74, %77 : vector<8x4xf32>
    %79 = vector.extract_strided_slice %22 {offsets = [104, 0], sizes = [8, 4], strides = [1, 1]} : vector<256x4xf32> to vector<8x4xf32>
    %80 = arith.addf %76, %79 : vector<8x4xf32>
    %81 = vector.extract_strided_slice %21 {offsets = [112, 0], sizes = [8, 4], strides = [1, 1]} : vector<256x4xf32> to vector<8x4xf32>
    %82 = arith.addf %78, %81 : vector<8x4xf32>
    %83 = vector.extract_strided_slice %22 {offsets = [112, 0], sizes = [8, 4], strides = [1, 1]} : vector<256x4xf32> to vector<8x4xf32>
    %84 = arith.addf %80, %83 : vector<8x4xf32>
    %85 = vector.extract_strided_slice %21 {offsets = [120, 0], sizes = [8, 4], strides = [1, 1]} : vector<256x4xf32> to vector<8x4xf32>
    %86 = arith.addf %82, %85 : vector<8x4xf32>
    %87 = vector.extract_strided_slice %22 {offsets = [120, 0], sizes = [8, 4], strides = [1, 1]} : vector<256x4xf32> to vector<8x4xf32>
    %88 = arith.addf %84, %87 : vector<8x4xf32>
    %89 = vector.extract_strided_slice %21 {offsets = [128, 0], sizes = [8, 4], strides = [1, 1]} : vector<256x4xf32> to vector<8x4xf32>
    %90 = arith.addf %86, %89 : vector<8x4xf32>
    %91 = vector.extract_strided_slice %22 {offsets = [128, 0], sizes = [8, 4], strides = [1, 1]} : vector<256x4xf32> to vector<8x4xf32>
    %92 = arith.addf %88, %91 : vector<8x4xf32>
    %93 = vector.extract_strided_slice %21 {offsets = [136, 0], sizes = [8, 4], strides = [1, 1]} : vector<256x4xf32> to vector<8x4xf32>
    %94 = arith.addf %90, %93 : vector<8x4xf32>
    %95 = vector.extract_strided_slice %22 {offsets = [136, 0], sizes = [8, 4], strides = [1, 1]} : vector<256x4xf32> to vector<8x4xf32>
    %96 = arith.addf %92, %95 : vector<8x4xf32>
    %97 = vector.extract_strided_slice %21 {offsets = [144, 0], sizes = [8, 4], strides = [1, 1]} : vector<256x4xf32> to vector<8x4xf32>
    %98 = arith.addf %94, %97 : vector<8x4xf32>
    %99 = vector.extract_strided_slice %22 {offsets = [144, 0], sizes = [8, 4], strides = [1, 1]} : vector<256x4xf32> to vector<8x4xf32>
    %100 = arith.addf %96, %99 : vector<8x4xf32>
    %101 = vector.extract_strided_slice %21 {offsets = [152, 0], sizes = [8, 4], strides = [1, 1]} : vector<256x4xf32> to vector<8x4xf32>
    %102 = arith.addf %98, %101 : vector<8x4xf32>
    %103 = vector.extract_strided_slice %22 {offsets = [152, 0], sizes = [8, 4], strides = [1, 1]} : vector<256x4xf32> to vector<8x4xf32>
    %104 = arith.addf %100, %103 : vector<8x4xf32>
    %105 = vector.extract_strided_slice %21 {offsets = [160, 0], sizes = [8, 4], strides = [1, 1]} : vector<256x4xf32> to vector<8x4xf32>
    %106 = arith.addf %102, %105 : vector<8x4xf32>
    %107 = vector.extract_strided_slice %22 {offsets = [160, 0], sizes = [8, 4], strides = [1, 1]} : vector<256x4xf32> to vector<8x4xf32>
    %108 = arith.addf %104, %107 : vector<8x4xf32>
    %109 = vector.extract_strided_slice %21 {offsets = [168, 0], sizes = [8, 4], strides = [1, 1]} : vector<256x4xf32> to vector<8x4xf32>
    %110 = arith.addf %106, %109 : vector<8x4xf32>
    %111 = vector.extract_strided_slice %22 {offsets = [168, 0], sizes = [8, 4], strides = [1, 1]} : vector<256x4xf32> to vector<8x4xf32>
    %112 = arith.addf %108, %111 : vector<8x4xf32>
    %113 = vector.extract_strided_slice %21 {offsets = [176, 0], sizes = [8, 4], strides = [1, 1]} : vector<256x4xf32> to vector<8x4xf32>
    %114 = arith.addf %110, %113 : vector<8x4xf32>
    %115 = vector.extract_strided_slice %22 {offsets = [176, 0], sizes = [8, 4], strides = [1, 1]} : vector<256x4xf32> to vector<8x4xf32>
    %116 = arith.addf %112, %115 : vector<8x4xf32>
    %117 = vector.extract_strided_slice %21 {offsets = [184, 0], sizes = [8, 4], strides = [1, 1]} : vector<256x4xf32> to vector<8x4xf32>
    %118 = arith.addf %114, %117 : vector<8x4xf32>
    %119 = vector.extract_strided_slice %22 {offsets = [184, 0], sizes = [8, 4], strides = [1, 1]} : vector<256x4xf32> to vector<8x4xf32>
    %120 = arith.addf %116, %119 : vector<8x4xf32>
    %121 = vector.extract_strided_slice %21 {offsets = [192, 0], sizes = [8, 4], strides = [1, 1]} : vector<256x4xf32> to vector<8x4xf32>
    %122 = arith.addf %118, %121 : vector<8x4xf32>
    %123 = vector.extract_strided_slice %22 {offsets = [192, 0], sizes = [8, 4], strides = [1, 1]} : vector<256x4xf32> to vector<8x4xf32>
    %124 = arith.addf %120, %123 : vector<8x4xf32>
    %125 = vector.extract_strided_slice %21 {offsets = [200, 0], sizes = [8, 4], strides = [1, 1]} : vector<256x4xf32> to vector<8x4xf32>
    %126 = arith.addf %122, %125 : vector<8x4xf32>
    %127 = vector.extract_strided_slice %22 {offsets = [200, 0], sizes = [8, 4], strides = [1, 1]} : vector<256x4xf32> to vector<8x4xf32>
    %128 = arith.addf %124, %127 : vector<8x4xf32>
    %129 = vector.extract_strided_slice %21 {offsets = [208, 0], sizes = [8, 4], strides = [1, 1]} : vector<256x4xf32> to vector<8x4xf32>
    %130 = arith.addf %126, %129 : vector<8x4xf32>
    %131 = vector.extract_strided_slice %22 {offsets = [208, 0], sizes = [8, 4], strides = [1, 1]} : vector<256x4xf32> to vector<8x4xf32>
    %132 = arith.addf %128, %131 : vector<8x4xf32>
    %133 = vector.extract_strided_slice %21 {offsets = [216, 0], sizes = [8, 4], strides = [1, 1]} : vector<256x4xf32> to vector<8x4xf32>
    %134 = arith.addf %130, %133 : vector<8x4xf32>
    %135 = vector.extract_strided_slice %22 {offsets = [216, 0], sizes = [8, 4], strides = [1, 1]} : vector<256x4xf32> to vector<8x4xf32>
    %136 = arith.addf %132, %135 : vector<8x4xf32>
    %137 = vector.extract_strided_slice %21 {offsets = [224, 0], sizes = [8, 4], strides = [1, 1]} : vector<256x4xf32> to vector<8x4xf32>
    %138 = arith.addf %134, %137 : vector<8x4xf32>
    %139 = vector.extract_strided_slice %22 {offsets = [224, 0], sizes = [8, 4], strides = [1, 1]} : vector<256x4xf32> to vector<8x4xf32>
    %140 = arith.addf %136, %139 : vector<8x4xf32>
    %141 = vector.extract_strided_slice %21 {offsets = [232, 0], sizes = [8, 4], strides = [1, 1]} : vector<256x4xf32> to vector<8x4xf32>
    %142 = arith.addf %138, %141 : vector<8x4xf32>
    %143 = vector.extract_strided_slice %22 {offsets = [232, 0], sizes = [8, 4], strides = [1, 1]} : vector<256x4xf32> to vector<8x4xf32>
    %144 = arith.addf %140, %143 : vector<8x4xf32>
    %145 = vector.extract_strided_slice %21 {offsets = [240, 0], sizes = [8, 4], strides = [1, 1]} : vector<256x4xf32> to vector<8x4xf32>
    %146 = arith.addf %142, %145 : vector<8x4xf32>
    %147 = vector.extract_strided_slice %22 {offsets = [240, 0], sizes = [8, 4], strides = [1, 1]} : vector<256x4xf32> to vector<8x4xf32>
    %148 = arith.addf %144, %147 : vector<8x4xf32>
    %149 = vector.extract_strided_slice %21 {offsets = [248, 0], sizes = [8, 4], strides = [1, 1]} : vector<256x4xf32> to vector<8x4xf32>
    %150 = arith.addf %146, %149 : vector<8x4xf32>
    %151 = vector.extract_strided_slice %22 {offsets = [248, 0], sizes = [8, 4], strides = [1, 1]} : vector<256x4xf32> to vector<8x4xf32>
    %152 = arith.addf %148, %151 : vector<8x4xf32>
    %c1 = arith.constant 1 : index
    %c0_11 = arith.constant 0 : index
    %c0_12 = arith.constant 0 : index
    %153 = vector.load %arg4[%c1, %c0_11, %c0_12] : memref<3x8x4xf32, #tpu.memory_space<vmem>>, vector<1x8x4xf32>
    %154 = vector.shape_cast %153 : vector<1x8x4xf32> to vector<8x4xf32>
    %155 = arith.addf %154, %150 : vector<8x4xf32>
    %c1_13 = arith.constant 1 : index
    %c0_14 = arith.constant 0 : index
    %c0_15 = arith.constant 0 : index
    %156 = vector.load %arg4[%c1_13, %c0_14, %c0_15] : memref<3x8x4xf32, #tpu.memory_space<vmem>>, vector<1x8x4xf32>
    %157 = vector.shape_cast %156 : vector<1x8x4xf32> to vector<8x4xf32>
    %158 = vector.shape_cast %155 : vector<8x4xf32> to vector<1x8x4xf32>
    tpu.vector_store %arg4[%c1_13, %c0_14, %c0_15], %158 {strides = array<i32>} : memref<3x8x4xf32, #tpu.memory_space<vmem>>, vector<1x8x4xf32>,
    %c2 = arith.constant 2 : index
    %c0_16 = arith.constant 0 : index
    %c0_17 = arith.constant 0 : index
    %159 = vector.load %arg4[%c2, %c0_16, %c0_17] : memref<3x8x4xf32, #tpu.memory_space<vmem>>, vector<1x8x4xf32>
    %160 = vector.shape_cast %159 : vector<1x8x4xf32> to vector<8x4xf32>
    %161 = arith.addf %160, %152 : vector<8x4xf32>
    %c2_18 = arith.constant 2 : index
    %c0_19 = arith.constant 0 : index
    %c0_20 = arith.constant 0 : index
    %162 = vector.load %arg4[%c2_18, %c0_19, %c0_20] : memref<3x8x4xf32, #tpu.memory_space<vmem>>, vector<1x8x4xf32>
    %163 = vector.shape_cast %162 : vector<1x8x4xf32> to vector<8x4xf32>
    %164 = vector.shape_cast %161 : vector<8x4xf32> to vector<1x8x4xf32>
    tpu.vector_store %arg4[%c2_18, %c0_19, %c0_20], %164 {strides = array<i32>} : memref<3x8x4xf32, #tpu.memory_space<vmem>>, vector<1x8x4xf32>,
    return
  }
  func.func @transform_0(%arg0: i32) -> (i32, i32) {
    %c0_i32 = arith.constant 0 : i32
    %c0_i32_0 = arith.constant 0 : i32
    return %arg0, %c0_i32 : i32, i32
  }
  func.func @transform_1(%arg0: i32) -> (i32, i32) {
    %c0_i32 = arith.constant 0 : i32
    %c0_i32_0 = arith.constant 0 : i32
    %c0_i32_1 = arith.constant 0 : i32
    return %c0_i32, %c0_i32_0 : i32, i32
  }
  func.func @transform_2(%arg0: i32) -> (i32, i32) {
    %c0_i32 = arith.constant 0 : i32
    %c0_i32_0 = arith.constant 0 : i32
    return %arg0, %c0_i32 : i32, i32
  }
  func.func @transform_3(%arg0: i32) -> (i32, i32, i32) {
    %c0_i32 = arith.constant 0 : i32
    %c0_i32_0 = arith.constant 0 : i32
    %c0_i32_1 = arith.constant 0 : i32
    %c0_i32_2 = arith.constant 0 : i32
    return %c0_i32, %c0_i32_0, %c0_i32_1 : i32, i32, i32
  }
}

module attributes {stable_mosaic.version = 11 : i64} {
  func.func @kernel(%arg0: i32, %arg1: memref<256x4xbf16, #tpu.memory_space<vmem>>, %arg2: memref<4x16xbf16, #tpu.memory_space<vmem>>, %arg3: memref<256x16xf32, #tpu.memory_space<vmem>>, %arg4: memref<3x8x16xf32, #tpu.memory_space<vmem>>) attributes {dimension_semantics = [#tpu.dimension_semantics<arbitrary>], iteration_bounds = array<i64: 2>, scalar_prefetch = 0 : i64, scratch_operands = 0 : i64, tpu.core_type = #tpu.core_type<tc>, window_params = [{transform_indices = @transform_0, window_bounds = array<i64: 256, 4>}, {pipeline_mode = #tpu.pipeline_mode<synchronous>, transform_indices = @transform_1, window_bounds = array<i64: 4, 16>}, {transform_indices = @transform_2, window_bounds = array<i64: 256, 16>}, {pipeline_mode = #tpu.pipeline_mode<synchronous>, transform_indices = @transform_3, window_bounds = array<i64: 3, 8, 16>}]} {
    %c0 = arith.constant 0 : index
    %c0_0 = arith.constant 0 : index
    %0 = vector.load %arg1[%c0, %c0_0] : memref<256x4xbf16, #tpu.memory_space<vmem>>, vector<256x4xbf16>
    %c0_1 = arith.constant 0 : index
    %c0_2 = arith.constant 0 : index
    %1 = vector.load %arg2[%c0_1, %c0_2] : memref<4x16xbf16, #tpu.memory_space<vmem>>, vector<4x16xbf16>
    %cst = arith.constant dense<0.000000e+00> : vector<256x16xf32>
    %2 = tpu.matmul %0, %1, %cst {dimension_numbers = #tpu.dot_dimension_numbers<[1], [0], [0], [1], [0, 0, 1, 1], [], []>} : vector<256x4xbf16>, vector<4x16xbf16>, vector<256x16xf32> -> vector<256x16xf32>
    %c0_3 = arith.constant 0 : index
    %c0_4 = arith.constant 0 : index
    %3 = vector.load %arg3[%c0_3, %c0_4] : memref<256x16xf32, #tpu.memory_space<vmem>>, vector<256x16xf32>
    tpu.vector_store %arg3[%c0_3, %c0_4], %2 {strides = array<i32>} : memref<256x16xf32, #tpu.memory_space<vmem>>, vector<256x16xf32>,
    %c0_i32 = arith.constant 0 : i32
    %4 = arith.cmpi eq, %arg0, %c0_i32 : i32
    %5 = arith.extui %4 : i1 to i32
    %c0_i32_5 = arith.constant 0 : i32
    %6 = arith.cmpi ne, %5, %c0_i32_5 : i32
    scf.if %6 {
      %cst_21 = arith.constant dense<0.000000e+00> : vector<16xf32>
      %165 = vector.multi_reduction <add>, %2, %cst_21 [0] : vector<256x16xf32> to vector<16xf32>
      %166 = vector.shape_cast %165 : vector<16xf32> to vector<1x16xf32>
      %cst_22 = arith.constant 3.906250e-03 : f32
      %167 = vector.broadcast %cst_22 : f32 to vector<1x16xf32>
      %168 = arith.mulf %166, %167 : vector<1x16xf32>
      %169 = vector.shape_cast %168 : vector<1x16xf32> to vector<1x16xf32>
      %170 = vector.broadcast %169 : vector<1x16xf32> to vector<8x16xf32>
      %c0_23 = arith.constant 0 : index
      %c0_24 = arith.constant 0 : index
      %c0_25 = arith.constant 0 : index
      %171 = vector.load %arg4[%c0_23, %c0_24, %c0_25] : memref<3x8x16xf32, #tpu.memory_space<vmem>>, vector<1x8x16xf32>
      %172 = vector.shape_cast %171 : vector<1x8x16xf32> to vector<8x16xf32>
      %173 = vector.shape_cast %170 : vector<8x16xf32> to vector<1x8x16xf32>
      tpu.vector_store %arg4[%c0_23, %c0_24, %c0_25], %173 {strides = array<i32>} : memref<3x8x16xf32, #tpu.memory_space<vmem>>, vector<1x8x16xf32>,
      %cst_26 = arith.constant 0.000000e+00 : f32
      %174 = vector.broadcast %cst_26 : f32 to vector<8x16xf32>
      %c1_27 = arith.constant 1 : index
      %c0_28 = arith.constant 0 : index
      %c0_29 = arith.constant 0 : index
      %175 = vector.load %arg4[%c1_27, %c0_28, %c0_29] : memref<3x8x16xf32, #tpu.memory_space<vmem>>, vector<1x8x16xf32>
      %176 = vector.shape_cast %175 : vector<1x8x16xf32> to vector<8x16xf32>
      %177 = vector.shape_cast %174 : vector<8x16xf32> to vector<1x8x16xf32>
      tpu.vector_store %arg4[%c1_27, %c0_28, %c0_29], %177 {strides = array<i32>} : memref<3x8x16xf32, #tpu.memory_space<vmem>>, vector<1x8x16xf32>,
      %cst_30 = arith.constant 0.000000e+00 : f32
      %178 = vector.broadcast %cst_30 : f32 to vector<8x16xf32>
      %c2_31 = arith.constant 2 : index
      %c0_32 = arith.constant 0 : index
      %c0_33 = arith.constant 0 : index
      %179 = vector.load %arg4[%c2_31, %c0_32, %c0_33] : memref<3x8x16xf32, #tpu.memory_space<vmem>>, vector<1x8x16xf32>
      %180 = vector.shape_cast %179 : vector<1x8x16xf32> to vector<8x16xf32>
      %181 = vector.shape_cast %178 : vector<8x16xf32> to vector<1x8x16xf32>
      tpu.vector_store %arg4[%c2_31, %c0_32, %c0_33], %181 {strides = array<i32>} : memref<3x8x16xf32, #tpu.memory_space<vmem>>, vector<1x8x16xf32>,
    } else {
    }
    %c0_6 = arith.constant 0 : index
    %c0_7 = arith.constant 0 : index
    %c0_8 = arith.constant 0 : index
    %7 = vector.load %arg4[%c0_6, %c0_7, %c0_8] : memref<3x8x16xf32, #tpu.memory_space<vmem>>, vector<1x8x16xf32>
    %8 = vector.shape_cast %7 : vector<1x8x16xf32> to vector<8x16xf32>
    %9 = vector.extract_strided_slice %8 {offsets = [0, 0], sizes = [1, 16], strides = [1, 1]} : vector<8x16xf32> to vector<1x16xf32>
    %10 = vector.broadcast %9 : vector<1x16xf32> to vector<256x16xf32>
    %11 = arith.subf %2, %10 : vector<256x16xf32>
    %c256_i32 = arith.constant 256 : i32
    %12 = arith.muli %arg0, %c256_i32 : i32
    %13 = tpu.iota {dimensions = array<i32: 0>} : vector<256x1xi32>
    %14 = vector.broadcast %12 : i32 to vector<256x1xi32>
    %15 = arith.addi %14, %13 : vector<256x1xi32>
    %c450_i32 = arith.constant 450 : i32
    %16 = vector.broadcast %c450_i32 : i32 to vector<256x1xi32>
    %17 = arith.cmpi slt, %15, %16 : vector<256x1xi32>
    %18 = arith.extui %17 : vector<256x1xi1> to vector<256x1xi32>
    %19 = arith.sitofp %18 : vector<256x1xi32> to vector<256x1xf32>
    %20 = vector.broadcast %19 : vector<256x1xf32> to vector<256x16xf32>
    %21 = arith.mulf %11, %20 : vector<256x16xf32>
    %22 = arith.mulf %21, %21 : vector<256x16xf32>
    %cst_9 = arith.constant 0.000000e+00 : f32
    %23 = vector.broadcast %cst_9 : f32 to vector<8x16xf32>
    %cst_10 = arith.constant 0.000000e+00 : f32
    %24 = vector.broadcast %cst_10 : f32 to vector<8x16xf32>
    %25 = vector.extract_strided_slice %21 {offsets = [0, 0], sizes = [8, 16], strides = [1, 1]} : vector<256x16xf32> to vector<8x16xf32>
    %26 = arith.addf %23, %25 : vector<8x16xf32>
    %27 = vector.extract_strided_slice %22 {offsets = [0, 0], sizes = [8, 16], strides = [1, 1]} : vector<256x16xf32> to vector<8x16xf32>
    %28 = arith.addf %24, %27 : vector<8x16xf32>
    %29 = vector.extract_strided_slice %21 {offsets = [8, 0], sizes = [8, 16], strides = [1, 1]} : vector<256x16xf32> to vector<8x16xf32>
    %30 = arith.addf %26, %29 : vector<8x16xf32>
    %31 = vector.extract_strided_slice %22 {offsets = [8, 0], sizes = [8, 16], strides = [1, 1]} : vector<256x16xf32> to vector<8x16xf32>
    %32 = arith.addf %28, %31 : vector<8x16xf32>
    %33 = vector.extract_strided_slice %21 {offsets = [16, 0], sizes = [8, 16], strides = [1, 1]} : vector<256x16xf32> to vector<8x16xf32>
    %34 = arith.addf %30, %33 : vector<8x16xf32>
    %35 = vector.extract_strided_slice %22 {offsets = [16, 0], sizes = [8, 16], strides = [1, 1]} : vector<256x16xf32> to vector<8x16xf32>
    %36 = arith.addf %32, %35 : vector<8x16xf32>
    %37 = vector.extract_strided_slice %21 {offsets = [24, 0], sizes = [8, 16], strides = [1, 1]} : vector<256x16xf32> to vector<8x16xf32>
    %38 = arith.addf %34, %37 : vector<8x16xf32>
    %39 = vector.extract_strided_slice %22 {offsets = [24, 0], sizes = [8, 16], strides = [1, 1]} : vector<256x16xf32> to vector<8x16xf32>
    %40 = arith.addf %36, %39 : vector<8x16xf32>
    %41 = vector.extract_strided_slice %21 {offsets = [32, 0], sizes = [8, 16], strides = [1, 1]} : vector<256x16xf32> to vector<8x16xf32>
    %42 = arith.addf %38, %41 : vector<8x16xf32>
    %43 = vector.extract_strided_slice %22 {offsets = [32, 0], sizes = [8, 16], strides = [1, 1]} : vector<256x16xf32> to vector<8x16xf32>
    %44 = arith.addf %40, %43 : vector<8x16xf32>
    %45 = vector.extract_strided_slice %21 {offsets = [40, 0], sizes = [8, 16], strides = [1, 1]} : vector<256x16xf32> to vector<8x16xf32>
    %46 = arith.addf %42, %45 : vector<8x16xf32>
    %47 = vector.extract_strided_slice %22 {offsets = [40, 0], sizes = [8, 16], strides = [1, 1]} : vector<256x16xf32> to vector<8x16xf32>
    %48 = arith.addf %44, %47 : vector<8x16xf32>
    %49 = vector.extract_strided_slice %21 {offsets = [48, 0], sizes = [8, 16], strides = [1, 1]} : vector<256x16xf32> to vector<8x16xf32>
    %50 = arith.addf %46, %49 : vector<8x16xf32>
    %51 = vector.extract_strided_slice %22 {offsets = [48, 0], sizes = [8, 16], strides = [1, 1]} : vector<256x16xf32> to vector<8x16xf32>
    %52 = arith.addf %48, %51 : vector<8x16xf32>
    %53 = vector.extract_strided_slice %21 {offsets = [56, 0], sizes = [8, 16], strides = [1, 1]} : vector<256x16xf32> to vector<8x16xf32>
    %54 = arith.addf %50, %53 : vector<8x16xf32>
    %55 = vector.extract_strided_slice %22 {offsets = [56, 0], sizes = [8, 16], strides = [1, 1]} : vector<256x16xf32> to vector<8x16xf32>
    %56 = arith.addf %52, %55 : vector<8x16xf32>
    %57 = vector.extract_strided_slice %21 {offsets = [64, 0], sizes = [8, 16], strides = [1, 1]} : vector<256x16xf32> to vector<8x16xf32>
    %58 = arith.addf %54, %57 : vector<8x16xf32>
    %59 = vector.extract_strided_slice %22 {offsets = [64, 0], sizes = [8, 16], strides = [1, 1]} : vector<256x16xf32> to vector<8x16xf32>
    %60 = arith.addf %56, %59 : vector<8x16xf32>
    %61 = vector.extract_strided_slice %21 {offsets = [72, 0], sizes = [8, 16], strides = [1, 1]} : vector<256x16xf32> to vector<8x16xf32>
    %62 = arith.addf %58, %61 : vector<8x16xf32>
    %63 = vector.extract_strided_slice %22 {offsets = [72, 0], sizes = [8, 16], strides = [1, 1]} : vector<256x16xf32> to vector<8x16xf32>
    %64 = arith.addf %60, %63 : vector<8x16xf32>
    %65 = vector.extract_strided_slice %21 {offsets = [80, 0], sizes = [8, 16], strides = [1, 1]} : vector<256x16xf32> to vector<8x16xf32>
    %66 = arith.addf %62, %65 : vector<8x16xf32>
    %67 = vector.extract_strided_slice %22 {offsets = [80, 0], sizes = [8, 16], strides = [1, 1]} : vector<256x16xf32> to vector<8x16xf32>
    %68 = arith.addf %64, %67 : vector<8x16xf32>
    %69 = vector.extract_strided_slice %21 {offsets = [88, 0], sizes = [8, 16], strides = [1, 1]} : vector<256x16xf32> to vector<8x16xf32>
    %70 = arith.addf %66, %69 : vector<8x16xf32>
    %71 = vector.extract_strided_slice %22 {offsets = [88, 0], sizes = [8, 16], strides = [1, 1]} : vector<256x16xf32> to vector<8x16xf32>
    %72 = arith.addf %68, %71 : vector<8x16xf32>
    %73 = vector.extract_strided_slice %21 {offsets = [96, 0], sizes = [8, 16], strides = [1, 1]} : vector<256x16xf32> to vector<8x16xf32>
    %74 = arith.addf %70, %73 : vector<8x16xf32>
    %75 = vector.extract_strided_slice %22 {offsets = [96, 0], sizes = [8, 16], strides = [1, 1]} : vector<256x16xf32> to vector<8x16xf32>
    %76 = arith.addf %72, %75 : vector<8x16xf32>
    %77 = vector.extract_strided_slice %21 {offsets = [104, 0], sizes = [8, 16], strides = [1, 1]} : vector<256x16xf32> to vector<8x16xf32>
    %78 = arith.addf %74, %77 : vector<8x16xf32>
    %79 = vector.extract_strided_slice %22 {offsets = [104, 0], sizes = [8, 16], strides = [1, 1]} : vector<256x16xf32> to vector<8x16xf32>
    %80 = arith.addf %76, %79 : vector<8x16xf32>
    %81 = vector.extract_strided_slice %21 {offsets = [112, 0], sizes = [8, 16], strides = [1, 1]} : vector<256x16xf32> to vector<8x16xf32>
    %82 = arith.addf %78, %81 : vector<8x16xf32>
    %83 = vector.extract_strided_slice %22 {offsets = [112, 0], sizes = [8, 16], strides = [1, 1]} : vector<256x16xf32> to vector<8x16xf32>
    %84 = arith.addf %80, %83 : vector<8x16xf32>
    %85 = vector.extract_strided_slice %21 {offsets = [120, 0], sizes = [8, 16], strides = [1, 1]} : vector<256x16xf32> to vector<8x16xf32>
    %86 = arith.addf %82, %85 : vector<8x16xf32>
    %87 = vector.extract_strided_slice %22 {offsets = [120, 0], sizes = [8, 16], strides = [1, 1]} : vector<256x16xf32> to vector<8x16xf32>
    %88 = arith.addf %84, %87 : vector<8x16xf32>
    %89 = vector.extract_strided_slice %21 {offsets = [128, 0], sizes = [8, 16], strides = [1, 1]} : vector<256x16xf32> to vector<8x16xf32>
    %90 = arith.addf %86, %89 : vector<8x16xf32>
    %91 = vector.extract_strided_slice %22 {offsets = [128, 0], sizes = [8, 16], strides = [1, 1]} : vector<256x16xf32> to vector<8x16xf32>
    %92 = arith.addf %88, %91 : vector<8x16xf32>
    %93 = vector.extract_strided_slice %21 {offsets = [136, 0], sizes = [8, 16], strides = [1, 1]} : vector<256x16xf32> to vector<8x16xf32>
    %94 = arith.addf %90, %93 : vector<8x16xf32>
    %95 = vector.extract_strided_slice %22 {offsets = [136, 0], sizes = [8, 16], strides = [1, 1]} : vector<256x16xf32> to vector<8x16xf32>
    %96 = arith.addf %92, %95 : vector<8x16xf32>
    %97 = vector.extract_strided_slice %21 {offsets = [144, 0], sizes = [8, 16], strides = [1, 1]} : vector<256x16xf32> to vector<8x16xf32>
    %98 = arith.addf %94, %97 : vector<8x16xf32>
    %99 = vector.extract_strided_slice %22 {offsets = [144, 0], sizes = [8, 16], strides = [1, 1]} : vector<256x16xf32> to vector<8x16xf32>
    %100 = arith.addf %96, %99 : vector<8x16xf32>
    %101 = vector.extract_strided_slice %21 {offsets = [152, 0], sizes = [8, 16], strides = [1, 1]} : vector<256x16xf32> to vector<8x16xf32>
    %102 = arith.addf %98, %101 : vector<8x16xf32>
    %103 = vector.extract_strided_slice %22 {offsets = [152, 0], sizes = [8, 16], strides = [1, 1]} : vector<256x16xf32> to vector<8x16xf32>
    %104 = arith.addf %100, %103 : vector<8x16xf32>
    %105 = vector.extract_strided_slice %21 {offsets = [160, 0], sizes = [8, 16], strides = [1, 1]} : vector<256x16xf32> to vector<8x16xf32>
    %106 = arith.addf %102, %105 : vector<8x16xf32>
    %107 = vector.extract_strided_slice %22 {offsets = [160, 0], sizes = [8, 16], strides = [1, 1]} : vector<256x16xf32> to vector<8x16xf32>
    %108 = arith.addf %104, %107 : vector<8x16xf32>
    %109 = vector.extract_strided_slice %21 {offsets = [168, 0], sizes = [8, 16], strides = [1, 1]} : vector<256x16xf32> to vector<8x16xf32>
    %110 = arith.addf %106, %109 : vector<8x16xf32>
    %111 = vector.extract_strided_slice %22 {offsets = [168, 0], sizes = [8, 16], strides = [1, 1]} : vector<256x16xf32> to vector<8x16xf32>
    %112 = arith.addf %108, %111 : vector<8x16xf32>
    %113 = vector.extract_strided_slice %21 {offsets = [176, 0], sizes = [8, 16], strides = [1, 1]} : vector<256x16xf32> to vector<8x16xf32>
    %114 = arith.addf %110, %113 : vector<8x16xf32>
    %115 = vector.extract_strided_slice %22 {offsets = [176, 0], sizes = [8, 16], strides = [1, 1]} : vector<256x16xf32> to vector<8x16xf32>
    %116 = arith.addf %112, %115 : vector<8x16xf32>
    %117 = vector.extract_strided_slice %21 {offsets = [184, 0], sizes = [8, 16], strides = [1, 1]} : vector<256x16xf32> to vector<8x16xf32>
    %118 = arith.addf %114, %117 : vector<8x16xf32>
    %119 = vector.extract_strided_slice %22 {offsets = [184, 0], sizes = [8, 16], strides = [1, 1]} : vector<256x16xf32> to vector<8x16xf32>
    %120 = arith.addf %116, %119 : vector<8x16xf32>
    %121 = vector.extract_strided_slice %21 {offsets = [192, 0], sizes = [8, 16], strides = [1, 1]} : vector<256x16xf32> to vector<8x16xf32>
    %122 = arith.addf %118, %121 : vector<8x16xf32>
    %123 = vector.extract_strided_slice %22 {offsets = [192, 0], sizes = [8, 16], strides = [1, 1]} : vector<256x16xf32> to vector<8x16xf32>
    %124 = arith.addf %120, %123 : vector<8x16xf32>
    %125 = vector.extract_strided_slice %21 {offsets = [200, 0], sizes = [8, 16], strides = [1, 1]} : vector<256x16xf32> to vector<8x16xf32>
    %126 = arith.addf %122, %125 : vector<8x16xf32>
    %127 = vector.extract_strided_slice %22 {offsets = [200, 0], sizes = [8, 16], strides = [1, 1]} : vector<256x16xf32> to vector<8x16xf32>
    %128 = arith.addf %124, %127 : vector<8x16xf32>
    %129 = vector.extract_strided_slice %21 {offsets = [208, 0], sizes = [8, 16], strides = [1, 1]} : vector<256x16xf32> to vector<8x16xf32>
    %130 = arith.addf %126, %129 : vector<8x16xf32>
    %131 = vector.extract_strided_slice %22 {offsets = [208, 0], sizes = [8, 16], strides = [1, 1]} : vector<256x16xf32> to vector<8x16xf32>
    %132 = arith.addf %128, %131 : vector<8x16xf32>
    %133 = vector.extract_strided_slice %21 {offsets = [216, 0], sizes = [8, 16], strides = [1, 1]} : vector<256x16xf32> to vector<8x16xf32>
    %134 = arith.addf %130, %133 : vector<8x16xf32>
    %135 = vector.extract_strided_slice %22 {offsets = [216, 0], sizes = [8, 16], strides = [1, 1]} : vector<256x16xf32> to vector<8x16xf32>
    %136 = arith.addf %132, %135 : vector<8x16xf32>
    %137 = vector.extract_strided_slice %21 {offsets = [224, 0], sizes = [8, 16], strides = [1, 1]} : vector<256x16xf32> to vector<8x16xf32>
    %138 = arith.addf %134, %137 : vector<8x16xf32>
    %139 = vector.extract_strided_slice %22 {offsets = [224, 0], sizes = [8, 16], strides = [1, 1]} : vector<256x16xf32> to vector<8x16xf32>
    %140 = arith.addf %136, %139 : vector<8x16xf32>
    %141 = vector.extract_strided_slice %21 {offsets = [232, 0], sizes = [8, 16], strides = [1, 1]} : vector<256x16xf32> to vector<8x16xf32>
    %142 = arith.addf %138, %141 : vector<8x16xf32>
    %143 = vector.extract_strided_slice %22 {offsets = [232, 0], sizes = [8, 16], strides = [1, 1]} : vector<256x16xf32> to vector<8x16xf32>
    %144 = arith.addf %140, %143 : vector<8x16xf32>
    %145 = vector.extract_strided_slice %21 {offsets = [240, 0], sizes = [8, 16], strides = [1, 1]} : vector<256x16xf32> to vector<8x16xf32>
    %146 = arith.addf %142, %145 : vector<8x16xf32>
    %147 = vector.extract_strided_slice %22 {offsets = [240, 0], sizes = [8, 16], strides = [1, 1]} : vector<256x16xf32> to vector<8x16xf32>
    %148 = arith.addf %144, %147 : vector<8x16xf32>
    %149 = vector.extract_strided_slice %21 {offsets = [248, 0], sizes = [8, 16], strides = [1, 1]} : vector<256x16xf32> to vector<8x16xf32>
    %150 = arith.addf %146, %149 : vector<8x16xf32>
    %151 = vector.extract_strided_slice %22 {offsets = [248, 0], sizes = [8, 16], strides = [1, 1]} : vector<256x16xf32> to vector<8x16xf32>
    %152 = arith.addf %148, %151 : vector<8x16xf32>
    %c1 = arith.constant 1 : index
    %c0_11 = arith.constant 0 : index
    %c0_12 = arith.constant 0 : index
    %153 = vector.load %arg4[%c1, %c0_11, %c0_12] : memref<3x8x16xf32, #tpu.memory_space<vmem>>, vector<1x8x16xf32>
    %154 = vector.shape_cast %153 : vector<1x8x16xf32> to vector<8x16xf32>
    %155 = arith.addf %154, %150 : vector<8x16xf32>
    %c1_13 = arith.constant 1 : index
    %c0_14 = arith.constant 0 : index
    %c0_15 = arith.constant 0 : index
    %156 = vector.load %arg4[%c1_13, %c0_14, %c0_15] : memref<3x8x16xf32, #tpu.memory_space<vmem>>, vector<1x8x16xf32>
    %157 = vector.shape_cast %156 : vector<1x8x16xf32> to vector<8x16xf32>
    %158 = vector.shape_cast %155 : vector<8x16xf32> to vector<1x8x16xf32>
    tpu.vector_store %arg4[%c1_13, %c0_14, %c0_15], %158 {strides = array<i32>} : memref<3x8x16xf32, #tpu.memory_space<vmem>>, vector<1x8x16xf32>,
    %c2 = arith.constant 2 : index
    %c0_16 = arith.constant 0 : index
    %c0_17 = arith.constant 0 : index
    %159 = vector.load %arg4[%c2, %c0_16, %c0_17] : memref<3x8x16xf32, #tpu.memory_space<vmem>>, vector<1x8x16xf32>
    %160 = vector.shape_cast %159 : vector<1x8x16xf32> to vector<8x16xf32>
    %161 = arith.addf %160, %152 : vector<8x16xf32>
    %c2_18 = arith.constant 2 : index
    %c0_19 = arith.constant 0 : index
    %c0_20 = arith.constant 0 : index
    %162 = vector.load %arg4[%c2_18, %c0_19, %c0_20] : memref<3x8x16xf32, #tpu.memory_space<vmem>>, vector<1x8x16xf32>
    %163 = vector.shape_cast %162 : vector<1x8x16xf32> to vector<8x16xf32>
    %164 = vector.shape_cast %161 : vector<8x16xf32> to vector<1x8x16xf32>
    tpu.vector_store %arg4[%c2_18, %c0_19, %c0_20], %164 {strides = array<i32>} : memref<3x8x16xf32, #tpu.memory_space<vmem>>, vector<1x8x16xf32>,
    return
  }
  func.func @transform_0(%arg0: i32) -> (i32, i32) {
    %c0_i32 = arith.constant 0 : i32
    %c0_i32_0 = arith.constant 0 : i32
    return %arg0, %c0_i32 : i32, i32
  }
  func.func @transform_1(%arg0: i32) -> (i32, i32) {
    %c0_i32 = arith.constant 0 : i32
    %c0_i32_0 = arith.constant 0 : i32
    %c0_i32_1 = arith.constant 0 : i32
    return %c0_i32, %c0_i32_0 : i32, i32
  }
  func.func @transform_2(%arg0: i32) -> (i32, i32) {
    %c0_i32 = arith.constant 0 : i32
    %c0_i32_0 = arith.constant 0 : i32
    return %arg0, %c0_i32 : i32, i32
  }
  func.func @transform_3(%arg0: i32) -> (i32, i32, i32) {
    %c0_i32 = arith.constant 0 : i32
    %c0_i32_0 = arith.constant 0 : i32
    %c0_i32_1 = arith.constant 0 : i32
    %c0_i32_2 = arith.constant 0 : i32
    return %c0_i32, %c0_i32_0, %c0_i32_1 : i32, i32, i32
  }
}

module attributes {stable_mosaic.version = 11 : i64} {
  func.func @kernel(%arg0: i32, %arg1: memref<256x64xbf16, #tpu.memory_space<vmem>>, %arg2: memref<64x16xbf16, #tpu.memory_space<vmem>>, %arg3: memref<256x16xf32, #tpu.memory_space<vmem>>, %arg4: memref<3x8x16xf32, #tpu.memory_space<vmem>>) attributes {dimension_semantics = [#tpu.dimension_semantics<arbitrary>], iteration_bounds = array<i64: 2>, scalar_prefetch = 0 : i64, scratch_operands = 0 : i64, tpu.core_type = #tpu.core_type<tc>, window_params = [{transform_indices = @transform_0, window_bounds = array<i64: 256, 64>}, {pipeline_mode = #tpu.pipeline_mode<synchronous>, transform_indices = @transform_1, window_bounds = array<i64: 64, 16>}, {transform_indices = @transform_2, window_bounds = array<i64: 256, 16>}, {pipeline_mode = #tpu.pipeline_mode<synchronous>, transform_indices = @transform_3, window_bounds = array<i64: 3, 8, 16>}]} {
    %c0 = arith.constant 0 : index
    %c0_0 = arith.constant 0 : index
    %0 = vector.load %arg1[%c0, %c0_0] : memref<256x64xbf16, #tpu.memory_space<vmem>>, vector<256x64xbf16>
    %c0_1 = arith.constant 0 : index
    %c0_2 = arith.constant 0 : index
    %1 = vector.load %arg2[%c0_1, %c0_2] : memref<64x16xbf16, #tpu.memory_space<vmem>>, vector<64x16xbf16>
    %cst = arith.constant dense<0.000000e+00> : vector<256x16xf32>
    %2 = tpu.matmul %0, %1, %cst {dimension_numbers = #tpu.dot_dimension_numbers<[1], [0], [0], [1], [0, 0, 1, 1], [], []>} : vector<256x64xbf16>, vector<64x16xbf16>, vector<256x16xf32> -> vector<256x16xf32>
    %c0_3 = arith.constant 0 : index
    %c0_4 = arith.constant 0 : index
    %3 = vector.load %arg3[%c0_3, %c0_4] : memref<256x16xf32, #tpu.memory_space<vmem>>, vector<256x16xf32>
    tpu.vector_store %arg3[%c0_3, %c0_4], %2 {strides = array<i32>} : memref<256x16xf32, #tpu.memory_space<vmem>>, vector<256x16xf32>,
    %c0_i32 = arith.constant 0 : i32
    %4 = arith.cmpi eq, %arg0, %c0_i32 : i32
    %5 = arith.extui %4 : i1 to i32
    %c0_i32_5 = arith.constant 0 : i32
    %6 = arith.cmpi ne, %5, %c0_i32_5 : i32
    scf.if %6 {
      %cst_21 = arith.constant dense<0.000000e+00> : vector<16xf32>
      %165 = vector.multi_reduction <add>, %2, %cst_21 [0] : vector<256x16xf32> to vector<16xf32>
      %166 = vector.shape_cast %165 : vector<16xf32> to vector<1x16xf32>
      %cst_22 = arith.constant 3.906250e-03 : f32
      %167 = vector.broadcast %cst_22 : f32 to vector<1x16xf32>
      %168 = arith.mulf %166, %167 : vector<1x16xf32>
      %169 = vector.shape_cast %168 : vector<1x16xf32> to vector<1x16xf32>
      %170 = vector.broadcast %169 : vector<1x16xf32> to vector<8x16xf32>
      %c0_23 = arith.constant 0 : index
      %c0_24 = arith.constant 0 : index
      %c0_25 = arith.constant 0 : index
      %171 = vector.load %arg4[%c0_23, %c0_24, %c0_25] : memref<3x8x16xf32, #tpu.memory_space<vmem>>, vector<1x8x16xf32>
      %172 = vector.shape_cast %171 : vector<1x8x16xf32> to vector<8x16xf32>
      %173 = vector.shape_cast %170 : vector<8x16xf32> to vector<1x8x16xf32>
      tpu.vector_store %arg4[%c0_23, %c0_24, %c0_25], %173 {strides = array<i32>} : memref<3x8x16xf32, #tpu.memory_space<vmem>>, vector<1x8x16xf32>,
      %cst_26 = arith.constant 0.000000e+00 : f32
      %174 = vector.broadcast %cst_26 : f32 to vector<8x16xf32>
      %c1_27 = arith.constant 1 : index
      %c0_28 = arith.constant 0 : index
      %c0_29 = arith.constant 0 : index
      %175 = vector.load %arg4[%c1_27, %c0_28, %c0_29] : memref<3x8x16xf32, #tpu.memory_space<vmem>>, vector<1x8x16xf32>
      %176 = vector.shape_cast %175 : vector<1x8x16xf32> to vector<8x16xf32>
      %177 = vector.shape_cast %174 : vector<8x16xf32> to vector<1x8x16xf32>
      tpu.vector_store %arg4[%c1_27, %c0_28, %c0_29], %177 {strides = array<i32>} : memref<3x8x16xf32, #tpu.memory_space<vmem>>, vector<1x8x16xf32>,
      %cst_30 = arith.constant 0.000000e+00 : f32
      %178 = vector.broadcast %cst_30 : f32 to vector<8x16xf32>
      %c2_31 = arith.constant 2 : index
      %c0_32 = arith.constant 0 : index
      %c0_33 = arith.constant 0 : index
      %179 = vector.load %arg4[%c2_31, %c0_32, %c0_33] : memref<3x8x16xf32, #tpu.memory_space<vmem>>, vector<1x8x16xf32>
      %180 = vector.shape_cast %179 : vector<1x8x16xf32> to vector<8x16xf32>
      %181 = vector.shape_cast %178 : vector<8x16xf32> to vector<1x8x16xf32>
      tpu.vector_store %arg4[%c2_31, %c0_32, %c0_33], %181 {strides = array<i32>} : memref<3x8x16xf32, #tpu.memory_space<vmem>>, vector<1x8x16xf32>,
    } else {
    }
    %c0_6 = arith.constant 0 : index
    %c0_7 = arith.constant 0 : index
    %c0_8 = arith.constant 0 : index
    %7 = vector.load %arg4[%c0_6, %c0_7, %c0_8] : memref<3x8x16xf32, #tpu.memory_space<vmem>>, vector<1x8x16xf32>
    %8 = vector.shape_cast %7 : vector<1x8x16xf32> to vector<8x16xf32>
    %9 = vector.extract_strided_slice %8 {offsets = [0, 0], sizes = [1, 16], strides = [1, 1]} : vector<8x16xf32> to vector<1x16xf32>
    %10 = vector.broadcast %9 : vector<1x16xf32> to vector<256x16xf32>
    %11 = arith.subf %2, %10 : vector<256x16xf32>
    %c256_i32 = arith.constant 256 : i32
    %12 = arith.muli %arg0, %c256_i32 : i32
    %13 = tpu.iota {dimensions = array<i32: 0>} : vector<256x1xi32>
    %14 = vector.broadcast %12 : i32 to vector<256x1xi32>
    %15 = arith.addi %14, %13 : vector<256x1xi32>
    %c450_i32 = arith.constant 450 : i32
    %16 = vector.broadcast %c450_i32 : i32 to vector<256x1xi32>
    %17 = arith.cmpi slt, %15, %16 : vector<256x1xi32>
    %18 = arith.extui %17 : vector<256x1xi1> to vector<256x1xi32>
    %19 = arith.sitofp %18 : vector<256x1xi32> to vector<256x1xf32>
    %20 = vector.broadcast %19 : vector<256x1xf32> to vector<256x16xf32>
    %21 = arith.mulf %11, %20 : vector<256x16xf32>
    %22 = arith.mulf %21, %21 : vector<256x16xf32>
    %cst_9 = arith.constant 0.000000e+00 : f32
    %23 = vector.broadcast %cst_9 : f32 to vector<8x16xf32>
    %cst_10 = arith.constant 0.000000e+00 : f32
    %24 = vector.broadcast %cst_10 : f32 to vector<8x16xf32>
    %25 = vector.extract_strided_slice %21 {offsets = [0, 0], sizes = [8, 16], strides = [1, 1]} : vector<256x16xf32> to vector<8x16xf32>
    %26 = arith.addf %23, %25 : vector<8x16xf32>
    %27 = vector.extract_strided_slice %22 {offsets = [0, 0], sizes = [8, 16], strides = [1, 1]} : vector<256x16xf32> to vector<8x16xf32>
    %28 = arith.addf %24, %27 : vector<8x16xf32>
    %29 = vector.extract_strided_slice %21 {offsets = [8, 0], sizes = [8, 16], strides = [1, 1]} : vector<256x16xf32> to vector<8x16xf32>
    %30 = arith.addf %26, %29 : vector<8x16xf32>
    %31 = vector.extract_strided_slice %22 {offsets = [8, 0], sizes = [8, 16], strides = [1, 1]} : vector<256x16xf32> to vector<8x16xf32>
    %32 = arith.addf %28, %31 : vector<8x16xf32>
    %33 = vector.extract_strided_slice %21 {offsets = [16, 0], sizes = [8, 16], strides = [1, 1]} : vector<256x16xf32> to vector<8x16xf32>
    %34 = arith.addf %30, %33 : vector<8x16xf32>
    %35 = vector.extract_strided_slice %22 {offsets = [16, 0], sizes = [8, 16], strides = [1, 1]} : vector<256x16xf32> to vector<8x16xf32>
    %36 = arith.addf %32, %35 : vector<8x16xf32>
    %37 = vector.extract_strided_slice %21 {offsets = [24, 0], sizes = [8, 16], strides = [1, 1]} : vector<256x16xf32> to vector<8x16xf32>
    %38 = arith.addf %34, %37 : vector<8x16xf32>
    %39 = vector.extract_strided_slice %22 {offsets = [24, 0], sizes = [8, 16], strides = [1, 1]} : vector<256x16xf32> to vector<8x16xf32>
    %40 = arith.addf %36, %39 : vector<8x16xf32>
    %41 = vector.extract_strided_slice %21 {offsets = [32, 0], sizes = [8, 16], strides = [1, 1]} : vector<256x16xf32> to vector<8x16xf32>
    %42 = arith.addf %38, %41 : vector<8x16xf32>
    %43 = vector.extract_strided_slice %22 {offsets = [32, 0], sizes = [8, 16], strides = [1, 1]} : vector<256x16xf32> to vector<8x16xf32>
    %44 = arith.addf %40, %43 : vector<8x16xf32>
    %45 = vector.extract_strided_slice %21 {offsets = [40, 0], sizes = [8, 16], strides = [1, 1]} : vector<256x16xf32> to vector<8x16xf32>
    %46 = arith.addf %42, %45 : vector<8x16xf32>
    %47 = vector.extract_strided_slice %22 {offsets = [40, 0], sizes = [8, 16], strides = [1, 1]} : vector<256x16xf32> to vector<8x16xf32>
    %48 = arith.addf %44, %47 : vector<8x16xf32>
    %49 = vector.extract_strided_slice %21 {offsets = [48, 0], sizes = [8, 16], strides = [1, 1]} : vector<256x16xf32> to vector<8x16xf32>
    %50 = arith.addf %46, %49 : vector<8x16xf32>
    %51 = vector.extract_strided_slice %22 {offsets = [48, 0], sizes = [8, 16], strides = [1, 1]} : vector<256x16xf32> to vector<8x16xf32>
    %52 = arith.addf %48, %51 : vector<8x16xf32>
    %53 = vector.extract_strided_slice %21 {offsets = [56, 0], sizes = [8, 16], strides = [1, 1]} : vector<256x16xf32> to vector<8x16xf32>
    %54 = arith.addf %50, %53 : vector<8x16xf32>
    %55 = vector.extract_strided_slice %22 {offsets = [56, 0], sizes = [8, 16], strides = [1, 1]} : vector<256x16xf32> to vector<8x16xf32>
    %56 = arith.addf %52, %55 : vector<8x16xf32>
    %57 = vector.extract_strided_slice %21 {offsets = [64, 0], sizes = [8, 16], strides = [1, 1]} : vector<256x16xf32> to vector<8x16xf32>
    %58 = arith.addf %54, %57 : vector<8x16xf32>
    %59 = vector.extract_strided_slice %22 {offsets = [64, 0], sizes = [8, 16], strides = [1, 1]} : vector<256x16xf32> to vector<8x16xf32>
    %60 = arith.addf %56, %59 : vector<8x16xf32>
    %61 = vector.extract_strided_slice %21 {offsets = [72, 0], sizes = [8, 16], strides = [1, 1]} : vector<256x16xf32> to vector<8x16xf32>
    %62 = arith.addf %58, %61 : vector<8x16xf32>
    %63 = vector.extract_strided_slice %22 {offsets = [72, 0], sizes = [8, 16], strides = [1, 1]} : vector<256x16xf32> to vector<8x16xf32>
    %64 = arith.addf %60, %63 : vector<8x16xf32>
    %65 = vector.extract_strided_slice %21 {offsets = [80, 0], sizes = [8, 16], strides = [1, 1]} : vector<256x16xf32> to vector<8x16xf32>
    %66 = arith.addf %62, %65 : vector<8x16xf32>
    %67 = vector.extract_strided_slice %22 {offsets = [80, 0], sizes = [8, 16], strides = [1, 1]} : vector<256x16xf32> to vector<8x16xf32>
    %68 = arith.addf %64, %67 : vector<8x16xf32>
    %69 = vector.extract_strided_slice %21 {offsets = [88, 0], sizes = [8, 16], strides = [1, 1]} : vector<256x16xf32> to vector<8x16xf32>
    %70 = arith.addf %66, %69 : vector<8x16xf32>
    %71 = vector.extract_strided_slice %22 {offsets = [88, 0], sizes = [8, 16], strides = [1, 1]} : vector<256x16xf32> to vector<8x16xf32>
    %72 = arith.addf %68, %71 : vector<8x16xf32>
    %73 = vector.extract_strided_slice %21 {offsets = [96, 0], sizes = [8, 16], strides = [1, 1]} : vector<256x16xf32> to vector<8x16xf32>
    %74 = arith.addf %70, %73 : vector<8x16xf32>
    %75 = vector.extract_strided_slice %22 {offsets = [96, 0], sizes = [8, 16], strides = [1, 1]} : vector<256x16xf32> to vector<8x16xf32>
    %76 = arith.addf %72, %75 : vector<8x16xf32>
    %77 = vector.extract_strided_slice %21 {offsets = [104, 0], sizes = [8, 16], strides = [1, 1]} : vector<256x16xf32> to vector<8x16xf32>
    %78 = arith.addf %74, %77 : vector<8x16xf32>
    %79 = vector.extract_strided_slice %22 {offsets = [104, 0], sizes = [8, 16], strides = [1, 1]} : vector<256x16xf32> to vector<8x16xf32>
    %80 = arith.addf %76, %79 : vector<8x16xf32>
    %81 = vector.extract_strided_slice %21 {offsets = [112, 0], sizes = [8, 16], strides = [1, 1]} : vector<256x16xf32> to vector<8x16xf32>
    %82 = arith.addf %78, %81 : vector<8x16xf32>
    %83 = vector.extract_strided_slice %22 {offsets = [112, 0], sizes = [8, 16], strides = [1, 1]} : vector<256x16xf32> to vector<8x16xf32>
    %84 = arith.addf %80, %83 : vector<8x16xf32>
    %85 = vector.extract_strided_slice %21 {offsets = [120, 0], sizes = [8, 16], strides = [1, 1]} : vector<256x16xf32> to vector<8x16xf32>
    %86 = arith.addf %82, %85 : vector<8x16xf32>
    %87 = vector.extract_strided_slice %22 {offsets = [120, 0], sizes = [8, 16], strides = [1, 1]} : vector<256x16xf32> to vector<8x16xf32>
    %88 = arith.addf %84, %87 : vector<8x16xf32>
    %89 = vector.extract_strided_slice %21 {offsets = [128, 0], sizes = [8, 16], strides = [1, 1]} : vector<256x16xf32> to vector<8x16xf32>
    %90 = arith.addf %86, %89 : vector<8x16xf32>
    %91 = vector.extract_strided_slice %22 {offsets = [128, 0], sizes = [8, 16], strides = [1, 1]} : vector<256x16xf32> to vector<8x16xf32>
    %92 = arith.addf %88, %91 : vector<8x16xf32>
    %93 = vector.extract_strided_slice %21 {offsets = [136, 0], sizes = [8, 16], strides = [1, 1]} : vector<256x16xf32> to vector<8x16xf32>
    %94 = arith.addf %90, %93 : vector<8x16xf32>
    %95 = vector.extract_strided_slice %22 {offsets = [136, 0], sizes = [8, 16], strides = [1, 1]} : vector<256x16xf32> to vector<8x16xf32>
    %96 = arith.addf %92, %95 : vector<8x16xf32>
    %97 = vector.extract_strided_slice %21 {offsets = [144, 0], sizes = [8, 16], strides = [1, 1]} : vector<256x16xf32> to vector<8x16xf32>
    %98 = arith.addf %94, %97 : vector<8x16xf32>
    %99 = vector.extract_strided_slice %22 {offsets = [144, 0], sizes = [8, 16], strides = [1, 1]} : vector<256x16xf32> to vector<8x16xf32>
    %100 = arith.addf %96, %99 : vector<8x16xf32>
    %101 = vector.extract_strided_slice %21 {offsets = [152, 0], sizes = [8, 16], strides = [1, 1]} : vector<256x16xf32> to vector<8x16xf32>
    %102 = arith.addf %98, %101 : vector<8x16xf32>
    %103 = vector.extract_strided_slice %22 {offsets = [152, 0], sizes = [8, 16], strides = [1, 1]} : vector<256x16xf32> to vector<8x16xf32>
    %104 = arith.addf %100, %103 : vector<8x16xf32>
    %105 = vector.extract_strided_slice %21 {offsets = [160, 0], sizes = [8, 16], strides = [1, 1]} : vector<256x16xf32> to vector<8x16xf32>
    %106 = arith.addf %102, %105 : vector<8x16xf32>
    %107 = vector.extract_strided_slice %22 {offsets = [160, 0], sizes = [8, 16], strides = [1, 1]} : vector<256x16xf32> to vector<8x16xf32>
    %108 = arith.addf %104, %107 : vector<8x16xf32>
    %109 = vector.extract_strided_slice %21 {offsets = [168, 0], sizes = [8, 16], strides = [1, 1]} : vector<256x16xf32> to vector<8x16xf32>
    %110 = arith.addf %106, %109 : vector<8x16xf32>
    %111 = vector.extract_strided_slice %22 {offsets = [168, 0], sizes = [8, 16], strides = [1, 1]} : vector<256x16xf32> to vector<8x16xf32>
    %112 = arith.addf %108, %111 : vector<8x16xf32>
    %113 = vector.extract_strided_slice %21 {offsets = [176, 0], sizes = [8, 16], strides = [1, 1]} : vector<256x16xf32> to vector<8x16xf32>
    %114 = arith.addf %110, %113 : vector<8x16xf32>
    %115 = vector.extract_strided_slice %22 {offsets = [176, 0], sizes = [8, 16], strides = [1, 1]} : vector<256x16xf32> to vector<8x16xf32>
    %116 = arith.addf %112, %115 : vector<8x16xf32>
    %117 = vector.extract_strided_slice %21 {offsets = [184, 0], sizes = [8, 16], strides = [1, 1]} : vector<256x16xf32> to vector<8x16xf32>
    %118 = arith.addf %114, %117 : vector<8x16xf32>
    %119 = vector.extract_strided_slice %22 {offsets = [184, 0], sizes = [8, 16], strides = [1, 1]} : vector<256x16xf32> to vector<8x16xf32>
    %120 = arith.addf %116, %119 : vector<8x16xf32>
    %121 = vector.extract_strided_slice %21 {offsets = [192, 0], sizes = [8, 16], strides = [1, 1]} : vector<256x16xf32> to vector<8x16xf32>
    %122 = arith.addf %118, %121 : vector<8x16xf32>
    %123 = vector.extract_strided_slice %22 {offsets = [192, 0], sizes = [8, 16], strides = [1, 1]} : vector<256x16xf32> to vector<8x16xf32>
    %124 = arith.addf %120, %123 : vector<8x16xf32>
    %125 = vector.extract_strided_slice %21 {offsets = [200, 0], sizes = [8, 16], strides = [1, 1]} : vector<256x16xf32> to vector<8x16xf32>
    %126 = arith.addf %122, %125 : vector<8x16xf32>
    %127 = vector.extract_strided_slice %22 {offsets = [200, 0], sizes = [8, 16], strides = [1, 1]} : vector<256x16xf32> to vector<8x16xf32>
    %128 = arith.addf %124, %127 : vector<8x16xf32>
    %129 = vector.extract_strided_slice %21 {offsets = [208, 0], sizes = [8, 16], strides = [1, 1]} : vector<256x16xf32> to vector<8x16xf32>
    %130 = arith.addf %126, %129 : vector<8x16xf32>
    %131 = vector.extract_strided_slice %22 {offsets = [208, 0], sizes = [8, 16], strides = [1, 1]} : vector<256x16xf32> to vector<8x16xf32>
    %132 = arith.addf %128, %131 : vector<8x16xf32>
    %133 = vector.extract_strided_slice %21 {offsets = [216, 0], sizes = [8, 16], strides = [1, 1]} : vector<256x16xf32> to vector<8x16xf32>
    %134 = arith.addf %130, %133 : vector<8x16xf32>
    %135 = vector.extract_strided_slice %22 {offsets = [216, 0], sizes = [8, 16], strides = [1, 1]} : vector<256x16xf32> to vector<8x16xf32>
    %136 = arith.addf %132, %135 : vector<8x16xf32>
    %137 = vector.extract_strided_slice %21 {offsets = [224, 0], sizes = [8, 16], strides = [1, 1]} : vector<256x16xf32> to vector<8x16xf32>
    %138 = arith.addf %134, %137 : vector<8x16xf32>
    %139 = vector.extract_strided_slice %22 {offsets = [224, 0], sizes = [8, 16], strides = [1, 1]} : vector<256x16xf32> to vector<8x16xf32>
    %140 = arith.addf %136, %139 : vector<8x16xf32>
    %141 = vector.extract_strided_slice %21 {offsets = [232, 0], sizes = [8, 16], strides = [1, 1]} : vector<256x16xf32> to vector<8x16xf32>
    %142 = arith.addf %138, %141 : vector<8x16xf32>
    %143 = vector.extract_strided_slice %22 {offsets = [232, 0], sizes = [8, 16], strides = [1, 1]} : vector<256x16xf32> to vector<8x16xf32>
    %144 = arith.addf %140, %143 : vector<8x16xf32>
    %145 = vector.extract_strided_slice %21 {offsets = [240, 0], sizes = [8, 16], strides = [1, 1]} : vector<256x16xf32> to vector<8x16xf32>
    %146 = arith.addf %142, %145 : vector<8x16xf32>
    %147 = vector.extract_strided_slice %22 {offsets = [240, 0], sizes = [8, 16], strides = [1, 1]} : vector<256x16xf32> to vector<8x16xf32>
    %148 = arith.addf %144, %147 : vector<8x16xf32>
    %149 = vector.extract_strided_slice %21 {offsets = [248, 0], sizes = [8, 16], strides = [1, 1]} : vector<256x16xf32> to vector<8x16xf32>
    %150 = arith.addf %146, %149 : vector<8x16xf32>
    %151 = vector.extract_strided_slice %22 {offsets = [248, 0], sizes = [8, 16], strides = [1, 1]} : vector<256x16xf32> to vector<8x16xf32>
    %152 = arith.addf %148, %151 : vector<8x16xf32>
    %c1 = arith.constant 1 : index
    %c0_11 = arith.constant 0 : index
    %c0_12 = arith.constant 0 : index
    %153 = vector.load %arg4[%c1, %c0_11, %c0_12] : memref<3x8x16xf32, #tpu.memory_space<vmem>>, vector<1x8x16xf32>
    %154 = vector.shape_cast %153 : vector<1x8x16xf32> to vector<8x16xf32>
    %155 = arith.addf %154, %150 : vector<8x16xf32>
    %c1_13 = arith.constant 1 : index
    %c0_14 = arith.constant 0 : index
    %c0_15 = arith.constant 0 : index
    %156 = vector.load %arg4[%c1_13, %c0_14, %c0_15] : memref<3x8x16xf32, #tpu.memory_space<vmem>>, vector<1x8x16xf32>
    %157 = vector.shape_cast %156 : vector<1x8x16xf32> to vector<8x16xf32>
    %158 = vector.shape_cast %155 : vector<8x16xf32> to vector<1x8x16xf32>
    tpu.vector_store %arg4[%c1_13, %c0_14, %c0_15], %158 {strides = array<i32>} : memref<3x8x16xf32, #tpu.memory_space<vmem>>, vector<1x8x16xf32>,
    %c2 = arith.constant 2 : index
    %c0_16 = arith.constant 0 : index
    %c0_17 = arith.constant 0 : index
    %159 = vector.load %arg4[%c2, %c0_16, %c0_17] : memref<3x8x16xf32, #tpu.memory_space<vmem>>, vector<1x8x16xf32>
    %160 = vector.shape_cast %159 : vector<1x8x16xf32> to vector<8x16xf32>
    %161 = arith.addf %160, %152 : vector<8x16xf32>
    %c2_18 = arith.constant 2 : index
    %c0_19 = arith.constant 0 : index
    %c0_20 = arith.constant 0 : index
    %162 = vector.load %arg4[%c2_18, %c0_19, %c0_20] : memref<3x8x16xf32, #tpu.memory_space<vmem>>, vector<1x8x16xf32>
    %163 = vector.shape_cast %162 : vector<1x8x16xf32> to vector<8x16xf32>
    %164 = vector.shape_cast %161 : vector<8x16xf32> to vector<1x8x16xf32>
    tpu.vector_store %arg4[%c2_18, %c0_19, %c0_20], %164 {strides = array<i32>} : memref<3x8x16xf32, #tpu.memory_space<vmem>>, vector<1x8x16xf32>,
    return
  }
  func.func @transform_0(%arg0: i32) -> (i32, i32) {
    %c0_i32 = arith.constant 0 : i32
    %c0_i32_0 = arith.constant 0 : i32
    return %arg0, %c0_i32 : i32, i32
  }
  func.func @transform_1(%arg0: i32) -> (i32, i32) {
    %c0_i32 = arith.constant 0 : i32
    %c0_i32_0 = arith.constant 0 : i32
    %c0_i32_1 = arith.constant 0 : i32
    return %c0_i32, %c0_i32_0 : i32, i32
  }
  func.func @transform_2(%arg0: i32) -> (i32, i32) {
    %c0_i32 = arith.constant 0 : i32
    %c0_i32_0 = arith.constant 0 : i32
    return %arg0, %c0_i32 : i32, i32
  }
  func.func @transform_3(%arg0: i32) -> (i32, i32, i32) {
    %c0_i32 = arith.constant 0 : i32
    %c0_i32_0 = arith.constant 0 : i32
    %c0_i32_1 = arith.constant 0 : i32
    %c0_i32_2 = arith.constant 0 : i32
    return %c0_i32, %c0_i32_0, %c0_i32_1 : i32, i32, i32
  }
}

module attributes {stable_mosaic.version = 11 : i64} {
  func.func @kernel(%arg0: i32, %arg1: memref<256x16xf32, #tpu.memory_space<vmem>>, %arg2: memref<1x16xf32, #tpu.memory_space<vmem>>, %arg3: memref<1x16xf32, #tpu.memory_space<vmem>>, %arg4: memref<256x16xf32, #tpu.memory_space<vmem>>) attributes {dimension_semantics = [#tpu.dimension_semantics<parallel>], iteration_bounds = array<i64: 2>, scalar_prefetch = 0 : i64, scratch_operands = 0 : i64, tpu.core_type = #tpu.core_type<tc>, window_params = [{transform_indices = @transform_0, window_bounds = array<i64: 256, 16>}, {pipeline_mode = #tpu.pipeline_mode<synchronous>, transform_indices = @transform_1, window_bounds = array<i64: 1, 16>}, {pipeline_mode = #tpu.pipeline_mode<synchronous>, transform_indices = @transform_2, window_bounds = array<i64: 1, 16>}, {transform_indices = @transform_3, window_bounds = array<i64: 256, 16>}]} {
    %c0 = arith.constant 0 : index
    %c0_0 = arith.constant 0 : index
    %0 = vector.load %arg1[%c0, %c0_0] : memref<256x16xf32, #tpu.memory_space<vmem>>, vector<256x16xf32>
    %c0_1 = arith.constant 0 : index
    %c0_2 = arith.constant 0 : index
    %1 = vector.load %arg2[%c0_1, %c0_2] : memref<1x16xf32, #tpu.memory_space<vmem>>, vector<1x16xf32>
    %2 = vector.broadcast %1 : vector<1x16xf32> to vector<256x16xf32>
    %3 = arith.mulf %0, %2 : vector<256x16xf32>
    %c0_3 = arith.constant 0 : index
    %c0_4 = arith.constant 0 : index
    %4 = vector.load %arg3[%c0_3, %c0_4] : memref<1x16xf32, #tpu.memory_space<vmem>>, vector<1x16xf32>
    %5 = vector.broadcast %4 : vector<1x16xf32> to vector<256x16xf32>
    %6 = arith.addf %3, %5 : vector<256x16xf32>
    %c0_5 = arith.constant 0 : index
    %c0_6 = arith.constant 0 : index
    %7 = vector.load %arg4[%c0_5, %c0_6] : memref<256x16xf32, #tpu.memory_space<vmem>>, vector<256x16xf32>
    tpu.vector_store %arg4[%c0_5, %c0_6], %6 {strides = array<i32>} : memref<256x16xf32, #tpu.memory_space<vmem>>, vector<256x16xf32>,
    return
  }
  func.func @transform_0(%arg0: i32) -> (i32, i32) {
    %c0_i32 = arith.constant 0 : i32
    %c0_i32_0 = arith.constant 0 : i32
    return %arg0, %c0_i32 : i32, i32
  }
  func.func @transform_1(%arg0: i32) -> (i32, i32) {
    %c0_i32 = arith.constant 0 : i32
    %c0_i32_0 = arith.constant 0 : i32
    %c0_i32_1 = arith.constant 0 : i32
    return %c0_i32, %c0_i32_0 : i32, i32
  }
  func.func @transform_2(%arg0: i32) -> (i32, i32) {
    %c0_i32 = arith.constant 0 : i32
    %c0_i32_0 = arith.constant 0 : i32
    %c0_i32_1 = arith.constant 0 : i32
    return %c0_i32, %c0_i32_0 : i32, i32
  }
  func.func @transform_3(%arg0: i32) -> (i32, i32) {
    %c0_i32 = arith.constant 0 : i32
    %c0_i32_0 = arith.constant 0 : i32
    return %arg0, %c0_i32 : i32, i32
  }
}

module attributes {stable_mosaic.version = 11 : i64} {
  func.func @kernel(%arg0: i32, %arg1: memref<256x16xf32, #tpu.memory_space<vmem>>, %arg2: memref<1x16xf32, #tpu.memory_space<vmem>>, %arg3: memref<1x16xf32, #tpu.memory_space<vmem>>, %arg4: memref<256x16xf32, #tpu.memory_space<vmem>>, %arg5: memref<256x16xf32, #tpu.memory_space<vmem>>) attributes {dimension_semantics = [#tpu.dimension_semantics<parallel>], iteration_bounds = array<i64: 2>, scalar_prefetch = 0 : i64, scratch_operands = 0 : i64, tpu.core_type = #tpu.core_type<tc>, window_params = [{transform_indices = @transform_0, window_bounds = array<i64: 256, 16>}, {pipeline_mode = #tpu.pipeline_mode<synchronous>, transform_indices = @transform_1, window_bounds = array<i64: 1, 16>}, {pipeline_mode = #tpu.pipeline_mode<synchronous>, transform_indices = @transform_2, window_bounds = array<i64: 1, 16>}, {transform_indices = @transform_3, window_bounds = array<i64: 256, 16>}, {transform_indices = @transform_4, window_bounds = array<i64: 256, 16>}]} {
    %c0 = arith.constant 0 : index
    %c0_0 = arith.constant 0 : index
    %0 = vector.load %arg1[%c0, %c0_0] : memref<256x16xf32, #tpu.memory_space<vmem>>, vector<256x16xf32>
    %c0_1 = arith.constant 0 : index
    %c0_2 = arith.constant 0 : index
    %1 = vector.load %arg2[%c0_1, %c0_2] : memref<1x16xf32, #tpu.memory_space<vmem>>, vector<1x16xf32>
    %2 = vector.broadcast %1 : vector<1x16xf32> to vector<256x16xf32>
    %3 = arith.mulf %0, %2 : vector<256x16xf32>
    %c0_3 = arith.constant 0 : index
    %c0_4 = arith.constant 0 : index
    %4 = vector.load %arg3[%c0_3, %c0_4] : memref<1x16xf32, #tpu.memory_space<vmem>>, vector<1x16xf32>
    %5 = vector.broadcast %4 : vector<1x16xf32> to vector<256x16xf32>
    %6 = arith.addf %3, %5 : vector<256x16xf32>
    %c0_5 = arith.constant 0 : index
    %c0_6 = arith.constant 0 : index
    %7 = vector.load %arg4[%c0_5, %c0_6] : memref<256x16xf32, #tpu.memory_space<vmem>>, vector<256x16xf32>
    %8 = arith.addf %6, %7 : vector<256x16xf32>
    %cst = arith.constant 0.000000e+00 : f32
    %9 = vector.broadcast %cst : f32 to vector<256x16xf32>
    %10 = arith.maximumf %8, %9 : vector<256x16xf32>
    %c0_7 = arith.constant 0 : index
    %c0_8 = arith.constant 0 : index
    %11 = vector.load %arg5[%c0_7, %c0_8] : memref<256x16xf32, #tpu.memory_space<vmem>>, vector<256x16xf32>
    tpu.vector_store %arg5[%c0_7, %c0_8], %10 {strides = array<i32>} : memref<256x16xf32, #tpu.memory_space<vmem>>, vector<256x16xf32>,
    return
  }
  func.func @transform_0(%arg0: i32) -> (i32, i32) {
    %c0_i32 = arith.constant 0 : i32
    %c0_i32_0 = arith.constant 0 : i32
    return %arg0, %c0_i32 : i32, i32
  }
  func.func @transform_1(%arg0: i32) -> (i32, i32) {
    %c0_i32 = arith.constant 0 : i32
    %c0_i32_0 = arith.constant 0 : i32
    %c0_i32_1 = arith.constant 0 : i32
    return %c0_i32, %c0_i32_0 : i32, i32
  }
  func.func @transform_2(%arg0: i32) -> (i32, i32) {
    %c0_i32 = arith.constant 0 : i32
    %c0_i32_0 = arith.constant 0 : i32
    %c0_i32_1 = arith.constant 0 : i32
    return %c0_i32, %c0_i32_0 : i32, i32
  }
  func.func @transform_3(%arg0: i32) -> (i32, i32) {
    %c0_i32 = arith.constant 0 : i32
    %c0_i32_0 = arith.constant 0 : i32
    return %arg0, %c0_i32 : i32, i32
  }
  func.func @transform_4(%arg0: i32) -> (i32, i32) {
    %c0_i32 = arith.constant 0 : i32
    %c0_i32_0 = arith.constant 0 : i32
    return %arg0, %c0_i32 : i32, i32
  }
}

</mosaic_0001>

<bundles_post_ra>
// kernel: bottleneck_forward.9
= control target key start
LH: loop header
LB: loop body
LE: loop exit
PB: predicated region body
PF: predicated region fallthrough
CT: control target
= control target key end

     0   :  { %s646_s12 = smov 0   ;;  %s841_s0 = inlined_call_operand.vmem [shape: f32[512,4], index: 0, kind: input, shape index: {}]   ;;  %s842_s1 = inlined_call_operand.vmem [shape: f32[1,4], index: 1, kind: input, shape index: {}]   ;;  %s843_s2 = inlined_call_operand.vmem [shape: f32[1,4], index: 2, kind: input, shape index: {}]   ;;  %s844_s3 = inlined_call_operand.vmem [shape: bf16[512,4], index: 3, kind: output, shape index: {}]  }
   0x1 LB: > { %s533_s13 = sadd.s32 4294967295, %s624_s12   ;;  %p537_p0 = scmp.ge.s32.totalorder %s624_s12, 1  ;;  %s624_s12 = sphi %s646_s12, %s13_s12  }
   0x2   : > { %p138_p1 = scmp.lt.s32.totalorder %s624_s12, 3 }
   0x4   : > { %p139_p2 = pnand %p537_p0, %p138_p1 }
   0x5   : > { %s538_s14 = sshll.u32 (!%p139_p2), %s533_s13, 5 }
   0x6   : > { %142 = sbr.rel (%p139_p2) target bundleno = 54 (0x36), region = 32  ;;  %p163_p3 = scmp.lt.s32.totalorder (!%p139_p2), %s538_s14, 63 }
   0xb   : > { %s846_s14 = smov (!%p163_p3, %s538_s14), 63  ;;  %v660_v0 = vld [vmem:[%s842_s1] ss:$0 sm:$0xff]  ;;  %vm444_vm0 = vcmask 27648  }
   0xc   : > { %s539_s15 = sshll.u32 %s846_s14, 3  ;;  %v670_v1 = vld [vmem:[%s843_s2] ss:$0 sm:$0xff]  ;;  %s541_s23 = sshll.u32 %s846_s14, 2 }
   0xd   : > { %s665_s20 = scalar_lea.vmem %s841_s0, %s539_s15  ;;  %s699_s26 = scalar_lea.vmem %s844_s3, %s541_s23 }
   0xe   : > { %v174_v2 = vld [vmem:[%s665_s20] sm:$0xff]  ;;  %v175_v3 = vld [vmem:[%s665_s20 + $0x8] sm:$0xff]  ;;  %v176_v4 = vld [vmem:[%s665_s20 + $0x10] sm:$0xff] }
   0xf   : > { %v213_v5 = vmul.f32 %v660_v0, %v174_v2  ;;  %v214_v6 = vmul.f32 %v660_v0, %v175_v3  ;;  %v215_v7 = vmul.f32 %v660_v0, %v176_v4  ;;  %v177_v8 = vld [vmem:[%s665_s20 + $0x18] sm:$0xff]  ;;  %v178_v9 = vld [vmem:[%s665_s20 + $0x20] sm:$0xff]  ;;  %v179_v10 = vld [vmem:[%s665_s20 + $0x28] sm:$0xff] }
  0x10   : > { %v216_v11 = vmul.f32 %v660_v0, %v177_v8  ;;  %v217_v12 = vmul.f32 %v660_v0, %v178_v9  ;;  %v218_v13 = vmul.f32 %v660_v0, %v179_v10  ;;  %v180_v14 = vld [vmem:[%s665_s20 + $0x30] sm:$0xff]  ;;  %v181_v15 = vld [vmem:[%s665_s20 + $0x38] sm:$0xff]  ;;  %v182_v32 = vld [vmem:[%s665_s20 + $0x40] sm:$0xff] }
  0x11   : > { %v252_v16 = vadd.f32 %v670_v1, %v213_v5  ;;  %v253_v17 = vadd.f32 %v670_v1, %v214_v6  ;;  %v254_v18 = vadd.f32 %v670_v1, %v215_v7  ;;  %v219_v19 = vmul.f32 %v660_v0, %v180_v14  ;;  %v183_v33 = vld [vmem:[%s665_s20 + $0x48] sm:$0xff]  ;;  %v184_v34 = vld [vmem:[%s665_s20 + $0x50] sm:$0xff]  ;;  %v185_v39 = vld [vmem:[%s665_s20 + $0x58] sm:$0xff] }
  0x12   : > { %v255_v20 = vadd.f32 %v670_v1, %v216_v11  ;;  %v256_v21 = vadd.f32 %v670_v1, %v217_v12  ;;  %v257_v22 = vadd.f32 %v670_v1, %v218_v13  ;;  %v220_v23 = vmul.f32 %v660_v0, %v181_v15  ;;  %v186_v40 = vld [vmem:[%s665_s20 + $0x60] sm:$0xff]  ;;  %v187_v41 = vld [vmem:[%s665_s20 + $0x68] sm:$0xff]  ;;  %v188_v46 = vld [vmem:[%s665_s20 + $0x70] sm:$0xff] }
  0x13   : > { %v284_v24 = vmax.f32 %v252_v16, 0.0  ;;  %v285_v25 = vmax.f32 %v253_v17, 0.0  ;;  %v286_v26 = vmax.f32 %v254_v18, 0.0  ;;  %v258_v27 = vadd.f32 %v670_v1, %v219_v19  ;;  %v189_v51 = vld [vmem:[%s665_s20 + $0x78] sm:$0xff]  ;;  %v190_v10 = vld [vmem:[%s665_s20 + $0x80] sm:$0xff]  ;;  %v191_v11 = vld [vmem:[%s665_s20 + $0x88] sm:$0xff] }
  0x14   : > { %v287_v28 = vmax.f32 %v255_v20, 0.0  ;;  %v288_v29 = vmax.f32 %v256_v21, 0.0  ;;  %v289_v30 = vmax.f32 %v257_v22, 0.0  ;;  %v259_v31 = vadd.f32 %v670_v1, %v220_v23  ;;  %v192_v12 = vld [vmem:[%s665_s20 + $0x90] sm:$0xff]  ;;  %v193_v17 = vld [vmem:[%s665_s20 + $0x98] sm:$0xff]  ;;  %v194_v18 = vld [vmem:[%s665_s20 + $0xa0] sm:$0xff] }
  0x15   : > { %v578_v35 = vpack.c.bf16 %v284_v24, %v284_v24  ;;  %v579_v36 = vpack.c.bf16 %v285_v25, %v285_v25  ;;  %v580_v37 = vpack.c.bf16 %v286_v26, %v286_v26  ;;  %v290_v38 = vmax.f32 %v258_v27, 0.0  ;;  %v195_v19 = vld [vmem:[%s665_s20 + $0xa8] sm:$0xff]  ;;  %v196_v24 = vld [vmem:[%s665_s20 + $0xb0] sm:$0xff] }
  0x16   : > { %v581_v42 = vpack.c.bf16 %v287_v28, %v287_v28  ;;  %v582_v43 = vpack.c.bf16 %v288_v29, %v288_v29  ;;  %v583_v44 = vpack.c.bf16 %v289_v30, %v289_v30  ;;  %v291_v45 = vmax.f32 %v259_v31, 0.0  ;;  %v197_v29 = vld [vmem:[%s665_s20 + $0xb8] sm:$0xff] }
  0x17   : > { %445 = vst.msk [vmem:[%s699_s26] sm:$0xf] %vm444_vm0, %v578_v35  ;;  %446 = vst.msk [vmem:[%s699_s26 + $0x4] sm:$0xf] %vm444_vm0, %v579_v36  ;;  %v584_v47 = vpack.c.bf16 %v290_v38, %v290_v38  ;;  %v221_v48 = vmul.f32 %v660_v0, %v182_v32  ;;  %v222_v49 = vmul.f32 %v660_v0, %v183_v33 }
  0x18   : > { %447 = vst.msk [vmem:[%s699_s26 + $0x8] sm:$0xf] %vm444_vm0, %v580_v37  ;;  %v223_v50 = vmul.f32 %v660_v0, %v184_v34  ;;  %448 = vst.msk [vmem:[%s699_s26 + $0xc] sm:$0xf] %vm444_vm0, %v581_v42  ;;  %v585_v52 = vpack.c.bf16 %v291_v45, %v291_v45  ;;  %v224_v53 = vmul.f32 %v660_v0, %v185_v39 }
  0x19   : > { %449 = vst.msk [vmem:[%s699_s26 + $0x10] sm:$0xf] %vm444_vm0, %v582_v43  ;;  %450 = vst.msk [vmem:[%s699_s26 + $0x14] sm:$0xf] %vm444_vm0, %v583_v44  ;;  %v225_v54 = vmul.f32 %v660_v0, %v186_v40  ;;  %v226_v55 = vmul.f32 %v660_v0, %v187_v41  ;;  %v260_v56 = vadd.f32 %v670_v1, %v221_v48 }
  0x1a   : > { %451 = vst.msk [vmem:[%s699_s26 + $0x18] sm:$0xf] %vm444_vm0, %v584_v47  ;;  %v261_v57 = vadd.f32 %v670_v1, %v222_v49  ;;  %v262_v58 = vadd.f32 %v670_v1, %v223_v50  ;;  %v227_v59 = vmul.f32 %v660_v0, %v188_v46  ;;  %452 = vst.msk [vmem:[%s699_s26 + $0x1c] sm:$0xf] %vm444_vm0, %v585_v52  ;;  %v198_v50 = vld [vmem:[%s665_s20 + $0xc0] sm:$0xff]  ;;  %v200_v52 = vld [vmem:[%s665_s20 + $0xd0] sm:$0xff] }
  0x1b   : > { %v263_v60 = vadd.f32 %v670_v1, %v224_v53  ;;  %v264_v61 = vadd.f32 %v670_v1, %v225_v54  ;;  %v265_v62 = vadd.f32 %v670_v1, %v226_v55  ;;  %v228_v63 = vmul.f32 %v660_v0, %v189_v51  ;;  %v199_v51 = vld [vmem:[%s665_s20 + $0xc8] sm:$0xff] }
  0x1c   : > { %v292_v2 = vmax.f32 %v260_v56, 0.0  ;;  %v293_v3 = vmax.f32 %v261_v57, 0.0  ;;  %v294_v4 = vmax.f32 %v262_v58, 0.0  ;;  %v266_v5 = vadd.f32 %v670_v1, %v227_v59  ;;  %v201_v57 = vld [vmem:[%s665_s20 + $0xd8] sm:$0xff]  ;;  %v202_v58 = vld [vmem:[%s665_s20 + $0xe0] sm:$0xff]  ;;  %v203_v59 = vld [vmem:[%s665_s20 + $0xe8] sm:$0xff] }
  0x1d   : > { %v295_v6 = vmax.f32 %v263_v60, 0.0  ;;  %v296_v7 = vmax.f32 %v264_v61, 0.0  ;;  %v297_v8 = vmax.f32 %v265_v62, 0.0  ;;  %v267_v9 = vadd.f32 %v670_v1, %v228_v63 }
  0x1e   : > { %v586_v13 = vpack.c.bf16 %v292_v2, %v292_v2  ;;  %v587_v14 = vpack.c.bf16 %v293_v3, %v293_v3  ;;  %v588_v15 = vpack.c.bf16 %v294_v4, %v294_v4  ;;  %v298_v16 = vmax.f32 %v266_v5, 0.0  ;;  %v204_v2 = vld [vmem:[%s665_s20 + $0xf0] sm:$0xff] }
  0x1f   : > { %v589_v20 = vpack.c.bf16 %v295_v6, %v295_v6  ;;  %v590_v21 = vpack.c.bf16 %v296_v7, %v296_v7  ;;  %v591_v22 = vpack.c.bf16 %v297_v8, %v297_v8  ;;  %v299_v23 = vmax.f32 %v267_v9, 0.0  ;;  %v205_v7 = vld [vmem:[%s665_s20 + $0xf8] sm:$0xff] }
  0x20   : > { %453 = vst.msk [vmem:[%s699_s26 + $0x20] sm:$0xf] %vm444_vm0, %v586_v13  ;;  %454 = vst.msk [vmem:[%s699_s26 + $0x24] sm:$0xf] %vm444_vm0, %v587_v14  ;;  %v592_v25 = vpack.c.bf16 %v298_v16, %v298_v16  ;;  %v229_v26 = vmul.f32 %v660_v0, %v190_v10  ;;  %v230_v27 = vmul.f32 %v660_v0, %v191_v11 }
  0x21   : > { %455 = vst.msk [vmem:[%s699_s26 + $0x28] sm:$0xf] %vm444_vm0, %v588_v15  ;;  %v231_v28 = vmul.f32 %v660_v0, %v192_v12  ;;  %456 = vst.msk [vmem:[%s699_s26 + $0x2c] sm:$0xf] %vm444_vm0, %v589_v20  ;;  %v593_v30 = vpack.c.bf16 %v299_v23, %v299_v23  ;;  %v232_v31 = vmul.f32 %v660_v0, %v193_v17 }
  0x22   : > { %457 = vst.msk [vmem:[%s699_s26 + $0x30] sm:$0xf] %vm444_vm0, %v590_v21  ;;  %458 = vst.msk [vmem:[%s699_s26 + $0x34] sm:$0xf] %vm444_vm0, %v591_v22  ;;  %v233_v32 = vmul.f32 %v660_v0, %v194_v18  ;;  %v234_v33 = vmul.f32 %v660_v0, %v195_v19  ;;  %v268_v34 = vadd.f32 %v670_v1, %v229_v26 }
  0x23   : > { %459 = vst.msk [vmem:[%s699_s26 + $0x38] sm:$0xf] %vm444_vm0, %v592_v25  ;;  %v269_v35 = vadd.f32 %v670_v1, %v230_v27  ;;  %v270_v36 = vadd.f32 %v670_v1, %v231_v28  ;;  %v235_v37 = vmul.f32 %v660_v0, %v196_v24  ;;  %460 = vst.msk [vmem:[%s699_s26 + $0x3c] sm:$0xf] %vm444_vm0, %v593_v30 }
  0x24   : > { %v271_v38 = vadd.f32 %v670_v1, %v232_v31  ;;  %v272_v39 = vadd.f32 %v670_v1, %v233_v32  ;;  %v273_v40 = vadd.f32 %v670_v1, %v234_v33  ;;  %v236_v41 = vmul.f32 %v660_v0, %v197_v29 }
  0x25   : > { %v300_v42 = vmax.f32 %v268_v34, 0.0  ;;  %v301_v43 = vmax.f32 %v269_v35, 0.0  ;;  %v302_v44 = vmax.f32 %v270_v36, 0.0  ;;  %v274_v45 = vadd.f32 %v670_v1, %v235_v37 }
  0x26   : > { %v303_v46 = vmax.f32 %v271_v38, 0.0  ;;  %v304_v47 = vmax.f32 %v272_v39, 0.0  ;;  %v305_v48 = vmax.f32 %v273_v40, 0.0  ;;  %v275_v49 = vadd.f32 %v670_v1, %v236_v41 }
  0x27   : > { %v594_v53 = vpack.c.bf16 %v300_v42, %v300_v42  ;;  %v595_v54 = vpack.c.bf16 %v301_v43, %v301_v43  ;;  %v596_v55 = vpack.c.bf16 %v302_v44, %v302_v44  ;;  %v306_v56 = vmax.f32 %v274_v45, 0.0 }
  0x28   : > { %v597_v60 = vpack.c.bf16 %v303_v46, %v303_v46  ;;  %v598_v61 = vpack.c.bf16 %v304_v47, %v304_v47  ;;  %v599_v62 = vpack.c.bf16 %v305_v48, %v305_v48  ;;  %v307_v63 = vmax.f32 %v275_v49, 0.0 }
  0x29   : > { %461 = vst.msk [vmem:[%s699_s26 + $0x40] sm:$0xf] %vm444_vm0, %v594_v53  ;;  %462 = vst.msk [vmem:[%s699_s26 + $0x44] sm:$0xf] %vm444_vm0, %v595_v54  ;;  %v600_v3 = vpack.c.bf16 %v306_v56, %v306_v56  ;;  %v237_v4 = vmul.f32 %v660_v0, %v198_v50  ;;  %v238_v5 = vmul.f32 %v660_v0, %v199_v51 }
  0x2a   : > { %463 = vst.msk [vmem:[%s699_s26 + $0x48] sm:$0xf] %vm444_vm0, %v596_v55  ;;  %v239_v6 = vmul.f32 %v660_v0, %v200_v52  ;;  %464 = vst.msk [vmem:[%s699_s26 + $0x4c] sm:$0xf] %vm444_vm0, %v597_v60  ;;  %v601_v8 = vpack.c.bf16 %v307_v63, %v307_v63  ;;  %v240_v9 = vmul.f32 %v660_v0, %v201_v57 }
  0x2b   : > { %465 = vst.msk [vmem:[%s699_s26 + $0x50] sm:$0xf] %vm444_vm0, %v598_v61  ;;  %466 = vst.msk [vmem:[%s699_s26 + $0x54] sm:$0xf] %vm444_vm0, %v599_v62  ;;  %v241_v10 = vmul.f32 %v660_v0, %v202_v58  ;;  %v242_v11 = vmul.f32 %v660_v0, %v203_v59  ;;  %v276_v12 = vadd.f32 %v670_v1, %v237_v4 }
  0x2c   : > { %467 = vst.msk [vmem:[%s699_s26 + $0x58] sm:$0xf] %vm444_vm0, %v600_v3  ;;  %v277_v13 = vadd.f32 %v670_v1, %v238_v5  ;;  %v278_v14 = vadd.f32 %v670_v1, %v239_v6  ;;  %v243_v15 = vmul.f32 %v660_v0, %v204_v2  ;;  %468 = vst.msk [vmem:[%s699_s26 + $0x5c] sm:$0xf] %vm444_vm0, %v601_v8 }
  0x2d   : > { %v279_v16 = vadd.f32 %v670_v1, %v240_v9  ;;  %v280_v17 = vadd.f32 %v670_v1, %v241_v10  ;;  %v281_v18 = vadd.f32 %v670_v1, %v242_v11  ;;  %v244_v19 = vmul.f32 %v660_v0, %v205_v7 }
  0x2e   : > { %v308_v20 = vmax.f32 %v276_v12, 0.0  ;;  %v309_v21 = vmax.f32 %v277_v13, 0.0  ;;  %v310_v22 = vmax.f32 %v278_v14, 0.0  ;;  %v282_v23 = vadd.f32 %v670_v1, %v243_v15 }
  0x2f   : > { %v311_v24 = vmax.f32 %v279_v16, 0.0  ;;  %v312_v25 = vmax.f32 %v280_v17, 0.0  ;;  %v313_v26 = vmax.f32 %v281_v18, 0.0  ;;  %v283_v27 = vadd.f32 %v670_v1, %v244_v19 }
  0x30   : > { %v602_v28 = vpack.c.bf16 %v308_v20, %v308_v20  ;;  %v603_v29 = vpack.c.bf16 %v309_v21, %v309_v21  ;;  %v604_v0 = vpack.c.bf16 %v310_v22, %v310_v22  ;;  %v314_v30 = vmax.f32 %v282_v23, 0.0 }
  0x31   : > { %v605_v31 = vpack.c.bf16 %v311_v24, %v311_v24  ;;  %v606_v32 = vpack.c.bf16 %v312_v25, %v312_v25  ;;  %v607_v33 = vpack.c.bf16 %v313_v26, %v313_v26  ;;  %v315_v34 = vmax.f32 %v283_v27, 0.0 }
  0x32   : > { %469 = vst.msk [vmem:[%s699_s26 + $0x60] sm:$0xf] %vm444_vm0, %v602_v28  ;;  %470 = vst.msk [vmem:[%s699_s26 + $0x64] sm:$0xf] %vm444_vm0, %v603_v29  ;;  %v608_v35 = vpack.c.bf16 %v314_v30, %v314_v30 }
  0x33   : > { %471 = vst.msk [vmem:[%s699_s26 + $0x68] sm:$0xf] %vm444_vm0, %v604_v0  ;;  %472 = vst.msk [vmem:[%s699_s26 + $0x6c] sm:$0xf] %vm444_vm0, %v605_v31  ;;  %v609_v1 = vpack.c.bf16 %v315_v34, %v315_v34 }
  0x34   : > { %473 = vst.msk [vmem:[%s699_s26 + $0x70] sm:$0xf] %vm444_vm0, %v606_v32  ;;  %474 = vst.msk [vmem:[%s699_s26 + $0x74] sm:$0xf] %vm444_vm0, %v607_v33 }
  0x35   : > { %475 = vst.msk [vmem:[%s699_s26 + $0x78] sm:$0xf] %vm444_vm0, %v608_v35  ;;  %476 = vst.msk [vmem:[%s699_s26 + $0x7c] sm:$0xf] %vm444_vm0, %v609_v1 }
  0x36 PF: > { %s13_s12 = sadd.s32 1, %s624_s12  }
  0x37   : > { %p10_p4 = scmp.ge.s32.totalorder %s13_s12, 4  }
  0x39   :  { %12 = sbr.rel (!%p10_p4) target bundleno = 1 (0x1), region = 62 }

// kernel: bottleneck_forward.8
= control target key start
LH: loop header
LB: loop body
LE: loop exit
PB: predicated region body
PF: predicated region fallthrough
CT: control target
= control target key end

     0   :  { %s977_s12 = smov 0   ;;  %s1360_s0 = inlined_call_operand.vmem [shape: bf16[512,16], index: 0, kind: input, shape index: {}]   ;;  %s1361_s1 = inlined_call_operand.vmem [shape: bf16[16,4], index: 1, kind: input, shape index: {}]   ;;  %s1362_s2 = inlined_call_operand.vmem [shape: f32[512,4], index: 2, kind: output, shape index: {0}]   ;;  %s1363_s3 = inlined_call_operand.vmem [shape: f32[3,8,4], index: 3, kind: output, shape index: {1}]  }
   0x1 LB: > { %s818_s13 = sadd.s32 4294967295, %s954_s12   ;;  %p822_p0 = scmp.ge.s32.totalorder %s954_s12, 1  ;;  %s954_s12 = sphi %s977_s12, %s14_s12  }
   0x2   : > { %p136_p1 = scmp.lt.s32.totalorder %s954_s12, 3 }
   0x4   : > { %p137_p2 = pnand %p822_p0, %p136_p1 }
   0x5   : > { %s823_s16 = sshll.u32 (!%p137_p2), %s818_s13, 5  ;;  %p860_p4 = scmp.ne.s32.totalorder (!%p137_p2), %s818_s13, 0 }
   0x6   : > { %140 = sbr.rel (%p137_p2) target bundleno = 397 (0x18d), region = 28  ;;  %p161_p3 = scmp.lt.s32.totalorder (!%p137_p2), %s823_s16, 63 }
   0xb   : > { %v931_v0 = vld [vmem:[%s1361_s1] sm:$0xff]   ;;  %s1365_s16 = smov (!%p161_p3, %s823_s16), 63  ;;  %vm293_vm0 = vcmask 130048   ;;  %vm503_vm1 = vcmask 31744  }
   0xc   : > { %886 = vmatprep.subr.bf16.mxu0 %v931_v0  ;;  %920 = vmatprep.subr.bf16.mxu1 %v931_v0  ;;  %s824_s17 = sshll.u32 %s1365_s16, 2  ;;  %s826_s21 = sshll.u32 %s1365_s16, 3 }
   0xd   : > { %887 = vmatpush3.bf16.msra.mxu0 %v931_v0  ;;  %921 = vmatpush3.bf16.msra.mxu1 %v931_v0  ;;  %s996_s20 = scalar_lea.vmem %s1360_s0, %s824_s17  ;;  %s1034_s24 = scalar_lea.vmem %s1362_s2, %s826_s21 }
   0xe   : > { %v932_v1 = vld [vmem:[%s996_s20] sm:$0xff]   ;;  %v934_v3 = vld [vmem:[%s996_s20 + $0x8] sm:$0xff]   ;;  %v936_v5 = vld [vmem:[%s996_s20 + $0x10] sm:$0xff]  }
   0xf   : > { %v933_v2 = vld [vmem:[%s996_s20 + $0x40] sm:$0xff]   ;;  %888 = vmatprep.mubr.msk.bf16.mxu0 %vm293_vm0, %v932_v1  ;;  %v935_v4 = vld [vmem:[%s996_s20 + $0x48] sm:$0xff]   ;;  %v937_v6 = vld [vmem:[%s996_s20 + $0x50] sm:$0xff]  }
  0x10   : > { %904 = vmatprep.mubr.msk.bf16.mxu1 %vm293_vm0, %v933_v2  ;;  %889 = vmatmul.mubr.msk.bf16.vlgmr.msra.gmra.mxu0 %vm293_vm0, %v934_v3  ;;  %v938_v7 = vld [vmem:[%s996_s20 + $0x18] sm:$0xff]   ;;  %v940_v9 = vld [vmem:[%s996_s20 + $0x20] sm:$0xff]   ;;  %v942_v11 = vld [vmem:[%s996_s20 + $0x28] sm:$0xff]  }
  0x11   : > { %905 = vmatmul.mubr.msk.bf16.vlgmr.msra.gmra.mxu1 %vm293_vm0, %v935_v4  ;;  %892 = vmatprep.mubr.msk.bf16.mxu0 %vm293_vm0, %v936_v5  ;;  %v939_v8 = vld [vmem:[%s996_s20 + $0x58] sm:$0xff]   ;;  %v941_v10 = vld [vmem:[%s996_s20 + $0x60] sm:$0xff]   ;;  %v943_v12 = vld [vmem:[%s996_s20 + $0x68] sm:$0xff]  }
  0x12   : > { %908 = vmatprep.mubr.msk.bf16.mxu1 %vm293_vm0, %v937_v6  ;;  %v944_v13 = vld [vmem:[%s996_s20 + $0x30] sm:$0xff]   ;;  %v946_v15 = vld [vmem:[%s996_s20 + $0x38] sm:$0xff]  }
  0x13   : > { %v945_v14 = vld [vmem:[%s996_s20 + $0x70] sm:$0xff]   ;;  %v947_v16 = vld [vmem:[%s996_s20 + $0x78] sm:$0xff]  }
  0x18   : > { %893 = vmatmul.mubr.msk.bf16.gmra.mxu0 %vm293_vm0, %v938_v7 }
  0x19   : > { %909 = vmatmul.mubr.msk.bf16.gmra.mxu1 %vm293_vm0, %v939_v8  ;;  %896 = vmatprep.mubr.msk.bf16.mxu0 %vm293_vm0, %v940_v9 }
  0x1a   : > { %912 = vmatprep.mubr.msk.bf16.mxu1 %vm293_vm0, %v941_v10 }
  0x20   : > { %897 = vmatmul.mubr.msk.bf16.gmra.mxu0 %vm293_vm0, %v942_v11 }
  0x21   : > { %913 = vmatmul.mubr.msk.bf16.gmra.mxu1 %vm293_vm0, %v943_v12  ;;  %900 = vmatprep.mubr.msk.bf16.mxu0 %vm293_vm0, %v944_v13 }
  0x22   : > { %916 = vmatprep.mubr.msk.bf16.mxu1 %vm293_vm0, %v945_v14 }
  0x28   : > { %901 = vmatmul.mubr.msk.bf16.gmra.mxu0 %vm293_vm0, %v946_v15 }
  0x29   : > { %917 = vmatmul.mubr.msk.bf16.gmra.mxu1 %vm293_vm0, %v947_v16 }
  0xd0   : > { %v1036_v17 = vpop.f32.mrf.mxu0 }
  0xd1   : > { %506 = vst.msk [vmem:[%s1034_s24 + $0x10] sm:$0xff] %vm503_vm1, %v1036_v17  ;;  %v1041_v18 = vpop.f32.mrf.mxu1 }
  0xd2   : > { %522 = vst.msk [vmem:[%s1034_s24 + $0x90] sm:$0xff] %vm503_vm1, %v1041_v18  ;;  %v1046_v19 = vpop.f32.mrf.mxu0 }
  0xd3   : > { %504 = vst.msk [vmem:[%s1034_s24] sm:$0xff] %vm503_vm1, %v1046_v19  ;;  %v1051_v20 = vpop.f32.mrf.mxu1 }
  0xd4   : > { %520 = vst.msk [vmem:[%s1034_s24 + $0x80] sm:$0xff] %vm503_vm1, %v1051_v20  ;;  %v1056_v21 = vpop.f32.mrf.mxu0 }
  0xd5   : > { %507 = vst.msk [vmem:[%s1034_s24 + $0x18] sm:$0xff] %vm503_vm1, %v1056_v21  ;;  %v1061_v22 = vpop.f32.mrf.mxu1 }
  0xd6   : > { %523 = vst.msk [vmem:[%s1034_s24 + $0x98] sm:$0xff] %vm503_vm1, %v1061_v22  ;;  %v1066_v23 = vpop.f32.mrf.mxu0 }
  0xd7   : > { %505 = vst.msk [vmem:[%s1034_s24 + $0x8] sm:$0xff] %vm503_vm1, %v1066_v23  ;;  %v1071_v24 = vpop.f32.mrf.mxu1 }
  0xd8   : > { %521 = vst.msk [vmem:[%s1034_s24 + $0x88] sm:$0xff] %vm503_vm1, %v1071_v24  ;;  %v1076_v25 = vpop.f32.mrf.mxu0 }
  0xd9   : > { %510 = vst.msk [vmem:[%s1034_s24 + $0x30] sm:$0xff] %vm503_vm1, %v1076_v25  ;;  %v1081_v26 = vpop.f32.mrf.mxu1 }
  0xda   : > { %526 = vst.msk [vmem:[%s1034_s24 + $0xb0] sm:$0xff] %vm503_vm1, %v1081_v26  ;;  %v1086_v27 = vpop.f32.mrf.mxu0 }
  0xdb   : > { %508 = vst.msk [vmem:[%s1034_s24 + $0x20] sm:$0xff] %vm503_vm1, %v1086_v27  ;;  %v1091_v28 = vpop.f32.mrf.mxu1 }
  0xdc   : > { %524 = vst.msk [vmem:[%s1034_s24 + $0xa0] sm:$0xff] %vm503_vm1, %v1091_v28  ;;  %v1096_v29 = vpop.f32.mrf.mxu0 }
  0xdd   : > { %511 = vst.msk [vmem:[%s1034_s24 + $0x38] sm:$0xff] %vm503_vm1, %v1096_v29  ;;  %v1101_v30 = vpop.f32.mrf.mxu1 }
  0xde   : > { %527 = vst.msk [vmem:[%s1034_s24 + $0xb8] sm:$0xff] %vm503_vm1, %v1101_v30  ;;  %v1106_v31 = vpop.f32.mrf.mxu0 }
  0xdf   : > { %509 = vst.msk [vmem:[%s1034_s24 + $0x28] sm:$0xff] %vm503_vm1, %v1106_v31  ;;  %v1111_v32 = vpop.f32.mrf.mxu1 }
  0xe0   : > { %525 = vst.msk [vmem:[%s1034_s24 + $0xa8] sm:$0xff] %vm503_vm1, %v1111_v32  ;;  %v1116_v33 = vpop.f32.mrf.mxu0 }
  0xe1   : > { %514 = vst.msk [vmem:[%s1034_s24 + $0x50] sm:$0xff] %vm503_vm1, %v1116_v33  ;;  %v1121_v34 = vpop.f32.mrf.mxu1 }
  0xe2   : > { %530 = vst.msk [vmem:[%s1034_s24 + $0xd0] sm:$0xff] %vm503_vm1, %v1121_v34  ;;  %v1126_v35 = vpop.f32.mrf.mxu0 }
  0xe3   : > { %512 = vst.msk [vmem:[%s1034_s24 + $0x40] sm:$0xff] %vm503_vm1, %v1126_v35  ;;  %v1131_v36 = vpop.f32.mrf.mxu1 }
  0xe4   : > { %528 = vst.msk [vmem:[%s1034_s24 + $0xc0] sm:$0xff] %vm503_vm1, %v1131_v36  ;;  %v1136_v37 = vpop.f32.mrf.mxu0 }
  0xe5   : > { %515 = vst.msk [vmem:[%s1034_s24 + $0x58] sm:$0xff] %vm503_vm1, %v1136_v37  ;;  %v1141_v38 = vpop.f32.mrf.mxu1 }
  0xe6   : > { %531 = vst.msk [vmem:[%s1034_s24 + $0xd8] sm:$0xff] %vm503_vm1, %v1141_v38  ;;  %v1146_v39 = vpop.f32.mrf.mxu0 }
  0xe7   : > { %513 = vst.msk [vmem:[%s1034_s24 + $0x48] sm:$0xff] %vm503_vm1, %v1146_v39  ;;  %v1151_v40 = vpop.f32.mrf.mxu1 }
  0xe8   : > { %529 = vst.msk [vmem:[%s1034_s24 + $0xc8] sm:$0xff] %vm503_vm1, %v1151_v40  ;;  %v1156_v41 = vpop.f32.mrf.mxu0 }
  0xe9   : > { %518 = vst.msk [vmem:[%s1034_s24 + $0x70] sm:$0xff] %vm503_vm1, %v1156_v41  ;;  %v1161_v42 = vpop.f32.mrf.mxu1 }
  0xea   : > { %534 = vst.msk [vmem:[%s1034_s24 + $0xf0] sm:$0xff] %vm503_vm1, %v1161_v42  ;;  %v1166_v43 = vpop.f32.mrf.mxu0 }
  0xeb   : > { %516 = vst.msk [vmem:[%s1034_s24 + $0x60] sm:$0xff] %vm503_vm1, %v1166_v43  ;;  %v1171_v44 = vpop.f32.mrf.mxu1 }
  0xec   : > { %532 = vst.msk [vmem:[%s1034_s24 + $0xe0] sm:$0xff] %vm503_vm1, %v1171_v44  ;;  %v1176_v45 = vpop.f32.mrf.mxu0  ;;  %539 = sbr.rel (%p860_p4) target bundleno = 319 (0x13f), region = 32 }
  0xed   : > { %519 = vst.msk [vmem:[%s1034_s24 + $0x78] sm:$0xff] %vm503_vm1, %v1176_v45  ;;  %v1181_v46 = vpop.f32.mrf.mxu1 }
  0xee   : > { %535 = vst.msk [vmem:[%s1034_s24 + $0xf8] sm:$0xff] %vm503_vm1, %v1181_v46  ;;  %v1186_v47 = vpop.f32.mrf.mxu0 }
  0xef   : > { %517 = vst.msk [vmem:[%s1034_s24 + $0x68] sm:$0xff] %vm503_vm1, %v1186_v47  ;;  %v1191_v48 = vpop.f32.mrf.mxu1 }
  0xf0   : > { %533 = vst.msk [vmem:[%s1034_s24 + $0xe8] sm:$0xff] %vm503_vm1, %v1191_v48 }
  0xf1   : > { %v540_v49 = vsel %vm503_vm1, %v1046_v19, 0.0  ;;  %v541_v50 = vsel %vm503_vm1, %v1066_v23, 0.0  ;;  %v543_v51 = vsel %vm503_vm1, %v1036_v17, 0.0  ;;  %v545_v53 = vsel %vm503_vm1, %v1056_v21, 0.0 }
  0xf2   : > { %v542_v52 = vadd.f32 %v541_v50, %v540_v49  ;;  %v547_v55 = vsel %vm503_vm1, %v1086_v27, 0.0  ;;  %v549_v57 = vsel %vm503_vm1, %v1106_v31, 0.0  ;;  %v551_v59 = vsel %vm503_vm1, %v1076_v25, 0.0 }
  0xf3   : > { %v553_v61 = vsel %vm503_vm1, %v1096_v29, 0.0  ;;  %v956_v62 = vmov 0.0   ;;  %v555_v0 = vsel %vm503_vm1, %v1126_v35, 0.0  ;;  %v557_v2 = vsel %vm503_vm1, %v1146_v39, 0.0 }
  0xf4   : > { %v544_v54 = vadd.f32 %v543_v51, %v542_v52  ;;  %861 = vst.msk [vmem:[%s1363_s3 + $0x8] sm:$0xff] %vm503_vm1, %v956_v62  ;;  %862 = vst.msk [vmem:[%s1363_s3 + $0x10] sm:$0xff] %vm503_vm1, %v956_v62  ;;  %v559_v4 = vsel %vm503_vm1, %v1116_v33, 0.0  ;;  %v561_v6 = vsel %vm503_vm1, %v1136_v37, 0.0  ;;  %v563_v8 = vsel %vm503_vm1, %v1166_v43, 0.0 }
  0xf5   : > { %v565_v10 = vsel %vm503_vm1, %v1186_v47, 0.0  ;;  %v567_v12 = vsel %vm503_vm1, %v1156_v41, 0.0  ;;  %v569_v14 = vsel %vm503_vm1, %v1176_v45, 0.0  ;;  %v571_v16 = vsel %vm503_vm1, %v1051_v20, 0.0 }
  0xf6   : > { %v546_v56 = vadd.f32 %v545_v53, %v544_v54  ;;  %v573_v50 = vsel %vm503_vm1, %v1071_v24, 0.0  ;;  %v575_v52 = vsel %vm503_vm1, %v1041_v18, 0.0  ;;  %v577_v54 = vsel %vm503_vm1, %v1061_v22, 0.0 }
  0xf7   : > { %v585_v62 = vsel %vm503_vm1, %v1101_v30, 0.0 }
  0xf8   : > { %v548_v58 = vadd.f32 %v547_v55, %v546_v56  ;;  %v579_v56 = vsel %vm503_vm1, %v1091_v28, 0.0 }
  0xfa   : > { %v550_v60 = vadd.f32 %v549_v57, %v548_v58  ;;  %v581_v58 = vsel %vm503_vm1, %v1111_v32, 0.0 }
  0xfc   : > { %v552_v63 = vadd.f32 %v551_v59, %v550_v60  ;;  %v583_v60 = vsel %vm503_vm1, %v1081_v26, 0.0 }
  0xfe   : > { %v554_v1 = vadd.f32 %v553_v61, %v552_v63 }
 0x100   : > { %v556_v3 = vadd.f32 %v555_v0, %v554_v1  ;;  %v587_v0 = vsel %vm503_vm1, %v1131_v36, 0.0 }
 0x102   : > { %v558_v5 = vadd.f32 %v557_v2, %v556_v3  ;;  %v589_v2 = vsel %vm503_vm1, %v1151_v40, 0.0 }
 0x104   : > { %v560_v7 = vadd.f32 %v559_v4, %v558_v5  ;;  %v591_v4 = vsel %vm503_vm1, %v1121_v34, 0.0 }
 0x106   : > { %v562_v9 = vadd.f32 %v561_v6, %v560_v7  ;;  %v593_v6 = vsel %vm503_vm1, %v1141_v38, 0.0 }
 0x108   : > { %v564_v11 = vadd.f32 %v563_v8, %v562_v9  ;;  %v595_v8 = vsel %vm503_vm1, %v1171_v44, 0.0 }
 0x10a   : > { %v566_v13 = vadd.f32 %v565_v10, %v564_v11  ;;  %v597_v10 = vsel %vm503_vm1, %v1191_v48, 0.0 }
 0x10c   : > { %v568_v15 = vadd.f32 %v567_v12, %v566_v13  ;;  %v599_v12 = vsel %vm503_vm1, %v1161_v42, 0.0 }
 0x10e   : > { %v570_v49 = vadd.f32 %v569_v14, %v568_v15  ;;  %v601_v14 = vsel %vm503_vm1, %v1181_v46, 0.0 }
 0x110   : > { %v572_v51 = vadd.f32 %v571_v16, %v570_v49 }
 0x112   : > { %v574_v53 = vadd.f32 %v573_v50, %v572_v51 }
 0x114   : > { %v576_v55 = vadd.f32 %v575_v52, %v574_v53 }
 0x116   : > { %v578_v57 = vadd.f32 %v577_v54, %v576_v55 }
 0x118   : > { %v580_v59 = vadd.f32 %v579_v56, %v578_v57 }
 0x11a   : > { %v582_v61 = vadd.f32 %v581_v58, %v580_v59 }
 0x11c   : > { %v584_v63 = vadd.f32 %v583_v60, %v582_v61 }
 0x11e   : > { %v586_v1 = vadd.f32 %v585_v62, %v584_v63 }
 0x120   : > { %v588_v3 = vadd.f32 %v587_v0, %v586_v1 }
 0x122   : > { %v590_v5 = vadd.f32 %v589_v2, %v588_v3 }
 0x124   : > { %v592_v7 = vadd.f32 %v591_v4, %v590_v5 }
 0x126   : > { %v594_v9 = vadd.f32 %v593_v6, %v592_v7 }
 0x128   : > { %v596_v11 = vadd.f32 %v595_v8, %v594_v9 }
 0x12a   : > { %v598_v13 = vadd.f32 %v597_v10, %v596_v11 }
 0x12c   : > { %v600_v15 = vadd.f32 %v599_v12, %v598_v13 }
 0x12e   : > { %v602_v16 = vadd.f32 %v601_v14, %v600_v15 }
 0x130   : > { %v603_v49 = vrot.slane %v602_v16, 4 }
 0x132   : > { %v604_v50 = vadd.f32 %v603_v49, %v602_v16 }
 0x134   : > { %v605_v51 = vrot.slane %v604_v50, 2 }
 0x136   : > { %v606_v52 = vadd.f32 %v605_v51, %v604_v50 }
 0x138   : > { %v607_v53 = vrot.slane %v606_v52, 1 }
 0x13a   : > { %v608_v54 = vadd.f32 %v607_v53, %v606_v52 }
 0x13c   : > { %v609_v55 = vmul.f32 0.00390625, %v608_v54 }
 0x13e   : > { %610 = vst.msk [vmem:[%s1363_s3] sm:$0xff] %vm503_vm1, %v609_v55 }
 0x13f PF: > { %v616_v56 = vlaneseq }
 0x141   : > { %v617_v57 = vshrl.u32 %v616_v56, 7 }
 0x143   : > { %v618_v58 = vsub.s32 0, %v617_v57 }
 0x145   : > { %v615_v59 = vld [vmem:[%s1363_s3] sm:$0xff] }
 0x146   : > { %v1277_v60 = vrot.slane %v615_v59, %v618_v58 }
 0x148   : > { %v620_v61 = vsub.f32 %v1046_v19, %v1277_v60  ;;  %v621_v62 = vsub.f32 %v1066_v23, %v1277_v60  ;;  %v622_v63 = vsub.f32 %v1036_v17, %v1277_v60  ;;  %v623_v0 = vsub.f32 %v1056_v21, %v1277_v60 }
 0x149   : > { %v624_v3 = vsub.f32 %v1086_v27, %v1277_v60  ;;  %v625_v5 = vsub.f32 %v1106_v31, %v1277_v60  ;;  %v626_v23 = vsub.f32 %v1076_v25, %v1277_v60  ;;  %v627_v21 = vsub.f32 %v1096_v29, %v1277_v60 }
 0x14a   : > { %v652_v1 = vmul.f32 %v620_v61, %v620_v61  ;;  %v653_v2 = vmul.f32 %v621_v62, %v621_v62  ;;  %v654_v4 = vmul.f32 %v622_v63, %v622_v63  ;;  %v655_v6 = vmul.f32 %v623_v0, %v623_v0 }
 0x14b   : > { %v686_v19 = vadd.f32 %v621_v62, %v620_v61  ;;  %v656_v8 = vmul.f32 %v624_v3, %v624_v3  ;;  %v657_v10 = vmul.f32 %v625_v5, %v625_v5  ;;  %v628_v27 = vsub.f32 %v1126_v35, %v1277_v60 }
 0x14c   : > { %v687_v7 = vadd.f32 %v653_v2, %v652_v1  ;;  %v658_v13 = vmul.f32 %v626_v23, %v626_v23  ;;  %v629_v15 = vsub.f32 %v1146_v39, %v1277_v60  ;;  %v659_v16 = vmul.f32 %v627_v21, %v627_v21 }
 0x14d   : > { %v688_v17 = vadd.f32 %v686_v19, %v622_v63  ;;  %v630_v50 = vsub.f32 %v1116_v33, %v1277_v60  ;;  %v660_v51 = vmul.f32 %v628_v27, %v628_v27  ;;  %v631_v53 = vsub.f32 %v1136_v37, %v1277_v60 }
 0x14e   : > { %v689_v9 = vadd.f32 %v687_v7, %v654_v4  ;;  %v661_v54 = vmul.f32 %v629_v15, %v629_v15  ;;  %v632_v56 = vsub.f32 %v1166_v43, %v1277_v60  ;;  %v633_v59 = vsub.f32 %v1186_v47, %v1277_v60 }
 0x14f   : > { %v690_v11 = vadd.f32 %v688_v17, %v623_v0  ;;  %v662_v57 = vmul.f32 %v630_v50, %v630_v50  ;;  %v663_v61 = vmul.f32 %v631_v53, %v631_v53  ;;  %v634_v63 = vsub.f32 %v1156_v41, %v1277_v60 }
 0x150   : > { %v691_v12 = vadd.f32 %v689_v9, %v655_v6  ;;  %v664_v0 = vmul.f32 %v632_v56, %v632_v56  ;;  %v635_v2 = vsub.f32 %v1176_v45, %v1277_v60  ;;  %v637_v7 = vsub.f32 %v1071_v24, %v1277_v60 }
 0x151   : > { %v692_v31 = vadd.f32 %v690_v11, %v624_v3  ;;  %v665_v3 = vmul.f32 %v633_v59, %v633_v59  ;;  %v666_v6 = vmul.f32 %v634_v63, %v634_v63  ;;  %v638_v17 = vsub.f32 %v1041_v18, %v1277_v60 }
 0x152   : > { %v693_v14 = vadd.f32 %v691_v12, %v656_v8  ;;  %v669_v11 = vmul.f32 %v637_v7, %v637_v7 }
 0x153   : > { %v694_v25 = vadd.f32 %v692_v31, %v625_v5  ;;  %v636_v5 = vsub.f32 %v1051_v20, %v1277_v60 }
 0x154   : > { %v695_v49 = vadd.f32 %v693_v14, %v657_v10  ;;  %v639_v10 = vsub.f32 %v1061_v22, %v1277_v60  ;;  %v641_v14 = vsub.f32 %v1111_v32, %v1277_v60 }
 0x155   : > { %v696_v29 = vadd.f32 %v694_v25, %v626_v23  ;;  %v667_v23 = vmul.f32 %v635_v2, %v635_v2  ;;  %v668_v9 = vmul.f32 %v636_v5, %v636_v5  ;;  %v642_v25 = vsub.f32 %v1081_v26, %v1277_v60 }
 0x156   : > { %v697_v52 = vadd.f32 %v695_v49, %v658_v13  ;;  %v670_v13 = vmul.f32 %v638_v17, %v638_v17 }
 0x157   : > { %v698_v35 = vadd.f32 %v696_v29, %v627_v21  ;;  %v673_v29 = vmul.f32 %v641_v14, %v641_v14 }
 0x158   : > { %v699_v55 = vadd.f32 %v697_v52, %v659_v16 }
 0x159   : > { %v700_v39 = vadd.f32 %v698_v35, %v628_v27  ;;  %v640_v27 = vsub.f32 %v1091_v28, %v1277_v60 }
 0x15a   : > { %v701_v58 = vadd.f32 %v699_v55, %v660_v51  ;;  %v643_v51 = vsub.f32 %v1101_v30, %v1277_v60  ;;  %v645_v55 = vsub.f32 %v1151_v40, %v1277_v60 }
 0x15b   : > { %v702_v33 = vadd.f32 %v700_v39, %v629_v15  ;;  %v671_v15 = vmul.f32 %v639_v10, %v639_v10  ;;  %v672_v49 = vmul.f32 %v640_v27, %v640_v27  ;;  %v646_v39 = vsub.f32 %v1121_v34, %v1277_v60 }
 0x15c   : > { %v703_v62 = vadd.f32 %v701_v58, %v661_v54  ;;  %v674_v54 = vmul.f32 %v642_v25, %v642_v25 }
 0x15d   : > { %v704_v37 = vadd.f32 %v702_v33, %v630_v50  ;;  %v677_v33 = vmul.f32 %v645_v55, %v645_v55 }
 0x15e   : > { %v705_v1 = vadd.f32 %v703_v62, %v662_v57 }
 0x15f   : > { %v706_v43 = vadd.f32 %v704_v37, %v631_v53  ;;  %v644_v53 = vsub.f32 %v1131_v36, %v1277_v60 }
 0x160   : > { %v707_v4 = vadd.f32 %v705_v1, %v663_v61  ;;  %v647_v61 = vsub.f32 %v1141_v38, %v1277_v60  ;;  %v649_v1 = vsub.f32 %v1191_v48, %v1277_v60 }
 0x161   : > { %v708_v47 = vadd.f32 %v706_v43, %v632_v56  ;;  %v675_v56 = vmul.f32 %v643_v51, %v643_v51  ;;  %v676_v58 = vmul.f32 %v644_v53, %v644_v53  ;;  %v650_v43 = vsub.f32 %v1161_v42, %v1277_v60  ;;  %v863_v42 = vld [vmem:[%s1363_s3 + $0x8] sm:$0xff] }
 0x162   : > { %v709_v19 = vadd.f32 %v707_v4, %v664_v0  ;;  %v678_v0 = vmul.f32 %v646_v39, %v646_v39 }
 0x163   : > { %v710_v41 = vadd.f32 %v708_v47, %v633_v59  ;;  %v681_v47 = vmul.f32 %v649_v1, %v649_v1 }
 0x164   : > { %v711_v8 = vadd.f32 %v709_v19, %v665_v3 }
 0x165   : > { %v712_v45 = vadd.f32 %v710_v41, %v634_v63  ;;  %v648_v63 = vsub.f32 %v1171_v44, %v1277_v60 }
 0x166   : > { %v713_v21 = vadd.f32 %v711_v8, %v666_v6  ;;  %v651_v6 = vsub.f32 %v1181_v46, %v1277_v60 }
 0x167   : > { %v714_v20 = vadd.f32 %v712_v45, %v635_v2  ;;  %v679_v2 = vmul.f32 %v647_v61, %v647_v61  ;;  %v680_v4 = vmul.f32 %v648_v63, %v648_v63 }
 0x168   : > { %v715_v12 = vadd.f32 %v713_v21, %v667_v23  ;;  %v683_v8 = vmul.f32 %v651_v6, %v651_v6  ;;  %v865_v21 = vld [vmem:[%s1363_s3 + $0x10] sm:$0xff] }
 0x169   : > { %v716_v24 = vadd.f32 %v714_v20, %v636_v5 }
 0x16a   : > { %v717_v31 = vadd.f32 %v715_v12, %v668_v9 }
 0x16b   : > { %v718_v18 = vadd.f32 %v716_v24, %v637_v7  ;;  %v682_v7 = vmul.f32 %v650_v43, %v650_v43 }
 0x16c   : > { %v719_v16 = vadd.f32 %v717_v31, %v669_v11 }
 0x16d   : > { %v720_v22 = vadd.f32 %v718_v18, %v638_v17 }
 0x16e   : > { %v721_v50 = vadd.f32 %v719_v16, %v670_v13 }
 0x16f   : > { %v722_v28 = vadd.f32 %v720_v22, %v639_v10 }
 0x170   : > { %v723_v52 = vadd.f32 %v721_v50, %v671_v15 }
 0x171   : > { %v724_v32 = vadd.f32 %v722_v28, %v640_v27 }
 0x172   : > { %v725_v35 = vadd.f32 %v723_v52, %v672_v49 }
 0x173   : > { %v726_v26 = vadd.f32 %v724_v32, %v641_v14 }
 0x174   : > { %v727_v57 = vadd.f32 %v725_v35, %v673_v29 }
 0x175   : > { %v728_v30 = vadd.f32 %v726_v26, %v642_v25 }
 0x176   : > { %v729_v59 = vadd.f32 %v727_v57, %v674_v54 }
 0x177   : > { %v730_v36 = vadd.f32 %v728_v30, %v643_v51 }
 0x178   : > { %v731_v62 = vadd.f32 %v729_v59, %v675_v56 }
 0x179   : > { %v732_v40 = vadd.f32 %v730_v36, %v644_v53 }
 0x17a   : > { %v733_v37 = vadd.f32 %v731_v62, %v676_v58 }
 0x17b   : > { %v734_v34 = vadd.f32 %v732_v40, %v645_v55 }
 0x17c   : > { %v735_v3 = vadd.f32 %v733_v37, %v677_v33 }
 0x17d   : > { %v736_v38 = vadd.f32 %v734_v34, %v646_v39 }
 0x17e   : > { %v737_v5 = vadd.f32 %v735_v3, %v678_v0 }
 0x17f   : > { %v738_v44 = vadd.f32 %v736_v38, %v647_v61 }
 0x180   : > { %v739_v19 = vadd.f32 %v737_v5, %v679_v2 }
 0x181   : > { %v740_v23 = vadd.f32 %v738_v44, %v648_v63 }
 0x182   : > { %v741_v41 = vadd.f32 %v739_v19, %v680_v4 }
 0x183   : > { %v742_v48 = vadd.f32 %v740_v23, %v649_v1 }
 0x184   : > { %v743_v17 = vadd.f32 %v741_v41, %v681_v47 }
 0x185   : > { %v744_v9 = vadd.f32 %v742_v48, %v650_v43 }
 0x186   : > { %v745_v45 = vadd.f32 %v743_v17, %v682_v7 }
 0x187   : > { %v746_v46 = vadd.f32 %v744_v9, %v651_v6 }
 0x188   : > { %v747_v60 = vadd.f32 %v745_v45, %v683_v8 }
 0x189   : > { %v750_v10 = vadd.f32 %v863_v42, %v746_v46 }
 0x18a   : > { %v754_v11 = vadd.f32 %v865_v21, %v747_v60 }
 0x18b   : > { %864 = vst.msk [vmem:[%s1363_s3 + $0x8] sm:$0xff] %vm503_vm1, %v750_v10 }
 0x18c   : > { %866 = vst.msk [vmem:[%s1363_s3 + $0x10] sm:$0xff] %vm503_vm1, %v754_v11 }
 0x18d PF: > { %s14_s12 = sadd.s32 1, %s954_s12  }
 0x18e   : > { %p11_p5 = scmp.ge.s32.totalorder %s14_s12, 4  }
 0x190   :  { %13 = sbr.rel (!%p11_p5) target bundleno = 1 (0x1), region = 74 }

// kernel: bottleneck_forward.10
= control target key start
LH: loop header
LB: loop body
LE: loop exit
PB: predicated region body
PF: predicated region fallthrough
CT: control target
= control target key end

     0   :  { %s1252_s12 = smov 0   ;;  %s1839_s0 = inlined_call_operand.vmem [shape: bf16[512,64], index: 0, kind: input, shape index: {}]   ;;  %s1840_s1 = inlined_call_operand.vmem [shape: bf16[64,4], index: 1, kind: input, shape index: {}]   ;;  %s1841_s2 = inlined_call_operand.vmem [shape: f32[512,4], index: 2, kind: output, shape index: {0}]   ;;  %s1842_s3 = inlined_call_operand.vmem [shape: f32[3,8,4], index: 3, kind: output, shape index: {1}]  }
   0x1 LB: > { %s1258_s13 = sadd.s32 4294967295, %s1228_s12   ;;  %p1041_p0 = scmp.ge.s32.totalorder %s1228_s12, 1  ;;  %s1228_s12 = sphi %s1252_s12, %s14_s12  }
   0x2   : > { %p136_p1 = scmp.lt.s32.totalorder %s1228_s12, 3 }
   0x4   : > { %p137_p2 = pnand %p1041_p0, %p136_p1 }
   0x5   : > { %s1042_s16 = sshll.u32 (!%p137_p2), %s1258_s13, 5  ;;  %p1082_p4 = scmp.ne.s32.totalorder (!%p137_p2), %s1258_s13, 0 }
   0x6   : > { %140 = sbr.rel (%p137_p2) target bundleno = 418 (0x1a2), region = 28  ;;  %p161_p3 = scmp.lt.s32.totalorder (!%p137_p2), %s1042_s16, 63 }
   0xb   : > { %v1202_v0 = vld [vmem:[%s1840_s1 + $0x18] sm:$0xff]   ;;  %v1203_v1 = vld [vmem:[%s1840_s1 + $0x10] sm:$0xff]   ;;  %s1858_s16 = smov (!%p161_p3, %s1042_s16), 63  ;;  %v1204_v2 = vld [vmem:[%s1840_s1 + $0x8] sm:$0xff]   ;;  %vm317_vm0 = vcmask 523264   ;;  %vm527_vm1 = vcmask 31744  }
   0xc   : > { %1144 = vmatprep.subr.bf16.mxu0 %v1202_v0  ;;  %1184 = vmatprep.subr.bf16.mxu1 %v1202_v0  ;;  %s1043_s21 = sshll.u32 %s1858_s16, 2  ;;  %v1205_v3 = vld [vmem:[%s1840_s1] sm:$0xff]   ;;  %s1045_s27 = sshll.u32 %s1858_s16, 3 }
   0xd   : > { %1145 = vmatpush3.bf16.msra.mxu0 %v1202_v0  ;;  %1188 = vmatpush3.bf16.msra.mxu1 %v1202_v0  ;;  %s1281_s26 = scalar_lea.vmem %s1839_s0, %s1043_s21  ;;  %s1319_s30 = scalar_lea.vmem %s1841_s2, %s1045_s27 }
   0xe   : > { %1146 = vmatprep.subr.bf16.mxu0 %v1203_v1  ;;  %1185 = vmatprep.subr.bf16.mxu1 %v1203_v1  ;;  %v1206_v4 = vld [vmem:[%s1281_s26] sm:$0xff]   ;;  %v1208_v6 = vld [vmem:[%s1281_s26 + $0x8] sm:$0xff]   ;;  %v1210_v8 = vld [vmem:[%s1281_s26 + $0x10] sm:$0xff]  }
   0xf   : > { %v1207_v5 = vld [vmem:[%s1281_s26 + $0x40] sm:$0xff]   ;;  %1152 = vmatprep.mubr.msk.bf16.mxu0 %vm317_vm0, %v1206_v4  ;;  %v1209_v7 = vld [vmem:[%s1281_s26 + $0x48] sm:$0xff]   ;;  %v1211_v9 = vld [vmem:[%s1281_s26 + $0x50] sm:$0xff]  }
  0x10   : > { %1168 = vmatprep.mubr.msk.bf16.mxu1 %vm317_vm0, %v1207_v5  ;;  %v1212_v10 = vld [vmem:[%s1281_s26 + $0x18] sm:$0xff]   ;;  %v1214_v12 = vld [vmem:[%s1281_s26 + $0x20] sm:$0xff]   ;;  %v1216_v14 = vld [vmem:[%s1281_s26 + $0x28] sm:$0xff]  }
  0x11   : > { %1147 = vmatpush3.bf16.msra.mxu0 %v1203_v1  ;;  %1189 = vmatpush3.bf16.msra.mxu1 %v1203_v1  ;;  %v1213_v11 = vld [vmem:[%s1281_s26 + $0x58] sm:$0xff]   ;;  %v1215_v13 = vld [vmem:[%s1281_s26 + $0x60] sm:$0xff]   ;;  %v1217_v15 = vld [vmem:[%s1281_s26 + $0x68] sm:$0xff]  }
  0x12   : > { %1148 = vmatprep.subr.bf16.mxu0 %v1204_v2  ;;  %1186 = vmatprep.subr.bf16.mxu1 %v1204_v2  ;;  %v1218_v16 = vld [vmem:[%s1281_s26 + $0x30] sm:$0xff]   ;;  %v1220_v18 = vld [vmem:[%s1281_s26 + $0x38] sm:$0xff]  }
  0x13   : > { %v1219_v17 = vld [vmem:[%s1281_s26 + $0x70] sm:$0xff]   ;;  %v1221_v19 = vld [vmem:[%s1281_s26 + $0x78] sm:$0xff]  }
  0x15   : > { %1149 = vmatpush3.bf16.msra.mxu0 %v1204_v2  ;;  %1190 = vmatpush3.bf16.msra.mxu1 %v1204_v2 }
  0x16   : > { %1150 = vmatprep.subr.bf16.mxu0 %v1205_v3  ;;  %1187 = vmatprep.subr.bf16.mxu1 %v1205_v3 }
  0x19   : > { %1151 = vmatpush3.bf16.msra.mxu0 %v1205_v3  ;;  %1191 = vmatpush3.bf16.msra.mxu1 %v1205_v3 }
  0x1c   : > { %1153 = vmatmul.mubr.msk.bf16.vlgmr.msra.gmra.mxu0 %vm317_vm0, %v1208_v6  ;;  %1169 = vmatmul.mubr.msk.bf16.vlgmr.msra.gmra.mxu1 %vm317_vm0, %v1209_v7 }
  0x1d   : > { %1156 = vmatprep.mubr.msk.bf16.mxu0 %vm317_vm0, %v1210_v8  ;;  %1172 = vmatprep.mubr.msk.bf16.mxu1 %vm317_vm0, %v1211_v9 }
  0x24   : > { %1157 = vmatmul.mubr.msk.bf16.gmra.mxu0 %vm317_vm0, %v1212_v10  ;;  %1173 = vmatmul.mubr.msk.bf16.gmra.mxu1 %vm317_vm0, %v1213_v11 }
  0x25   : > { %1160 = vmatprep.mubr.msk.bf16.mxu0 %vm317_vm0, %v1214_v12  ;;  %1176 = vmatprep.mubr.msk.bf16.mxu1 %vm317_vm0, %v1215_v13 }
  0x2c   : > { %1161 = vmatmul.mubr.msk.bf16.gmra.mxu0 %vm317_vm0, %v1216_v14  ;;  %1177 = vmatmul.mubr.msk.bf16.gmra.mxu1 %vm317_vm0, %v1217_v15 }
  0x2d   : > { %1164 = vmatprep.mubr.msk.bf16.mxu0 %vm317_vm0, %v1218_v16  ;;  %1180 = vmatprep.mubr.msk.bf16.mxu1 %vm317_vm0, %v1219_v17 }
  0x34   : > { %1165 = vmatmul.mubr.msk.bf16.gmra.mxu0 %vm317_vm0, %v1220_v18  ;;  %1181 = vmatmul.mubr.msk.bf16.gmra.mxu1 %vm317_vm0, %v1221_v19 }
  0xdc   : > { %v1321_v20 = vpop.f32.mrf.mxu0  ;;  %v1323_v21 = vpop.f32.mrf.mxu1 }
  0xdd   : > { %530 = vst.msk [vmem:[%s1319_s30 + $0x10] sm:$0xff] %vm527_vm1, %v1321_v20  ;;  %546 = vst.msk [vmem:[%s1319_s30 + $0x90] sm:$0xff] %vm527_vm1, %v1323_v21 }
  0xde   : > { %v1331_v22 = vpop.f32.mrf.mxu0  ;;  %v1333_v23 = vpop.f32.mrf.mxu1 }
  0xdf   : > { %528 = vst.msk [vmem:[%s1319_s30] sm:$0xff] %vm527_vm1, %v1331_v22  ;;  %544 = vst.msk [vmem:[%s1319_s30 + $0x80] sm:$0xff] %vm527_vm1, %v1333_v23 }
  0xe0   : > { %v1341_v24 = vpop.f32.mrf.mxu0  ;;  %v1343_v25 = vpop.f32.mrf.mxu1 }
  0xe1   : > { %531 = vst.msk [vmem:[%s1319_s30 + $0x18] sm:$0xff] %vm527_vm1, %v1341_v24  ;;  %547 = vst.msk [vmem:[%s1319_s30 + $0x98] sm:$0xff] %vm527_vm1, %v1343_v25 }
  0xe2   : > { %v1351_v26 = vpop.f32.mrf.mxu0  ;;  %v1353_v27 = vpop.f32.mrf.mxu1 }
  0xe3   : > { %529 = vst.msk [vmem:[%s1319_s30 + $0x8] sm:$0xff] %vm527_vm1, %v1351_v26  ;;  %545 = vst.msk [vmem:[%s1319_s30 + $0x88] sm:$0xff] %vm527_vm1, %v1353_v27 }
  0xe4   : > { %v1361_v28 = vpop.f32.mrf.mxu0  ;;  %v1363_v29 = vpop.f32.mrf.mxu1 }
  0xe5   : > { %534 = vst.msk [vmem:[%s1319_s30 + $0x30] sm:$0xff] %vm527_vm1, %v1361_v28  ;;  %550 = vst.msk [vmem:[%s1319_s30 + $0xb0] sm:$0xff] %vm527_vm1, %v1363_v29 }
  0xe6   : > { %v1371_v30 = vpop.f32.mrf.mxu0  ;;  %v1373_v31 = vpop.f32.mrf.mxu1 }
  0xe7   : > { %532 = vst.msk [vmem:[%s1319_s30 + $0x20] sm:$0xff] %vm527_vm1, %v1371_v30  ;;  %548 = vst.msk [vmem:[%s1319_s30 + $0xa0] sm:$0xff] %vm527_vm1, %v1373_v31 }
  0xe8   : > { %v1381_v32 = vpop.f32.mrf.mxu0  ;;  %v1383_v33 = vpop.f32.mrf.mxu1 }
  0xe9   : > { %535 = vst.msk [vmem:[%s1319_s30 + $0x38] sm:$0xff] %vm527_vm1, %v1381_v32  ;;  %551 = vst.msk [vmem:[%s1319_s30 + $0xb8] sm:$0xff] %vm527_vm1, %v1383_v33 }
  0xea   : > { %v1391_v34 = vpop.f32.mrf.mxu0  ;;  %v1393_v35 = vpop.f32.mrf.mxu1 }
  0xeb   : > { %533 = vst.msk [vmem:[%s1319_s30 + $0x28] sm:$0xff] %vm527_vm1, %v1391_v34  ;;  %549 = vst.msk [vmem:[%s1319_s30 + $0xa8] sm:$0xff] %vm527_vm1, %v1393_v35 }
  0xec   : > { %v1401_v36 = vpop.f32.mrf.mxu0  ;;  %v1403_v37 = vpop.f32.mrf.mxu1 }
  0xed   : > { %538 = vst.msk [vmem:[%s1319_s30 + $0x50] sm:$0xff] %vm527_vm1, %v1401_v36  ;;  %554 = vst.msk [vmem:[%s1319_s30 + $0xd0] sm:$0xff] %vm527_vm1, %v1403_v37 }
  0xee   : > { %v1411_v38 = vpop.f32.mrf.mxu0  ;;  %v1413_v39 = vpop.f32.mrf.mxu1 }
  0xef   : > { %536 = vst.msk [vmem:[%s1319_s30 + $0x40] sm:$0xff] %vm527_vm1, %v1411_v38  ;;  %552 = vst.msk [vmem:[%s1319_s30 + $0xc0] sm:$0xff] %vm527_vm1, %v1413_v39 }
  0xf0   : > { %v1421_v40 = vpop.f32.mrf.mxu0  ;;  %v1423_v41 = vpop.f32.mrf.mxu1 }
  0xf1   : > { %539 = vst.msk [vmem:[%s1319_s30 + $0x58] sm:$0xff] %vm527_vm1, %v1421_v40  ;;  %555 = vst.msk [vmem:[%s1319_s30 + $0xd8] sm:$0xff] %vm527_vm1, %v1423_v41 }
  0xf2   : > { %v1431_v42 = vpop.f32.mrf.mxu0  ;;  %v1433_v43 = vpop.f32.mrf.mxu1 }
  0xf3   : > { %537 = vst.msk [vmem:[%s1319_s30 + $0x48] sm:$0xff] %vm527_vm1, %v1431_v42  ;;  %553 = vst.msk [vmem:[%s1319_s30 + $0xc8] sm:$0xff] %vm527_vm1, %v1433_v43 }
  0xf4   : > { %v1441_v44 = vpop.f32.mrf.mxu0  ;;  %v1443_v45 = vpop.f32.mrf.mxu1 }
  0xf5   : > { %542 = vst.msk [vmem:[%s1319_s30 + $0x70] sm:$0xff] %vm527_vm1, %v1441_v44  ;;  %558 = vst.msk [vmem:[%s1319_s30 + $0xf0] sm:$0xff] %vm527_vm1, %v1443_v45 }
  0xf6   : > { %v1451_v46 = vpop.f32.mrf.mxu0  ;;  %v1453_v47 = vpop.f32.mrf.mxu1 }
  0xf7   : > { %540 = vst.msk [vmem:[%s1319_s30 + $0x60] sm:$0xff] %vm527_vm1, %v1451_v46  ;;  %556 = vst.msk [vmem:[%s1319_s30 + $0xe0] sm:$0xff] %vm527_vm1, %v1453_v47  ;;  %563 = sbr.rel (%p1082_p4) target bundleno = 330 (0x14a), region = 32 }
  0xf8   : > { %v1461_v48 = vpop.f32.mrf.mxu0  ;;  %v1463_v49 = vpop.f32.mrf.mxu1 }
  0xf9   : > { %543 = vst.msk [vmem:[%s1319_s30 + $0x78] sm:$0xff] %vm527_vm1, %v1461_v48  ;;  %559 = vst.msk [vmem:[%s1319_s30 + $0xf8] sm:$0xff] %vm527_vm1, %v1463_v49 }
  0xfa   : > { %v1471_v50 = vpop.f32.mrf.mxu0  ;;  %v1473_v51 = vpop.f32.mrf.mxu1 }
  0xfb   : > { %541 = vst.msk [vmem:[%s1319_s30 + $0x68] sm:$0xff] %vm527_vm1, %v1471_v50  ;;  %557 = vst.msk [vmem:[%s1319_s30 + $0xe8] sm:$0xff] %vm527_vm1, %v1473_v51 }
  0xfc   : > { %v564_v52 = vsel %vm527_vm1, %v1331_v22, 0.0  ;;  %v565_v53 = vsel %vm527_vm1, %v1351_v26, 0.0  ;;  %v567_v54 = vsel %vm527_vm1, %v1321_v20, 0.0  ;;  %v569_v56 = vsel %vm527_vm1, %v1341_v24, 0.0 }
  0xfd   : > { %v566_v55 = vadd.f32 %v565_v53, %v564_v52  ;;  %v571_v58 = vsel %vm527_vm1, %v1371_v30, 0.0  ;;  %v573_v60 = vsel %vm527_vm1, %v1391_v34, 0.0  ;;  %v575_v62 = vsel %vm527_vm1, %v1361_v28, 0.0 }
  0xfe   : > { %v577_v0 = vsel %vm527_vm1, %v1381_v32, 0.0  ;;  %v1230_v1 = vmov 0.0   ;;  %v579_v3 = vsel %vm527_vm1, %v1411_v38, 0.0  ;;  %v581_v5 = vsel %vm527_vm1, %v1431_v42, 0.0 }
  0xff   : > { %v568_v57 = vadd.f32 %v567_v54, %v566_v55  ;;  %1083 = vst.msk [vmem:[%s1842_s3 + $0x8] sm:$0xff] %vm527_vm1, %v1230_v1  ;;  %1084 = vst.msk [vmem:[%s1842_s3 + $0x10] sm:$0xff] %vm527_vm1, %v1230_v1  ;;  %v583_v7 = vsel %vm527_vm1, %v1401_v36, 0.0  ;;  %v585_v9 = vsel %vm527_vm1, %v1421_v40, 0.0  ;;  %v587_v11 = vsel %vm527_vm1, %v1451_v46, 0.0 }
 0x100   : > { %v589_v13 = vsel %vm527_vm1, %v1471_v50, 0.0  ;;  %v591_v15 = vsel %vm527_vm1, %v1441_v44, 0.0  ;;  %v593_v17 = vsel %vm527_vm1, %v1461_v48, 0.0  ;;  %v595_v19 = vsel %vm527_vm1, %v1333_v23, 0.0 }
 0x101   : > { %v570_v59 = vadd.f32 %v569_v56, %v568_v57  ;;  %v597_v53 = vsel %vm527_vm1, %v1353_v27, 0.0  ;;  %v599_v55 = vsel %vm527_vm1, %v1323_v21, 0.0  ;;  %v601_v57 = vsel %vm527_vm1, %v1343_v25, 0.0 }
 0x102   : > { %v609_v1 = vsel %vm527_vm1, %v1383_v33, 0.0 }
 0x103   : > { %v572_v61 = vadd.f32 %v571_v58, %v570_v59  ;;  %v603_v59 = vsel %vm527_vm1, %v1373_v31, 0.0 }
 0x105   : > { %v574_v63 = vadd.f32 %v573_v60, %v572_v61  ;;  %v605_v61 = vsel %vm527_vm1, %v1393_v35, 0.0 }
 0x107   : > { %v576_v2 = vadd.f32 %v575_v62, %v574_v63  ;;  %v607_v63 = vsel %vm527_vm1, %v1363_v29, 0.0 }
 0x109   : > { %v578_v4 = vadd.f32 %v577_v0, %v576_v2 }
 0x10b   : > { %v580_v6 = vadd.f32 %v579_v3, %v578_v4  ;;  %v611_v3 = vsel %vm527_vm1, %v1413_v39, 0.0 }
 0x10d   : > { %v582_v8 = vadd.f32 %v581_v5, %v580_v6  ;;  %v613_v5 = vsel %vm527_vm1, %v1433_v43, 0.0 }
 0x10f   : > { %v584_v10 = vadd.f32 %v583_v7, %v582_v8  ;;  %v615_v7 = vsel %vm527_vm1, %v1403_v37, 0.0 }
 0x111   : > { %v586_v12 = vadd.f32 %v585_v9, %v584_v10  ;;  %v617_v9 = vsel %vm527_vm1, %v1423_v41, 0.0 }
 0x113   : > { %v588_v14 = vadd.f32 %v587_v11, %v586_v12  ;;  %v619_v11 = vsel %vm527_vm1, %v1453_v47, 0.0 }
 0x115   : > { %v590_v16 = vadd.f32 %v589_v13, %v588_v14  ;;  %v621_v13 = vsel %vm527_vm1, %v1473_v51, 0.0 }
 0x117   : > { %v592_v18 = vadd.f32 %v591_v15, %v590_v16  ;;  %v623_v15 = vsel %vm527_vm1, %v1443_v45, 0.0 }
 0x119   : > { %v594_v52 = vadd.f32 %v593_v17, %v592_v18  ;;  %v625_v17 = vsel %vm527_vm1, %v1463_v49, 0.0 }
 0x11b   : > { %v596_v54 = vadd.f32 %v595_v19, %v594_v52 }
 0x11d   : > { %v598_v56 = vadd.f32 %v597_v53, %v596_v54 }
 0x11f   : > { %v600_v58 = vadd.f32 %v599_v55, %v598_v56 }
 0x121   : > { %v602_v60 = vadd.f32 %v601_v57, %v600_v58 }
 0x123   : > { %v604_v62 = vadd.f32 %v603_v59, %v602_v60 }
 0x125   : > { %v606_v0 = vadd.f32 %v605_v61, %v604_v62 }
 0x127   : > { %v608_v2 = vadd.f32 %v607_v63, %v606_v0 }
 0x129   : > { %v610_v4 = vadd.f32 %v609_v1, %v608_v2 }
 0x12b   : > { %v612_v6 = vadd.f32 %v611_v3, %v610_v4 }
 0x12d   : > { %v614_v8 = vadd.f32 %v613_v5, %v612_v6 }
 0x12f   : > { %v616_v10 = vadd.f32 %v615_v7, %v614_v8 }
 0x131   : > { %v618_v12 = vadd.f32 %v617_v9, %v616_v10 }
 0x133   : > { %v620_v14 = vadd.f32 %v619_v11, %v618_v12 }
 0x135   : > { %v622_v16 = vadd.f32 %v621_v13, %v620_v14 }
 0x137   : > { %v624_v18 = vadd.f32 %v623_v15, %v622_v16 }
 0x139   : > { %v626_v19 = vadd.f32 %v625_v17, %v624_v18 }
 0x13b   : > { %v627_v52 = vrot.slane %v626_v19, 4 }
 0x13d   : > { %v628_v53 = vadd.f32 %v627_v52, %v626_v19 }
 0x13f   : > { %v629_v54 = vrot.slane %v628_v53, 2 }
 0x141   : > { %v630_v55 = vadd.f32 %v629_v54, %v628_v53 }
 0x143   : > { %v631_v56 = vrot.slane %v630_v55, 1 }
 0x145   : > { %v632_v57 = vadd.f32 %v631_v56, %v630_v55 }
 0x147   : > { %v633_v58 = vmul.f32 0.00390625, %v632_v57 }
 0x149   : > { %634 = vst.msk [vmem:[%s1842_s3] sm:$0xff] %vm527_vm1, %v633_v58 }
 0x14a PF: > { %v640_v59 = vlaneseq  ;;  %s1085_s10 = sshll.u32 %s1258_s13, 8  ;;  %v1231_v58 = vmov 0.0  }
 0x14b   : > { %v1566_v0 = vstv %s1085_s10 }
 0x14c   : > { %v1558_v60 = vshrl.u32 %v640_v59, 7 }
 0x14e   : > { %v642_v61 = vsub.s32 0, %v1558_v60  ;;  %v679_v63 = vadd.s32 8, %v1558_v60  ;;  %v680_v1 = vadd.s32 16, %v1558_v60  ;;  %v681_v3 = vadd.s32 24, %v1558_v60 }
 0x14f   : > { %v682_v4 = vadd.s32 32, %v1558_v60  ;;  %v711_v5 = vadd.s32 %v1566_v0, %v1558_v60  ;;  %v683_v7 = vadd.s32 40, %v1558_v60  ;;  %v684_v8 = vadd.s32 48, %v1558_v60 }
 0x150   : > { %v639_v62 = vld [vmem:[%s1842_s3] sm:$0xff]  ;;  %v712_v6 = vadd.s32 %v1566_v0, %v679_v63  ;;  %v685_v9 = vadd.s32 56, %v1558_v60  ;;  %v686_v10 = vadd.s32 64, %v1558_v60  ;;  %v687_v11 = vadd.s32 72, %v1558_v60 }
 0x151   : > { %v1569_v2 = vrot.slane %v639_v62, %v642_v61  ;;  %v688_v12 = vadd.s32 80, %v1558_v60  ;;  %v1583_v13 = vadd.s32 88, %v1558_v60  ;;  %v713_v14 = vadd.s32 %v1566_v0, %v680_v1 }
 0x152   : > { %v1589_v16 = vadd.s32 96, %v1558_v60  ;;  %v1592_v17 = vadd.s32 104, %v1558_v60  ;;  %v1595_v18 = vadd.s32 112, %v1558_v60  ;;  %v714_v52 = vadd.s32 %v1566_v0, %v681_v3 }
 0x153   : > { %v644_v15 = vsub.f32 %v1331_v22, %v1569_v2  ;;  %v645_v19 = vsub.f32 %v1351_v26, %v1569_v2  ;;  %vm743_vm2 = vcmp.lt.s32.totalorder %v711_v5, 450  ;;  %vm744_vm3 = vcmp.lt.s32.totalorder %v712_v6, 450 }
 0x154   : > { %v646_v53 = vsub.f32 %v1321_v20, %v1569_v2  ;;  %v647_v22 = vsub.f32 %v1341_v24, %v1569_v2  ;;  %v648_v54 = vsub.f32 %v1371_v30, %v1569_v2  ;;  %v649_v55 = vsub.f32 %v1391_v34, %v1569_v2 }
 0x155   : > { %v650_v56 = vsub.f32 %v1361_v28, %v1569_v2  ;;  %v651_v26 = vsub.f32 %v1381_v32, %v1569_v2  ;;  %v715_v57 = vadd.s32 %v1566_v0, %v682_v4  ;;  %vm745_vm4 = vcmp.lt.s32.totalorder %v713_v14, 450 }
 0x156   : > { %v652_v20 = vsub.f32 %v1411_v38, %v1569_v2  ;;  %v653_v24 = vsub.f32 %v1431_v42, %v1569_v2  ;;  %v1086_v30 = vsel %vm743_vm2, 1.0, %v1231_v58  ;;  %v1087_v34 = vsel %vm744_vm3, 1.0, %v1231_v58 }
 0x157   : > { %v654_v28 = vsub.f32 %v1401_v36, %v1569_v2  ;;  %v716_v61 = vadd.s32 %v1566_v0, %v683_v7  ;;  %vm746_vm5 = vcmp.lt.s32.totalorder %v714_v52, 450  ;;  %v1088_v3 = vsel %vm745_vm4, 1.0, %v1231_v58 }
 0x158   : > { %v717_v4 = vadd.s32 %v1566_v0, %v684_v8  ;;  %vm747_vm6 = vcmp.lt.s32.totalorder %v715_v57, 450  ;;  %v839_v5 = vmul.f32 %v1086_v30, %v644_v15  ;;  %v840_v6 = vmul.f32 %v1087_v34, %v645_v19 }
 0x159   : > { %v1089_v63 = vsel %vm746_vm5, 1.0, %v1231_v58  ;;  %v718_v62 = vadd.s32 %v1566_v0, %v685_v9  ;;  %vm748_vm7 = vcmp.lt.s32.totalorder %v716_v61, 450  ;;  %v841_v8 = vmul.f32 %v1088_v3, %v646_v53 }
 0x15a   : > { %v719_v57 = vadd.s32 %v1566_v0, %v686_v10  ;;  %v1090_v30 = vsel %vm747_vm6, 1.0, %v1231_v58  ;;  %vm749_vm8 = vcmp.lt.s32.totalorder %v717_v4, 450  ;;  %v842_v34 = vmul.f32 %v1089_v63, %v647_v22 }
 0x15b   : > { %v871_v52 = vmul.f32 %v839_v5, %v839_v5  ;;  %v872_v14 = vmul.f32 %v840_v6, %v840_v6  ;;  %v720_v53 = vadd.s32 %v1566_v0, %v687_v11  ;;  %v1091_v61 = vsel %vm748_vm7, 1.0, %v1231_v58 }
 0x15c   : > { %vm750_vm9 = vcmp.lt.s32.totalorder %v718_v62, 450  ;;  %v843_v10 = vmul.f32 %v1090_v30, %v648_v54  ;;  %v873_v19 = vmul.f32 %v841_v8, %v841_v8  ;;  %v721_v63 = vadd.s32 %v1566_v0, %v688_v12 }
 0x15d   : > { %vm751_vm10 = vcmp.lt.s32.totalorder %v719_v57, 450  ;;  %v1092_v4 = vsel %vm749_vm8, 1.0, %v1231_v58  ;;  %v844_v1 = vmul.f32 %v1091_v61, %v649_v55  ;;  %v874_v9 = vmul.f32 %v842_v34, %v842_v34 }
 0x15e   : > { %v905_v15 = vadd.f32 %v840_v6, %v839_v5  ;;  %v906_v11 = vadd.f32 %v872_v14, %v871_v52  ;;  %v669_v7 = vsub.f32 %v1433_v43, %v1569_v2  ;;  %v722_v62 = vadd.s32 %v1566_v0, %v1583_v13 }
 0x15f   : > { %vm752_vm11 = vcmp.lt.s32.totalorder %v720_v53, 450  ;;  %v1093_v54 = vsel %vm750_vm9, 1.0, %v1231_v58  ;;  %v845_v30 = vmul.f32 %v1092_v4, %v650_v56  ;;  %v875_v22 = vmul.f32 %v843_v10, %v843_v10 }
 0x160   : > { %v907_v3 = vadd.f32 %v905_v15, %v841_v8  ;;  %v908_v12 = vadd.f32 %v906_v11, %v873_v19  ;;  %v670_v59 = vsub.f32 %v1403_v37, %v1569_v2  ;;  %v723_v55 = vadd.s32 %v1566_v0, %v1589_v16 }
 0x161   : > { %vm753_vm12 = vcmp.lt.s32.totalorder %v721_v63, 450  ;;  %v1094_v5 = vsel %vm751_vm10, 1.0, %v1231_v58  ;;  %v846_v13 = vmul.f32 %v1093_v54, %v651_v26  ;;  %v876_v6 = vmul.f32 %v844_v1, %v844_v1 }
 0x162   : > { %v909_v14 = vadd.f32 %v907_v3, %v842_v34  ;;  %v910_v56 = vadd.f32 %v908_v12, %v874_v9  ;;  %v693_v52 = vadd.s32 120, %v1558_v60  ;;  %v724_v8 = vadd.s32 %v1566_v0, %v1592_v17 }
 0x163   : > { %vm754_vm13 = vcmp.lt.s32.totalorder %v722_v62, 450  ;;  %v1095_v16 = vsel %vm752_vm11, 1.0, %v1231_v58  ;;  %v847_v15 = vmul.f32 %v1094_v5, %v652_v20  ;;  %v877_v19 = vmul.f32 %v845_v30, %v845_v30 }
 0x164   : > { %v911_v57 = vadd.f32 %v909_v14, %v843_v10  ;;  %v912_v32 = vadd.f32 %v910_v56, %v875_v22  ;;  %v694_v26 = vadd.s32 128, %v1558_v60  ;;  %v725_v34 = vadd.s32 %v1566_v0, %v1595_v18 }
 0x165   : > { %vm755_vm14 = vcmp.lt.s32.totalorder %v723_v55, 450  ;;  %v1096_v17 = vsel %vm753_vm12, 1.0, %v1231_v58  ;;  %v848_v9 = vmul.f32 %v1095_v16, %v653_v24  ;;  %v878_v53 = vmul.f32 %v846_v13, %v846_v13 }
 0x166   : > { %v913_v61 = vadd.f32 %v911_v57, %v844_v1  ;;  %v914_v38 = vadd.f32 %v912_v32, %v876_v6  ;;  %v695_v20 = vadd.s32 136, %v1558_v60  ;;  %v726_v3 = vadd.s32 %v1566_v0, %v693_v52 }
 0x167   : > { %vm756_vm15 = vcmp.lt.s32.totalorder %v724_v8, 450  ;;  %v1097_v10 = vsel %vm754_vm13, 1.0, %v1231_v58  ;;  %v849_v18 = vmul.f32 %v1096_v17, %v654_v28  ;;  %v879_v22 = vmul.f32 %v847_v15, %v847_v15 }
 0x168   : > { %v915_v63 = vadd.f32 %v913_v61, %v845_v30  ;;  %v916_v4 = vadd.f32 %v914_v38, %v877_v19  ;;  %v696_v42 = vadd.s32 144, %v1558_v60  ;;  %v727_v24 = vadd.s32 %v1566_v0, %v694_v26 }
 0x169   : > { %vm757_vm0 = vcmp.lt.s32.totalorder %v725_v34, 450  ;;  %v1098_v1 = vsel %vm755_vm14, 1.0, %v1231_v58  ;;  %v1843_v11 = vsub.f32 %v1421_v40, %v1569_v2  ;;  %v880_v54 = vmul.f32 %v848_v9, %v848_v9 }
 0x16a   : > { %v917_v12 = vadd.f32 %v915_v63, %v846_v13  ;;  %v918_v5 = vadd.f32 %v916_v4, %v878_v53  ;;  %v697_v36 = vadd.s32 152, %v1558_v60  ;;  %v728_v28 = vadd.s32 %v1566_v0, %v695_v20 }
 0x16b   : > { %v850_v62 = vmul.f32 %v1097_v10, %v1843_v11  ;;  %vm758_vm2 = vcmp.lt.s32.totalorder %v726_v3, 450  ;;  %v1099_v30 = vsel %vm756_vm15, 1.0, %v1231_v58  ;;  %v1844_v6 = vsub.f32 %v1451_v46, %v1569_v2 }
 0x16c   : > { %v881_v14 = vmul.f32 %v849_v18, %v849_v18  ;;  %v919_v56 = vadd.f32 %v917_v12, %v847_v15  ;;  %v920_v52 = vadd.f32 %v918_v5, %v879_v22  ;;  %v698_v40 = vadd.s32 160, %v1558_v60 }
 0x16d   : > { %v851_v55 = vmul.f32 %v1098_v1, %v1844_v6  ;;  %v729_v13 = vadd.s32 %v1566_v0, %v696_v42  ;;  %vm759_vm3 = vcmp.lt.s32.totalorder %v727_v24, 450  ;;  %v1100_v16 = vsel %vm757_vm0, 1.0, %v1231_v58 }
 0x16e   : > { %v1845_v19 = vsub.f32 %v1471_v50, %v1569_v2  ;;  %v882_v57 = vmul.f32 %v850_v62, %v850_v62  ;;  %v921_v32 = vadd.f32 %v919_v56, %v848_v9  ;;  %v922_v26 = vadd.f32 %v920_v52, %v880_v54 }
 0x16f   : > { %v699_v46 = vadd.s32 168, %v1558_v60  ;;  %v730_v15 = vadd.s32 %v1566_v0, %v697_v36  ;;  %vm760_vm4 = vcmp.lt.s32.totalorder %v728_v28, 450  ;;  %v1101_v17 = vsel %vm758_vm2, 1.0, %v1231_v58 }
 0x170   : > { %v852_v8 = vmul.f32 %v1099_v30, %v1845_v19  ;;  %v1846_v53 = vsub.f32 %v1441_v44, %v1569_v2  ;;  %v883_v61 = vmul.f32 %v851_v55, %v851_v55  ;;  %v923_v38 = vadd.f32 %v921_v32, %v849_v18 }
 0x171   : > { %v924_v20 = vadd.f32 %v922_v26, %v881_v14  ;;  %v700_v50 = vadd.s32 176, %v1558_v60  ;;  %v731_v9 = vadd.s32 %v1566_v0, %v698_v40  ;;  %vm761_vm5 = vcmp.lt.s32.totalorder %v729_v13, 450 }
 0x172   : > { %v853_v34 = vmul.f32 %v1100_v16, %v1846_v53  ;;  %v1102_v10 = vsel %vm759_vm3, 1.0, %v1231_v58  ;;  %v1847_v22 = vsub.f32 %v1461_v48, %v1569_v2  ;;  %v884_v63 = vmul.f32 %v852_v8, %v852_v8 }
 0x173   : > { %v925_v4 = vadd.f32 %v923_v38, %v850_v62  ;;  %v926_v42 = vadd.f32 %v924_v20, %v882_v57  ;;  %v701_v44 = vadd.s32 184, %v1558_v60  ;;  %v732_v18 = vadd.s32 %v1566_v0, %v699_v46 }
 0x174   : > { %v854_v3 = vmul.f32 %v1101_v17, %v1847_v22  ;;  %vm762_vm6 = vcmp.lt.s32.totalorder %v730_v15, 450  ;;  %v1103_v1 = vsel %vm760_vm4, 1.0, %v1231_v58  ;;  %v1848_v11 = vsub.f32 %v1333_v23, %v1569_v2 }
 0x175   : > { %v885_v54 = vmul.f32 %v853_v34, %v853_v34  ;;  %v927_v12 = vadd.f32 %v925_v4, %v851_v55  ;;  %v928_v5 = vadd.f32 %v926_v42, %v883_v61  ;;  %v702_v48 = vadd.s32 192, %v1558_v60 }
 0x176   : > { %v855_v24 = vmul.f32 %v1102_v10, %v1848_v11  ;;  %v733_v62 = vadd.s32 %v1566_v0, %v700_v50  ;;  %vm763_vm7 = vcmp.lt.s32.totalorder %v731_v9, 450  ;;  %v1104_v36 = vsel %vm761_vm5, 1.0, %v1231_v58 }
 0x177   : > { %v1849_v30 = vsub.f32 %v1353_v27, %v1569_v2  ;;  %v886_v6 = vmul.f32 %v854_v3, %v854_v3  ;;  %v929_v14 = vadd.f32 %v927_v12, %v852_v8  ;;  %v930_v56 = vadd.f32 %v928_v5, %v884_v63 }
 0x178   : > { %v703_v23 = vadd.s32 200, %v1558_v60  ;;  %v734_v55 = vadd.s32 %v1566_v0, %v701_v44  ;;  %vm764_vm8 = vcmp.lt.s32.totalorder %v732_v18, 450  ;;  %v1105_v52 = vsel %vm762_vm6, 1.0, %v1231_v58 }
 0x179   : > { %v856_v28 = vmul.f32 %v1103_v1, %v1849_v30  ;;  %v1850_v40 = vsub.f32 %v1323_v21, %v1569_v2  ;;  %v887_v16 = vmul.f32 %v855_v24, %v855_v24  ;;  %v931_v19 = vadd.f32 %v929_v14, %v853_v34 }
 0x17a   : > { %v932_v57 = vadd.f32 %v930_v56, %v885_v54  ;;  %v704_v27 = vadd.s32 208, %v1558_v60  ;;  %v735_v8 = vadd.s32 %v1566_v0, %v702_v48  ;;  %vm765_vm9 = vcmp.lt.s32.totalorder %v733_v62, 450 }
 0x17b   : > { %v857_v13 = vmul.f32 %v1104_v36, %v1850_v40  ;;  %v1106_v32 = vsel %vm763_vm7, 1.0, %v1231_v58  ;;  %v1851_v26 = vsub.f32 %v1343_v25, %v1569_v2  ;;  %v888_v15 = vmul.f32 %v856_v28, %v856_v28 }
 0x17c   : > { %v933_v17 = vadd.f32 %v931_v19, %v854_v3  ;;  %v934_v53 = vadd.f32 %v932_v57, %v886_v6  ;;  %v705_v21 = vadd.s32 216, %v1558_v60  ;;  %v736_v34 = vadd.s32 %v1566_v0, %v703_v23 }
 0x17d   : > { %v858_v46 = vmul.f32 %v1105_v52, %v1851_v26  ;;  %vm766_vm10 = vcmp.lt.s32.totalorder %v734_v55, 450  ;;  %v1107_v61 = vsel %vm764_vm8, 1.0, %v1231_v58  ;;  %v1852_v38 = vsub.f32 %v1373_v31, %v1569_v2 }
 0x17e   : > { %v889_v50 = vmul.f32 %v857_v13, %v857_v13  ;;  %v935_v9 = vadd.f32 %v933_v17, %v855_v24  ;;  %v936_v10 = vadd.f32 %v934_v53, %v887_v16  ;;  %v706_v25 = vadd.s32 224, %v1558_v60 }
 0x17f   : > { %v859_v20 = vmul.f32 %v1106_v32, %v1852_v38  ;;  %v737_v22 = vadd.s32 %v1566_v0, %v704_v27  ;;  %vm767_vm11 = vcmp.lt.s32.totalorder %v735_v8, 450  ;;  %v1108_v3 = vsel %vm765_vm9, 1.0, %v1231_v58 }
 0x180   : > { %v1853_v63 = vsub.f32 %v1393_v35, %v1569_v2  ;;  %v890_v42 = vmul.f32 %v858_v46, %v858_v46  ;;  %v937_v44 = vadd.f32 %v935_v9, %v856_v28  ;;  %v938_v18 = vadd.f32 %v936_v10, %v888_v15 }
 0x181   : > { %v707_v31 = vadd.s32 232, %v1558_v60  ;;  %v738_v1 = vadd.s32 %v1566_v0, %v705_v21  ;;  %vm768_vm12 = vcmp.lt.s32.totalorder %v736_v34, 450  ;;  %v1109_v11 = vsel %vm766_vm10, 1.0, %v1231_v58 }
 0x182   : > { %v860_v4 = vmul.f32 %v1107_v61, %v1853_v63  ;;  %v1854_v24 = vsub.f32 %v1363_v29, %v1569_v2  ;;  %v891_v12 = vmul.f32 %v859_v20, %v859_v20  ;;  %v939_v5 = vadd.f32 %v937_v44, %v857_v13 }
 0x183   : > { %v940_v48 = vadd.f32 %v938_v18, %v889_v50  ;;  %v708_v35 = vadd.s32 240, %v1558_v60  ;;  %v739_v62 = vadd.s32 %v1566_v0, %v706_v25  ;;  %vm769_vm13 = vcmp.lt.s32.totalorder %v737_v22, 450 }
 0x184   : > { %v861_v54 = vmul.f32 %v1108_v3, %v1854_v24  ;;  %v1110_v36 = vsel %vm767_vm11, 1.0, %v1231_v58  ;;  %v1855_v30 = vsub.f32 %v1383_v33, %v1569_v2  ;;  %v892_v6 = vmul.f32 %v860_v4, %v860_v4 }
 0x185   : > { %v941_v14 = vadd.f32 %v939_v5, %v858_v46  ;;  %v942_v56 = vadd.f32 %v940_v48, %v890_v42  ;;  %v709_v29 = vadd.s32 248, %v1558_v60  ;;  %v740_v23 = vadd.s32 %v1566_v0, %v707_v31 }
 0x186   : > { %v862_v28 = vmul.f32 %v1109_v11, %v1855_v30  ;;  %vm770_vm14 = vcmp.lt.s32.totalorder %v738_v1, 450  ;;  %v1111_v55 = vsel %vm768_vm12, 1.0, %v1231_v58  ;;  %v1856_v52 = vsub.f32 %v1413_v39, %v1569_v2 }
 0x187   : > { %v893_v13 = vmul.f32 %v861_v54, %v861_v54  ;;  %v943_v16 = vadd.f32 %v941_v14, %v859_v20  ;;  %v944_v19 = vadd.f32 %v942_v56, %v891_v12  ;;  %v671_v33 = vsub.f32 %v1423_v41, %v1569_v2 }
 0x188   : > { %v863_v40 = vmul.f32 %v1110_v36, %v1856_v52  ;;  %v741_v57 = vadd.s32 %v1566_v0, %v708_v35  ;;  %vm771_vm15 = vcmp.lt.s32.totalorder %v739_v62, 450  ;;  %v1112_v60 = vsel %vm769_vm13, 1.0, %v1231_v58  ;;  %v1120_v36 = vld [vmem:[%s1842_s3 + $0x10] sm:$0xff] }
 0x189   : > { %v864_v27 = vmul.f32 %v1111_v55, %v669_v7  ;;  %v894_v8 = vmul.f32 %v862_v28, %v862_v28  ;;  %v945_v32 = vadd.f32 %v943_v16, %v860_v4  ;;  %v946_v39 = vadd.f32 %v944_v19, %v892_v6 }
 0x18a   : > { %v672_v26 = vsub.f32 %v1453_v47, %v1569_v2  ;;  %v742_v46 = vadd.s32 %v1566_v0, %v709_v29  ;;  %vm772_vm0 = vcmp.lt.s32.totalorder %v740_v23, 450  ;;  %v1113_v41 = vsel %vm770_vm14, 1.0, %v1231_v58 }
 0x18b   : > { %v865_v15 = vmul.f32 %v1112_v60, %v670_v59  ;;  %v895_v17 = vmul.f32 %v863_v40, %v863_v40  ;;  %v947_v53 = vadd.f32 %v945_v32, %v861_v54  ;;  %v948_v43 = vadd.f32 %v946_v39, %v893_v13 }
 0x18c   : > { %v673_v7 = vsub.f32 %v1473_v51, %v1569_v2  ;;  %vm773_vm2 = vcmp.lt.s32.totalorder %v741_v57, 450  ;;  %v1114_v47 = vsel %vm771_vm15, 1.0, %v1231_v58  ;;  %v866_v21 = vmul.f32 %v1113_v41, %v671_v33 }
 0x18d   : > { %v896_v0 = vmul.f32 %v864_v27, %v864_v27  ;;  %v949_v34 = vadd.f32 %v947_v53, %v862_v28  ;;  %v950_v61 = vadd.f32 %v948_v43, %v894_v8  ;;  %v674_v38 = vsub.f32 %v1443_v45, %v1569_v2 }
 0x18e   : > { %vm774_vm3 = vcmp.lt.s32.totalorder %v742_v46, 450  ;;  %v1115_v37 = vsel %vm772_vm0, 1.0, %v1231_v58  ;;  %v867_v59 = vmul.f32 %v1114_v47, %v672_v26  ;;  %v897_v20 = vmul.f32 %v865_v15, %v865_v15 }
 0x18f   : > { %v951_v50 = vadd.f32 %v949_v34, %v863_v40  ;;  %v952_v9 = vadd.f32 %v950_v61, %v895_v17  ;;  %v675_v51 = vsub.f32 %v1463_v49, %v1569_v2  ;;  %v1116_v10 = vsel %vm773_vm2, 1.0, %v1231_v58 }
 0x190   : > { %v868_v25 = vmul.f32 %v1115_v37, %v673_v7  ;;  %v898_v22 = vmul.f32 %v866_v21, %v866_v21  ;;  %v1117_v4 = vsel %vm774_vm3, 1.0, %v1231_v58  ;;  %v869_v42 = vmul.f32 %v1116_v10, %v674_v38  ;;  %v1118_v58 = vld [vmem:[%s1842_s3 + $0x8] sm:$0xff] }
 0x191   : > { %v953_v3 = vadd.f32 %v951_v50, %v864_v27  ;;  %v954_v63 = vadd.f32 %v952_v9, %v896_v0  ;;  %v899_v45 = vmul.f32 %v867_v59, %v867_v59  ;;  %v870_v31 = vmul.f32 %v1117_v4, %v675_v51 }
 0x192   : > { %v900_v1 = vmul.f32 %v868_v25, %v868_v25  ;;  %v901_v54 = vmul.f32 %v869_v42, %v869_v42 }
 0x193   : > { %v955_v44 = vadd.f32 %v953_v3, %v865_v15  ;;  %v956_v18 = vadd.f32 %v954_v63, %v897_v20  ;;  %v902_v49 = vmul.f32 %v870_v31, %v870_v31 }
 0x195   : > { %v957_v11 = vadd.f32 %v955_v44, %v866_v21  ;;  %v958_v24 = vadd.f32 %v956_v18, %v898_v22 }
 0x197   : > { %v959_v12 = vadd.f32 %v957_v11, %v867_v59  ;;  %v960_v5 = vadd.f32 %v958_v24, %v899_v45 }
 0x199   : > { %v961_v2 = vadd.f32 %v959_v12, %v868_v25  ;;  %v962_v48 = vadd.f32 %v960_v5, %v900_v1 }
 0x19b   : > { %v963_v35 = vadd.f32 %v961_v2, %v869_v42  ;;  %v964_v62 = vadd.f32 %v962_v48, %v901_v54 }
 0x19d   : > { %v965_v30 = vadd.f32 %v963_v35, %v870_v31  ;;  %v966_v28 = vadd.f32 %v964_v62, %v902_v49 }
 0x19f   : > { %v969_v6 = vadd.f32 %v1118_v58, %v965_v30  ;;  %v973_v14 = vadd.f32 %v1120_v36, %v966_v28 }
 0x1a1   : > { %1119 = vst.msk [vmem:[%s1842_s3 + $0x8] sm:$0xff] %vm527_vm1, %v969_v6  ;;  %1121 = vst.msk [vmem:[%s1842_s3 + $0x10] sm:$0xff] %vm527_vm1, %v973_v14 }
 0x1a2 PF: > { %s14_s12 = sadd.s32 1, %s1228_s12  }
 0x1a3   : > { %p11_p5 = scmp.ge.s32.totalorder %s14_s12, 4  }
 0x1a5   :  { %13 = sbr.rel (!%p11_p5) target bundleno = 1 (0x1), region = 74 }

// kernel: bottleneck_forward.14
= control target key start
LH: loop header
LB: loop body
LE: loop exit
PB: predicated region body
PF: predicated region fallthrough
CT: control target
= control target key end

     0   :  { %s1204_s12 = smov 0   ;;  %s1782_s0 = inlined_call_operand.vmem [shape: bf16[512,4], index: 0, kind: input, shape index: {}]   ;;  %s1783_s1 = inlined_call_operand.vmem [shape: bf16[4,16], index: 1, kind: input, shape index: {}]   ;;  %s1784_s2 = inlined_call_operand.vmem [shape: f32[512,16], index: 2, kind: output, shape index: {0}]   ;;  %s1785_s3 = inlined_call_operand.vmem [shape: f32[3,8,16], index: 3, kind: output, shape index: {1}]  }
   0x1 LB: > { %s1210_s13 = sadd.s32 4294967295, %s1180_s12   ;;  %p1014_p0 = scmp.ge.s32.totalorder %s1180_s12, 1  ;;  %s1180_s12 = sphi %s1204_s12, %s14_s12  }
   0x2   : > { %p136_p1 = scmp.lt.s32.totalorder %s1180_s12, 3 }
   0x4   : > { %p137_p2 = pnand %p1014_p0, %p136_p1 }
   0x5   : > { %s1015_s16 = sshll.u32 (!%p137_p2), %s1210_s13, 5  ;;  %p1051_p4 = scmp.ne.s32.totalorder (!%p137_p2), %s1210_s13, 0 }
   0x6   : > { %140 = sbr.rel (%p137_p2) target bundleno = 407 (0x197), region = 28  ;;  %p161_p3 = scmp.lt.s32.totalorder (!%p137_p2), %s1015_s16, 63 }
   0xb   : > { %v205_v0 = vld [vmem:[%s1783_s1] sm:$0x3]  ;;  %vm335_vm0 = vcmask 1041408   ;;  %s1801_s16 = smov (!%p161_p3, %s1015_s16), 63  ;;  %vm286_vm1 = vcmask 31744   ;;  %vm500_vm2 = vcmask 130048  }
   0xc   : > { %1146 = vmatprep.subr.msk.bf16.mxu0 %vm335_vm0, %v205_v0  ;;  %1147 = vmatprep.subr.msk.bf16.mxu1 %vm335_vm0, %v205_v0  ;;  %v337_v1 = vsel %vm335_vm0, %v205_v0, 0  ;;  %s1016_s17 = sshll.u32 %s1801_s16, 2  ;;  %s1018_s21 = sshll.u32 %s1801_s16, 3 }
   0xd   : > { %1111 = vmatpush3.bf16.msra.mxu0 %v337_v1  ;;  %1145 = vmatpush3.bf16.msra.mxu1 %v337_v1  ;;  %s1224_s20 = scalar_lea.vmem %s1782_s0, %s1016_s17  ;;  %s1262_s24 = scalar_lea.vmem %s1784_s2, %s1018_s21 }
   0xe   : > { %v1158_v2 = vld [vmem:[%s1224_s20] sm:$0xff]   ;;  %v1160_v4 = vld [vmem:[%s1224_s20 + $0x8] sm:$0xff]   ;;  %v1162_v6 = vld [vmem:[%s1224_s20 + $0x10] sm:$0xff]  }
   0xf   : > { %v1159_v3 = vld [vmem:[%s1224_s20 + $0x40] sm:$0xff]   ;;  %1112 = vmatprep.mubr.msk.bf16.mxu0 %vm286_vm1, %v1158_v2  ;;  %v1161_v5 = vld [vmem:[%s1224_s20 + $0x48] sm:$0xff]   ;;  %v1163_v7 = vld [vmem:[%s1224_s20 + $0x50] sm:$0xff]  }
  0x10   : > { %1128 = vmatprep.mubr.msk.bf16.mxu1 %vm286_vm1, %v1159_v3  ;;  %1113 = vmatmul.mubr.msk.bf16.vlgmr.msra.gmra.mxu0 %vm286_vm1, %v1160_v4  ;;  %v1164_v8 = vld [vmem:[%s1224_s20 + $0x18] sm:$0xff]   ;;  %v1166_v10 = vld [vmem:[%s1224_s20 + $0x20] sm:$0xff]   ;;  %v1168_v12 = vld [vmem:[%s1224_s20 + $0x28] sm:$0xff]  }
  0x11   : > { %1129 = vmatmul.mubr.msk.bf16.vlgmr.msra.gmra.mxu1 %vm286_vm1, %v1161_v5  ;;  %1116 = vmatprep.mubr.msk.bf16.mxu0 %vm286_vm1, %v1162_v6  ;;  %v1165_v9 = vld [vmem:[%s1224_s20 + $0x58] sm:$0xff]   ;;  %v1167_v11 = vld [vmem:[%s1224_s20 + $0x60] sm:$0xff]   ;;  %v1169_v13 = vld [vmem:[%s1224_s20 + $0x68] sm:$0xff]  }
  0x12   : > { %1132 = vmatprep.mubr.msk.bf16.mxu1 %vm286_vm1, %v1163_v7  ;;  %v1170_v14 = vld [vmem:[%s1224_s20 + $0x30] sm:$0xff]   ;;  %v1172_v16 = vld [vmem:[%s1224_s20 + $0x38] sm:$0xff]  }
  0x13   : > { %v1171_v15 = vld [vmem:[%s1224_s20 + $0x70] sm:$0xff]   ;;  %v1173_v17 = vld [vmem:[%s1224_s20 + $0x78] sm:$0xff]  }
  0x18   : > { %1117 = vmatmul.mubr.msk.bf16.gmra.mxu0 %vm286_vm1, %v1164_v8 }
  0x19   : > { %1133 = vmatmul.mubr.msk.bf16.gmra.mxu1 %vm286_vm1, %v1165_v9  ;;  %1120 = vmatprep.mubr.msk.bf16.mxu0 %vm286_vm1, %v1166_v10 }
  0x1a   : > { %1136 = vmatprep.mubr.msk.bf16.mxu1 %vm286_vm1, %v1167_v11 }
  0x20   : > { %1121 = vmatmul.mubr.msk.bf16.gmra.mxu0 %vm286_vm1, %v1168_v12 }
  0x21   : > { %1137 = vmatmul.mubr.msk.bf16.gmra.mxu1 %vm286_vm1, %v1169_v13  ;;  %1124 = vmatprep.mubr.msk.bf16.mxu0 %vm286_vm1, %v1170_v14 }
  0x22   : > { %1140 = vmatprep.mubr.msk.bf16.mxu1 %vm286_vm1, %v1171_v15 }
  0x28   : > { %1125 = vmatmul.mubr.msk.bf16.gmra.mxu0 %vm286_vm1, %v1172_v16 }
  0x29   : > { %1141 = vmatmul.mubr.msk.bf16.gmra.mxu1 %vm286_vm1, %v1173_v17 }
  0xd0   : > { %v1264_v18 = vpop.f32.mrf.mxu0 }
  0xd1   : > { %503 = vst.msk [vmem:[%s1262_s24 + $0x10] sm:$0xff] %vm500_vm2, %v1264_v18  ;;  %v1269_v19 = vpop.f32.mrf.mxu1 }
  0xd2   : > { %519 = vst.msk [vmem:[%s1262_s24 + $0x90] sm:$0xff] %vm500_vm2, %v1269_v19  ;;  %v1274_v20 = vpop.f32.mrf.mxu0 }
  0xd3   : > { %501 = vst.msk [vmem:[%s1262_s24] sm:$0xff] %vm500_vm2, %v1274_v20  ;;  %v1279_v21 = vpop.f32.mrf.mxu1 }
  0xd4   : > { %517 = vst.msk [vmem:[%s1262_s24 + $0x80] sm:$0xff] %vm500_vm2, %v1279_v21  ;;  %v1284_v22 = vpop.f32.mrf.mxu0 }
  0xd5   : > { %504 = vst.msk [vmem:[%s1262_s24 + $0x18] sm:$0xff] %vm500_vm2, %v1284_v22  ;;  %v1289_v23 = vpop.f32.mrf.mxu1 }
  0xd6   : > { %520 = vst.msk [vmem:[%s1262_s24 + $0x98] sm:$0xff] %vm500_vm2, %v1289_v23  ;;  %v1294_v24 = vpop.f32.mrf.mxu0 }
  0xd7   : > { %502 = vst.msk [vmem:[%s1262_s24 + $0x8] sm:$0xff] %vm500_vm2, %v1294_v24  ;;  %v1299_v25 = vpop.f32.mrf.mxu1 }
  0xd8   : > { %518 = vst.msk [vmem:[%s1262_s24 + $0x88] sm:$0xff] %vm500_vm2, %v1299_v25  ;;  %v1304_v26 = vpop.f32.mrf.mxu0 }
  0xd9   : > { %507 = vst.msk [vmem:[%s1262_s24 + $0x30] sm:$0xff] %vm500_vm2, %v1304_v26  ;;  %v1309_v27 = vpop.f32.mrf.mxu1 }
  0xda   : > { %523 = vst.msk [vmem:[%s1262_s24 + $0xb0] sm:$0xff] %vm500_vm2, %v1309_v27  ;;  %v1314_v28 = vpop.f32.mrf.mxu0 }
  0xdb   : > { %505 = vst.msk [vmem:[%s1262_s24 + $0x20] sm:$0xff] %vm500_vm2, %v1314_v28  ;;  %v1319_v29 = vpop.f32.mrf.mxu1 }
  0xdc   : > { %521 = vst.msk [vmem:[%s1262_s24 + $0xa0] sm:$0xff] %vm500_vm2, %v1319_v29  ;;  %v1324_v30 = vpop.f32.mrf.mxu0 }
  0xdd   : > { %508 = vst.msk [vmem:[%s1262_s24 + $0x38] sm:$0xff] %vm500_vm2, %v1324_v30  ;;  %v1329_v31 = vpop.f32.mrf.mxu1 }
  0xde   : > { %524 = vst.msk [vmem:[%s1262_s24 + $0xb8] sm:$0xff] %vm500_vm2, %v1329_v31  ;;  %v1334_v32 = vpop.f32.mrf.mxu0 }
  0xdf   : > { %506 = vst.msk [vmem:[%s1262_s24 + $0x28] sm:$0xff] %vm500_vm2, %v1334_v32  ;;  %v1339_v33 = vpop.f32.mrf.mxu1 }
  0xe0   : > { %522 = vst.msk [vmem:[%s1262_s24 + $0xa8] sm:$0xff] %vm500_vm2, %v1339_v33  ;;  %v1344_v34 = vpop.f32.mrf.mxu0 }
  0xe1   : > { %511 = vst.msk [vmem:[%s1262_s24 + $0x50] sm:$0xff] %vm500_vm2, %v1344_v34  ;;  %v1349_v35 = vpop.f32.mrf.mxu1 }
  0xe2   : > { %527 = vst.msk [vmem:[%s1262_s24 + $0xd0] sm:$0xff] %vm500_vm2, %v1349_v35  ;;  %v1354_v36 = vpop.f32.mrf.mxu0 }
  0xe3   : > { %509 = vst.msk [vmem:[%s1262_s24 + $0x40] sm:$0xff] %vm500_vm2, %v1354_v36  ;;  %v1359_v37 = vpop.f32.mrf.mxu1 }
  0xe4   : > { %525 = vst.msk [vmem:[%s1262_s24 + $0xc0] sm:$0xff] %vm500_vm2, %v1359_v37  ;;  %v1364_v38 = vpop.f32.mrf.mxu0 }
  0xe5   : > { %512 = vst.msk [vmem:[%s1262_s24 + $0x58] sm:$0xff] %vm500_vm2, %v1364_v38  ;;  %v1369_v39 = vpop.f32.mrf.mxu1 }
  0xe6   : > { %528 = vst.msk [vmem:[%s1262_s24 + $0xd8] sm:$0xff] %vm500_vm2, %v1369_v39  ;;  %v1374_v40 = vpop.f32.mrf.mxu0 }
  0xe7   : > { %510 = vst.msk [vmem:[%s1262_s24 + $0x48] sm:$0xff] %vm500_vm2, %v1374_v40  ;;  %v1379_v41 = vpop.f32.mrf.mxu1 }
  0xe8   : > { %526 = vst.msk [vmem:[%s1262_s24 + $0xc8] sm:$0xff] %vm500_vm2, %v1379_v41  ;;  %v1384_v42 = vpop.f32.mrf.mxu0 }
  0xe9   : > { %515 = vst.msk [vmem:[%s1262_s24 + $0x70] sm:$0xff] %vm500_vm2, %v1384_v42  ;;  %v1389_v43 = vpop.f32.mrf.mxu1 }
  0xea   : > { %531 = vst.msk [vmem:[%s1262_s24 + $0xf0] sm:$0xff] %vm500_vm2, %v1389_v43  ;;  %v1394_v44 = vpop.f32.mrf.mxu0 }
  0xeb   : > { %513 = vst.msk [vmem:[%s1262_s24 + $0x60] sm:$0xff] %vm500_vm2, %v1394_v44  ;;  %v1399_v45 = vpop.f32.mrf.mxu1 }
  0xec   : > { %529 = vst.msk [vmem:[%s1262_s24 + $0xe0] sm:$0xff] %vm500_vm2, %v1399_v45  ;;  %v1404_v46 = vpop.f32.mrf.mxu0  ;;  %536 = sbr.rel (%p1051_p4) target bundleno = 319 (0x13f), region = 32 }
  0xed   : > { %516 = vst.msk [vmem:[%s1262_s24 + $0x78] sm:$0xff] %vm500_vm2, %v1404_v46  ;;  %v1409_v47 = vpop.f32.mrf.mxu1 }
  0xee   : > { %532 = vst.msk [vmem:[%s1262_s24 + $0xf8] sm:$0xff] %vm500_vm2, %v1409_v47  ;;  %v1414_v48 = vpop.f32.mrf.mxu0 }
  0xef   : > { %514 = vst.msk [vmem:[%s1262_s24 + $0x68] sm:$0xff] %vm500_vm2, %v1414_v48  ;;  %v1419_v49 = vpop.f32.mrf.mxu1 }
  0xf0   : > { %530 = vst.msk [vmem:[%s1262_s24 + $0xe8] sm:$0xff] %vm500_vm2, %v1419_v49 }
  0xf1   : > { %v537_v50 = vsel %vm500_vm2, %v1274_v20, 0.0  ;;  %v538_v51 = vsel %vm500_vm2, %v1294_v24, 0.0  ;;  %v540_v52 = vsel %vm500_vm2, %v1264_v18, 0.0  ;;  %v542_v54 = vsel %vm500_vm2, %v1284_v22, 0.0 }
  0xf2   : > { %v539_v53 = vadd.f32 %v538_v51, %v537_v50  ;;  %v544_v56 = vsel %vm500_vm2, %v1314_v28, 0.0  ;;  %v546_v58 = vsel %vm500_vm2, %v1334_v32, 0.0  ;;  %v548_v60 = vsel %vm500_vm2, %v1304_v26, 0.0 }
  0xf3   : > { %v550_v62 = vsel %vm500_vm2, %v1324_v30, 0.0  ;;  %v1182_v63 = vmov 0.0   ;;  %v552_v1 = vsel %vm500_vm2, %v1354_v36, 0.0  ;;  %v554_v3 = vsel %vm500_vm2, %v1374_v40, 0.0 }
  0xf4   : > { %v541_v55 = vadd.f32 %v540_v52, %v539_v53  ;;  %1052 = vst.msk [vmem:[%s1785_s3 + $0x8] sm:$0xff] %vm500_vm2, %v1182_v63  ;;  %1053 = vst.msk [vmem:[%s1785_s3 + $0x10] sm:$0xff] %vm500_vm2, %v1182_v63  ;;  %v556_v5 = vsel %vm500_vm2, %v1344_v34, 0.0  ;;  %v558_v7 = vsel %vm500_vm2, %v1364_v38, 0.0  ;;  %v560_v9 = vsel %vm500_vm2, %v1394_v44, 0.0 }
  0xf5   : > { %v562_v11 = vsel %vm500_vm2, %v1414_v48, 0.0  ;;  %v564_v13 = vsel %vm500_vm2, %v1384_v42, 0.0  ;;  %v566_v15 = vsel %vm500_vm2, %v1404_v46, 0.0  ;;  %v568_v17 = vsel %vm500_vm2, %v1279_v21, 0.0 }
  0xf6   : > { %v543_v57 = vadd.f32 %v542_v54, %v541_v55  ;;  %v570_v51 = vsel %vm500_vm2, %v1299_v25, 0.0  ;;  %v572_v53 = vsel %vm500_vm2, %v1269_v19, 0.0  ;;  %v574_v55 = vsel %vm500_vm2, %v1289_v23, 0.0 }
  0xf7   : > { %v582_v63 = vsel %vm500_vm2, %v1329_v31, 0.0 }
  0xf8   : > { %v545_v59 = vadd.f32 %v544_v56, %v543_v57  ;;  %v576_v57 = vsel %vm500_vm2, %v1319_v29, 0.0 }
  0xfa   : > { %v547_v61 = vadd.f32 %v546_v58, %v545_v59  ;;  %v578_v59 = vsel %vm500_vm2, %v1339_v33, 0.0 }
  0xfc   : > { %v549_v0 = vadd.f32 %v548_v60, %v547_v61  ;;  %v580_v61 = vsel %vm500_vm2, %v1309_v27, 0.0 }
  0xfe   : > { %v551_v2 = vadd.f32 %v550_v62, %v549_v0 }
 0x100   : > { %v553_v4 = vadd.f32 %v552_v1, %v551_v2  ;;  %v584_v1 = vsel %vm500_vm2, %v1359_v37, 0.0 }
 0x102   : > { %v555_v6 = vadd.f32 %v554_v3, %v553_v4  ;;  %v586_v3 = vsel %vm500_vm2, %v1379_v41, 0.0 }
 0x104   : > { %v557_v8 = vadd.f32 %v556_v5, %v555_v6  ;;  %v588_v5 = vsel %vm500_vm2, %v1349_v35, 0.0 }
 0x106   : > { %v559_v10 = vadd.f32 %v558_v7, %v557_v8  ;;  %v590_v7 = vsel %vm500_vm2, %v1369_v39, 0.0 }
 0x108   : > { %v561_v12 = vadd.f32 %v560_v9, %v559_v10  ;;  %v592_v9 = vsel %vm500_vm2, %v1399_v45, 0.0 }
 0x10a   : > { %v563_v14 = vadd.f32 %v562_v11, %v561_v12  ;;  %v594_v11 = vsel %vm500_vm2, %v1419_v49, 0.0 }
 0x10c   : > { %v565_v16 = vadd.f32 %v564_v13, %v563_v14  ;;  %v596_v13 = vsel %vm500_vm2, %v1389_v43, 0.0 }
 0x10e   : > { %v567_v50 = vadd.f32 %v566_v15, %v565_v16  ;;  %v598_v15 = vsel %vm500_vm2, %v1409_v47, 0.0 }
 0x110   : > { %v569_v52 = vadd.f32 %v568_v17, %v567_v50 }
 0x112   : > { %v571_v54 = vadd.f32 %v570_v51, %v569_v52 }
 0x114   : > { %v573_v56 = vadd.f32 %v572_v53, %v571_v54 }
 0x116   : > { %v575_v58 = vadd.f32 %v574_v55, %v573_v56 }
 0x118   : > { %v577_v60 = vadd.f32 %v576_v57, %v575_v58 }
 0x11a   : > { %v579_v62 = vadd.f32 %v578_v59, %v577_v60 }
 0x11c   : > { %v581_v0 = vadd.f32 %v580_v61, %v579_v62 }
 0x11e   : > { %v583_v2 = vadd.f32 %v582_v63, %v581_v0 }
 0x120   : > { %v585_v4 = vadd.f32 %v584_v1, %v583_v2 }
 0x122   : > { %v587_v6 = vadd.f32 %v586_v3, %v585_v4 }
 0x124   : > { %v589_v8 = vadd.f32 %v588_v5, %v587_v6 }
 0x126   : > { %v591_v10 = vadd.f32 %v590_v7, %v589_v8 }
 0x128   : > { %v593_v12 = vadd.f32 %v592_v9, %v591_v10 }
 0x12a   : > { %v595_v14 = vadd.f32 %v594_v11, %v593_v12 }
 0x12c   : > { %v597_v16 = vadd.f32 %v596_v13, %v595_v14 }
 0x12e   : > { %v599_v17 = vadd.f32 %v598_v15, %v597_v16 }
 0x130   : > { %v600_v50 = vrot.slane %v599_v17, 4 }
 0x132   : > { %v601_v51 = vadd.f32 %v600_v50, %v599_v17 }
 0x134   : > { %v602_v52 = vrot.slane %v601_v51, 2 }
 0x136   : > { %v603_v53 = vadd.f32 %v602_v52, %v601_v51 }
 0x138   : > { %v604_v54 = vrot.slane %v603_v53, 1 }
 0x13a   : > { %v605_v55 = vadd.f32 %v604_v54, %v603_v53 }
 0x13c   : > { %v606_v56 = vmul.f32 0.00390625, %v605_v55 }
 0x13e   : > { %607 = vst.msk [vmem:[%s1785_s3] sm:$0xff] %vm500_vm2, %v606_v56 }
 0x13f PF: > { %v613_v57 = vlaneseq  ;;  %s1054_s4 = sshll.u32 %s1210_s13, 8  ;;  %v1183_v56 = vmov 0.0  }
 0x140   : > { %v1509_v62 = vstv %s1054_s4 }
 0x141   : > { %v1501_v58 = vshrl.u32 %v613_v57, 7 }
 0x143   : > { %v615_v59 = vsub.s32 0, %v1501_v58  ;;  %v652_v61 = vadd.s32 8, %v1501_v58  ;;  %v653_v63 = vadd.s32 16, %v1501_v58  ;;  %v654_v1 = vadd.s32 24, %v1501_v58 }
 0x144   : > { %v655_v2 = vadd.s32 32, %v1501_v58  ;;  %v684_v3 = vadd.s32 %v1509_v62, %v1501_v58  ;;  %v656_v5 = vadd.s32 40, %v1501_v58  ;;  %v657_v6 = vadd.s32 48, %v1501_v58 }
 0x145   : > { %v612_v60 = vld [vmem:[%s1785_s3] sm:$0xff]  ;;  %v685_v4 = vadd.s32 %v1509_v62, %v652_v61  ;;  %v658_v7 = vadd.s32 56, %v1501_v58  ;;  %v659_v8 = vadd.s32 64, %v1501_v58  ;;  %v660_v9 = vadd.s32 72, %v1501_v58 }
 0x146   : > { %v1512_v0 = vrot.slane %v612_v60, %v615_v59  ;;  %v661_v10 = vadd.s32 80, %v1501_v58  ;;  %v1526_v11 = vadd.s32 88, %v1501_v58  ;;  %v686_v12 = vadd.s32 %v1509_v62, %v653_v63 }
 0x147   : > { %v1532_v14 = vadd.s32 96, %v1501_v58  ;;  %v1535_v15 = vadd.s32 104, %v1501_v58  ;;  %v1538_v16 = vadd.s32 112, %v1501_v58  ;;  %v687_v50 = vadd.s32 %v1509_v62, %v654_v1 }
 0x148   : > { %v617_v13 = vsub.f32 %v1274_v20, %v1512_v0  ;;  %v618_v17 = vsub.f32 %v1294_v24, %v1512_v0  ;;  %vm716_vm3 = vcmp.lt.s32.totalorder %v684_v3, 450  ;;  %vm717_vm4 = vcmp.lt.s32.totalorder %v685_v4, 450 }
 0x149   : > { %v619_v51 = vsub.f32 %v1264_v18, %v1512_v0  ;;  %v620_v20 = vsub.f32 %v1284_v22, %v1512_v0  ;;  %v621_v52 = vsub.f32 %v1314_v28, %v1512_v0  ;;  %v622_v53 = vsub.f32 %v1334_v32, %v1512_v0 }
 0x14a   : > { %v623_v54 = vsub.f32 %v1304_v26, %v1512_v0  ;;  %v624_v24 = vsub.f32 %v1324_v30, %v1512_v0  ;;  %v688_v55 = vadd.s32 %v1509_v62, %v655_v2  ;;  %vm718_vm5 = vcmp.lt.s32.totalorder %v686_v12, 450 }
 0x14b   : > { %v625_v18 = vsub.f32 %v1354_v36, %v1512_v0  ;;  %v626_v22 = vsub.f32 %v1374_v40, %v1512_v0  ;;  %v1055_v28 = vsel %vm716_vm3, 1.0, %v1183_v56  ;;  %v1056_v32 = vsel %vm717_vm4, 1.0, %v1183_v56 }
 0x14c   : > { %v627_v26 = vsub.f32 %v1344_v34, %v1512_v0  ;;  %v689_v59 = vadd.s32 %v1509_v62, %v656_v5  ;;  %vm719_vm6 = vcmp.lt.s32.totalorder %v687_v50, 450  ;;  %v1057_v1 = vsel %vm718_vm5, 1.0, %v1183_v56 }
 0x14d   : > { %v690_v2 = vadd.s32 %v1509_v62, %v657_v6  ;;  %vm720_vm7 = vcmp.lt.s32.totalorder %v688_v55, 450  ;;  %v812_v3 = vmul.f32 %v1055_v28, %v617_v13  ;;  %v813_v4 = vmul.f32 %v1056_v32, %v618_v17 }
 0x14e   : > { %v1058_v61 = vsel %vm719_vm6, 1.0, %v1183_v56  ;;  %v691_v60 = vadd.s32 %v1509_v62, %v658_v7  ;;  %vm721_vm8 = vcmp.lt.s32.totalorder %v689_v59, 450  ;;  %v814_v6 = vmul.f32 %v1057_v1, %v619_v51 }
 0x14f   : > { %v692_v55 = vadd.s32 %v1509_v62, %v659_v8  ;;  %v1059_v28 = vsel %vm720_vm7, 1.0, %v1183_v56  ;;  %vm722_vm9 = vcmp.lt.s32.totalorder %v690_v2, 450  ;;  %v815_v32 = vmul.f32 %v1058_v61, %v620_v20 }
 0x150   : > { %v844_v50 = vmul.f32 %v812_v3, %v812_v3  ;;  %v845_v12 = vmul.f32 %v813_v4, %v813_v4  ;;  %v693_v51 = vadd.s32 %v1509_v62, %v660_v9  ;;  %v1060_v59 = vsel %vm721_vm8, 1.0, %v1183_v56 }
 0x151   : > { %vm723_vm10 = vcmp.lt.s32.totalorder %v691_v60, 450  ;;  %v816_v8 = vmul.f32 %v1059_v28, %v621_v52  ;;  %v846_v17 = vmul.f32 %v814_v6, %v814_v6  ;;  %v694_v61 = vadd.s32 %v1509_v62, %v661_v10 }
 0x152   : > { %vm724_vm11 = vcmp.lt.s32.totalorder %v692_v55, 450  ;;  %v1061_v2 = vsel %vm722_vm9, 1.0, %v1183_v56  ;;  %v817_v63 = vmul.f32 %v1060_v59, %v622_v53  ;;  %v847_v7 = vmul.f32 %v815_v32, %v815_v32 }
 0x153   : > { %v878_v13 = vadd.f32 %v813_v4, %v812_v3  ;;  %v879_v9 = vadd.f32 %v845_v12, %v844_v50  ;;  %v642_v5 = vsub.f32 %v1379_v41, %v1512_v0  ;;  %v695_v60 = vadd.s32 %v1509_v62, %v1526_v11 }
 0x154   : > { %vm725_vm12 = vcmp.lt.s32.totalorder %v693_v51, 450  ;;  %v1062_v52 = vsel %vm723_vm10, 1.0, %v1183_v56  ;;  %v818_v28 = vmul.f32 %v1061_v2, %v623_v54  ;;  %v848_v20 = vmul.f32 %v816_v8, %v816_v8 }
 0x155   : > { %v880_v1 = vadd.f32 %v878_v13, %v814_v6  ;;  %v881_v10 = vadd.f32 %v879_v9, %v846_v17  ;;  %v643_v57 = vsub.f32 %v1349_v35, %v1512_v0  ;;  %v696_v53 = vadd.s32 %v1509_v62, %v1532_v14 }
 0x156   : > { %vm726_vm13 = vcmp.lt.s32.totalorder %v694_v61, 450  ;;  %v1063_v3 = vsel %vm724_vm11, 1.0, %v1183_v56  ;;  %v819_v11 = vmul.f32 %v1062_v52, %v624_v24  ;;  %v849_v4 = vmul.f32 %v817_v63, %v817_v63 }
 0x157   : > { %v882_v12 = vadd.f32 %v880_v1, %v815_v32  ;;  %v883_v54 = vadd.f32 %v881_v10, %v847_v7  ;;  %v666_v50 = vadd.s32 120, %v1501_v58  ;;  %v697_v6 = vadd.s32 %v1509_v62, %v1535_v15 }
 0x158   : > { %vm727_vm14 = vcmp.lt.s32.totalorder %v695_v60, 450  ;;  %v1064_v14 = vsel %vm725_vm12, 1.0, %v1183_v56  ;;  %v820_v13 = vmul.f32 %v1063_v3, %v625_v18  ;;  %v850_v17 = vmul.f32 %v818_v28, %v818_v28 }
 0x159   : > { %v884_v55 = vadd.f32 %v882_v12, %v816_v8  ;;  %v885_v30 = vadd.f32 %v883_v54, %v848_v20  ;;  %v667_v24 = vadd.s32 128, %v1501_v58  ;;  %v698_v32 = vadd.s32 %v1509_v62, %v1538_v16 }
 0x15a   : > { %vm728_vm15 = vcmp.lt.s32.totalorder %v696_v53, 450  ;;  %v1065_v15 = vsel %vm726_vm13, 1.0, %v1183_v56  ;;  %v821_v7 = vmul.f32 %v1064_v14, %v626_v22  ;;  %v851_v51 = vmul.f32 %v819_v11, %v819_v11 }
 0x15b   : > { %v886_v59 = vadd.f32 %v884_v55, %v817_v63  ;;  %v887_v36 = vadd.f32 %v885_v30, %v849_v4  ;;  %v668_v18 = vadd.s32 136, %v1501_v58  ;;  %v699_v1 = vadd.s32 %v1509_v62, %v666_v50 }
 0x15c   : > { %vm729_vm0 = vcmp.lt.s32.totalorder %v697_v6, 450  ;;  %v1066_v8 = vsel %vm727_vm14, 1.0, %v1183_v56  ;;  %v822_v16 = vmul.f32 %v1065_v15, %v627_v26  ;;  %v852_v20 = vmul.f32 %v820_v13, %v820_v13 }
 0x15d   : > { %v888_v61 = vadd.f32 %v886_v59, %v818_v28  ;;  %v889_v2 = vadd.f32 %v887_v36, %v850_v17  ;;  %v669_v40 = vadd.s32 144, %v1501_v58  ;;  %v700_v22 = vadd.s32 %v1509_v62, %v667_v24 }
 0x15e   : > { %vm730_vm1 = vcmp.lt.s32.totalorder %v698_v32, 450  ;;  %v1067_v63 = vsel %vm728_vm15, 1.0, %v1183_v56  ;;  %v1786_v9 = vsub.f32 %v1364_v38, %v1512_v0  ;;  %v853_v52 = vmul.f32 %v821_v7, %v821_v7 }
 0x15f   : > { %v890_v10 = vadd.f32 %v888_v61, %v819_v11  ;;  %v891_v3 = vadd.f32 %v889_v2, %v851_v51  ;;  %v670_v34 = vadd.s32 152, %v1501_v58  ;;  %v701_v26 = vadd.s32 %v1509_v62, %v668_v18 }
 0x160   : > { %v823_v60 = vmul.f32 %v1066_v8, %v1786_v9  ;;  %vm731_vm3 = vcmp.lt.s32.totalorder %v699_v1, 450  ;;  %v1068_v28 = vsel %vm729_vm0, 1.0, %v1183_v56  ;;  %v1787_v4 = vsub.f32 %v1394_v44, %v1512_v0 }
 0x161   : > { %v854_v12 = vmul.f32 %v822_v16, %v822_v16  ;;  %v892_v54 = vadd.f32 %v890_v10, %v820_v13  ;;  %v893_v50 = vadd.f32 %v891_v3, %v852_v20  ;;  %v671_v38 = vadd.s32 160, %v1501_v58 }
 0x162   : > { %v824_v53 = vmul.f32 %v1067_v63, %v1787_v4  ;;  %v702_v11 = vadd.s32 %v1509_v62, %v669_v40  ;;  %vm732_vm4 = vcmp.lt.s32.totalorder %v700_v22, 450  ;;  %v1069_v14 = vsel %vm730_vm1, 1.0, %v1183_v56 }
 0x163   : > { %v1788_v17 = vsub.f32 %v1414_v48, %v1512_v0  ;;  %v855_v55 = vmul.f32 %v823_v60, %v823_v60  ;;  %v894_v30 = vadd.f32 %v892_v54, %v821_v7  ;;  %v895_v24 = vadd.f32 %v893_v50, %v853_v52 }
 0x164   : > { %v672_v44 = vadd.s32 168, %v1501_v58  ;;  %v703_v13 = vadd.s32 %v1509_v62, %v670_v34  ;;  %vm733_vm5 = vcmp.lt.s32.totalorder %v701_v26, 450  ;;  %v1070_v15 = vsel %vm731_vm3, 1.0, %v1183_v56 }
 0x165   : > { %v825_v6 = vmul.f32 %v1068_v28, %v1788_v17  ;;  %v1789_v51 = vsub.f32 %v1384_v42, %v1512_v0  ;;  %v856_v59 = vmul.f32 %v824_v53, %v824_v53  ;;  %v896_v36 = vadd.f32 %v894_v30, %v822_v16 }
 0x166   : > { %v897_v18 = vadd.f32 %v895_v24, %v854_v12  ;;  %v673_v48 = vadd.s32 176, %v1501_v58  ;;  %v704_v7 = vadd.s32 %v1509_v62, %v671_v38  ;;  %vm734_vm6 = vcmp.lt.s32.totalorder %v702_v11, 450 }
 0x167   : > { %v826_v32 = vmul.f32 %v1069_v14, %v1789_v51  ;;  %v1071_v8 = vsel %vm732_vm4, 1.0, %v1183_v56  ;;  %v1790_v20 = vsub.f32 %v1404_v46, %v1512_v0  ;;  %v857_v61 = vmul.f32 %v825_v6, %v825_v6 }
 0x168   : > { %v898_v2 = vadd.f32 %v896_v36, %v823_v60  ;;  %v899_v40 = vadd.f32 %v897_v18, %v855_v55  ;;  %v674_v42 = vadd.s32 184, %v1501_v58  ;;  %v705_v16 = vadd.s32 %v1509_v62, %v672_v44 }
 0x169   : > { %v827_v1 = vmul.f32 %v1070_v15, %v1790_v20  ;;  %vm735_vm7 = vcmp.lt.s32.totalorder %v703_v13, 450  ;;  %v1072_v63 = vsel %vm733_vm5, 1.0, %v1183_v56  ;;  %v1791_v9 = vsub.f32 %v1279_v21, %v1512_v0 }
 0x16a   : > { %v858_v52 = vmul.f32 %v826_v32, %v826_v32  ;;  %v900_v10 = vadd.f32 %v898_v2, %v824_v53  ;;  %v901_v3 = vadd.f32 %v899_v40, %v856_v59  ;;  %v675_v46 = vadd.s32 192, %v1501_v58 }
 0x16b   : > { %v828_v22 = vmul.f32 %v1071_v8, %v1791_v9  ;;  %v706_v60 = vadd.s32 %v1509_v62, %v673_v48  ;;  %vm736_vm8 = vcmp.lt.s32.totalorder %v704_v7, 450  ;;  %v1073_v34 = vsel %vm734_vm6, 1.0, %v1183_v56 }
 0x16c   : > { %v1792_v28 = vsub.f32 %v1299_v25, %v1512_v0  ;;  %v859_v4 = vmul.f32 %v827_v1, %v827_v1  ;;  %v902_v12 = vadd.f32 %v900_v10, %v825_v6  ;;  %v903_v54 = vadd.f32 %v901_v3, %v857_v61 }
 0x16d   : > { %v676_v21 = vadd.s32 200, %v1501_v58  ;;  %v707_v53 = vadd.s32 %v1509_v62, %v674_v42  ;;  %vm737_vm9 = vcmp.lt.s32.totalorder %v705_v16, 450  ;;  %v1074_v50 = vsel %vm735_vm7, 1.0, %v1183_v56 }
 0x16e   : > { %v829_v26 = vmul.f32 %v1072_v63, %v1792_v28  ;;  %v1793_v38 = vsub.f32 %v1269_v19, %v1512_v0  ;;  %v860_v14 = vmul.f32 %v828_v22, %v828_v22  ;;  %v904_v17 = vadd.f32 %v902_v12, %v826_v32 }
 0x16f   : > { %v905_v55 = vadd.f32 %v903_v54, %v858_v52  ;;  %v677_v25 = vadd.s32 208, %v1501_v58  ;;  %v708_v6 = vadd.s32 %v1509_v62, %v675_v46  ;;  %vm738_vm10 = vcmp.lt.s32.totalorder %v706_v60, 450 }
 0x170   : > { %v830_v11 = vmul.f32 %v1073_v34, %v1793_v38  ;;  %v1075_v30 = vsel %vm736_vm8, 1.0, %v1183_v56  ;;  %v1794_v24 = vsub.f32 %v1289_v23, %v1512_v0  ;;  %v861_v13 = vmul.f32 %v829_v26, %v829_v26 }
 0x171   : > { %v906_v15 = vadd.f32 %v904_v17, %v827_v1  ;;  %v907_v51 = vadd.f32 %v905_v55, %v859_v4  ;;  %v678_v19 = vadd.s32 216, %v1501_v58  ;;  %v709_v32 = vadd.s32 %v1509_v62, %v676_v21 }
 0x172   : > { %v831_v44 = vmul.f32 %v1074_v50, %v1794_v24  ;;  %vm739_vm11 = vcmp.lt.s32.totalorder %v707_v53, 450  ;;  %v1076_v59 = vsel %vm737_vm9, 1.0, %v1183_v56  ;;  %v1795_v36 = vsub.f32 %v1319_v29, %v1512_v0 }
 0x173   : > { %v862_v48 = vmul.f32 %v830_v11, %v830_v11  ;;  %v908_v7 = vadd.f32 %v906_v15, %v828_v22  ;;  %v909_v8 = vadd.f32 %v907_v51, %v860_v14  ;;  %v679_v23 = vadd.s32 224, %v1501_v58 }
 0x174   : > { %v832_v18 = vmul.f32 %v1075_v30, %v1795_v36  ;;  %v710_v20 = vadd.s32 %v1509_v62, %v677_v25  ;;  %vm740_vm12 = vcmp.lt.s32.totalorder %v708_v6, 450  ;;  %v1077_v1 = vsel %vm738_vm10, 1.0, %v1183_v56 }
 0x175   : > { %v1796_v61 = vsub.f32 %v1339_v33, %v1512_v0  ;;  %v863_v40 = vmul.f32 %v831_v44, %v831_v44  ;;  %v910_v42 = vadd.f32 %v908_v7, %v829_v26  ;;  %v911_v16 = vadd.f32 %v909_v8, %v861_v13 }
 0x176   : > { %v680_v29 = vadd.s32 232, %v1501_v58  ;;  %v711_v63 = vadd.s32 %v1509_v62, %v678_v19  ;;  %vm741_vm13 = vcmp.lt.s32.totalorder %v709_v32, 450  ;;  %v1078_v9 = vsel %vm739_vm11, 1.0, %v1183_v56 }
 0x177   : > { %v833_v2 = vmul.f32 %v1076_v59, %v1796_v61  ;;  %v1797_v22 = vsub.f32 %v1309_v27, %v1512_v0  ;;  %v864_v10 = vmul.f32 %v832_v18, %v832_v18  ;;  %v912_v3 = vadd.f32 %v910_v42, %v830_v11 }
 0x178   : > { %v913_v46 = vadd.f32 %v911_v16, %v862_v48  ;;  %v681_v33 = vadd.s32 240, %v1501_v58  ;;  %v712_v60 = vadd.s32 %v1509_v62, %v679_v23  ;;  %vm742_vm14 = vcmp.lt.s32.totalorder %v710_v20, 450 }
 0x179   : > { %v834_v52 = vmul.f32 %v1077_v1, %v1797_v22  ;;  %v1079_v34 = vsel %vm740_vm12, 1.0, %v1183_v56  ;;  %v1798_v28 = vsub.f32 %v1329_v31, %v1512_v0  ;;  %v865_v4 = vmul.f32 %v833_v2, %v833_v2 }
 0x17a   : > { %v914_v12 = vadd.f32 %v912_v3, %v831_v44  ;;  %v915_v54 = vadd.f32 %v913_v46, %v863_v40  ;;  %v682_v27 = vadd.s32 248, %v1501_v58  ;;  %v713_v21 = vadd.s32 %v1509_v62, %v680_v29 }
 0x17b   : > { %v835_v26 = vmul.f32 %v1078_v9, %v1798_v28  ;;  %vm743_vm15 = vcmp.lt.s32.totalorder %v711_v63, 450  ;;  %v1080_v53 = vsel %vm741_vm13, 1.0, %v1183_v56  ;;  %v1799_v50 = vsub.f32 %v1359_v37, %v1512_v0 }
 0x17c   : > { %v866_v11 = vmul.f32 %v834_v52, %v834_v52  ;;  %v916_v14 = vadd.f32 %v914_v12, %v832_v18  ;;  %v917_v17 = vadd.f32 %v915_v54, %v864_v10  ;;  %v644_v31 = vsub.f32 %v1369_v39, %v1512_v0 }
 0x17d   : > { %v836_v38 = vmul.f32 %v1079_v34, %v1799_v50  ;;  %v714_v55 = vadd.s32 %v1509_v62, %v681_v33  ;;  %vm744_vm0 = vcmp.lt.s32.totalorder %v712_v60, 450  ;;  %v1081_v58 = vsel %vm742_vm14, 1.0, %v1183_v56  ;;  %v1089_v34 = vld [vmem:[%s1785_s3 + $0x10] sm:$0xff] }
 0x17e   : > { %v837_v25 = vmul.f32 %v1080_v53, %v642_v5  ;;  %v867_v6 = vmul.f32 %v835_v26, %v835_v26  ;;  %v918_v30 = vadd.f32 %v916_v14, %v833_v2  ;;  %v919_v37 = vadd.f32 %v917_v17, %v865_v4 }
 0x17f   : > { %v645_v24 = vsub.f32 %v1399_v45, %v1512_v0  ;;  %v715_v44 = vadd.s32 %v1509_v62, %v682_v27  ;;  %vm745_vm1 = vcmp.lt.s32.totalorder %v713_v21, 450  ;;  %v1082_v39 = vsel %vm743_vm15, 1.0, %v1183_v56 }
 0x180   : > { %v838_v13 = vmul.f32 %v1081_v58, %v643_v57  ;;  %v868_v15 = vmul.f32 %v836_v38, %v836_v38  ;;  %v920_v51 = vadd.f32 %v918_v30, %v834_v52  ;;  %v921_v41 = vadd.f32 %v919_v37, %v866_v11 }
 0x181   : > { %v646_v5 = vsub.f32 %v1419_v49, %v1512_v0  ;;  %vm746_vm3 = vcmp.lt.s32.totalorder %v714_v55, 450  ;;  %v1083_v45 = vsel %vm744_vm0, 1.0, %v1183_v56  ;;  %v839_v19 = vmul.f32 %v1082_v39, %v644_v31 }
 0x182   : > { %v869_v62 = vmul.f32 %v837_v25, %v837_v25  ;;  %v922_v32 = vadd.f32 %v920_v51, %v835_v26  ;;  %v923_v59 = vadd.f32 %v921_v41, %v867_v6  ;;  %v647_v36 = vsub.f32 %v1389_v43, %v1512_v0 }
 0x183   : > { %vm747_vm4 = vcmp.lt.s32.totalorder %v715_v44, 450  ;;  %v1084_v35 = vsel %vm745_vm1, 1.0, %v1183_v56  ;;  %v840_v57 = vmul.f32 %v1083_v45, %v645_v24  ;;  %v870_v18 = vmul.f32 %v838_v13, %v838_v13 }
 0x184   : > { %v924_v48 = vadd.f32 %v922_v32, %v836_v38  ;;  %v925_v7 = vadd.f32 %v923_v59, %v868_v15  ;;  %v648_v49 = vsub.f32 %v1409_v47, %v1512_v0  ;;  %v1085_v8 = vsel %vm746_vm3, 1.0, %v1183_v56 }
 0x185   : > { %v841_v23 = vmul.f32 %v1084_v35, %v646_v5  ;;  %v871_v20 = vmul.f32 %v839_v19, %v839_v19  ;;  %v1086_v2 = vsel %vm747_vm4, 1.0, %v1183_v56  ;;  %v842_v40 = vmul.f32 %v1085_v8, %v647_v36  ;;  %v1087_v56 = vld [vmem:[%s1785_s3 + $0x8] sm:$0xff] }
 0x186   : > { %v926_v1 = vadd.f32 %v924_v48, %v837_v25  ;;  %v927_v61 = vadd.f32 %v925_v7, %v869_v62  ;;  %v872_v43 = vmul.f32 %v840_v57, %v840_v57  ;;  %v843_v29 = vmul.f32 %v1086_v2, %v648_v49 }
 0x187   : > { %v873_v63 = vmul.f32 %v841_v23, %v841_v23  ;;  %v874_v52 = vmul.f32 %v842_v40, %v842_v40 }
 0x188   : > { %v928_v42 = vadd.f32 %v926_v1, %v838_v13  ;;  %v929_v16 = vadd.f32 %v927_v61, %v870_v18  ;;  %v875_v47 = vmul.f32 %v843_v29, %v843_v29 }
 0x18a   : > { %v930_v9 = vadd.f32 %v928_v42, %v839_v19  ;;  %v931_v22 = vadd.f32 %v929_v16, %v871_v20 }
 0x18c   : > { %v932_v10 = vadd.f32 %v930_v9, %v840_v57  ;;  %v933_v3 = vadd.f32 %v931_v22, %v872_v43 }
 0x18e   : > { %v934_v0 = vadd.f32 %v932_v10, %v841_v23  ;;  %v935_v46 = vadd.f32 %v933_v3, %v873_v63 }
 0x190   : > { %v936_v33 = vadd.f32 %v934_v0, %v842_v40  ;;  %v937_v60 = vadd.f32 %v935_v46, %v874_v52 }
 0x192   : > { %v938_v28 = vadd.f32 %v936_v33, %v843_v29  ;;  %v939_v26 = vadd.f32 %v937_v60, %v875_v47 }
 0x194   : > { %v942_v4 = vadd.f32 %v1087_v56, %v938_v28  ;;  %v946_v12 = vadd.f32 %v1089_v34, %v939_v26 }
 0x196   : > { %1088 = vst.msk [vmem:[%s1785_s3 + $0x8] sm:$0xff] %vm500_vm2, %v942_v4  ;;  %1090 = vst.msk [vmem:[%s1785_s3 + $0x10] sm:$0xff] %vm500_vm2, %v946_v12 }
 0x197 PF: > { %s14_s12 = sadd.s32 1, %s1180_s12  }
 0x198   : > { %p11_p5 = scmp.ge.s32.totalorder %s14_s12, 4  }
 0x19a   :  { %13 = sbr.rel (!%p11_p5) target bundleno = 1 (0x1), region = 74 }

// kernel: bottleneck_forward.12
= control target key start
LH: loop header
LB: loop body
LE: loop exit
PB: predicated region body
PF: predicated region fallthrough
CT: control target
= control target key end

     0   :  { %s1252_s12 = smov 0   ;;  %s1839_s0 = inlined_call_operand.vmem [shape: bf16[512,64], index: 0, kind: input, shape index: {}]   ;;  %s1840_s1 = inlined_call_operand.vmem [shape: bf16[64,16], index: 1, kind: input, shape index: {}]   ;;  %s1841_s2 = inlined_call_operand.vmem [shape: f32[512,16], index: 2, kind: output, shape index: {0}]   ;;  %s1842_s3 = inlined_call_operand.vmem [shape: f32[3,8,16], index: 3, kind: output, shape index: {1}]  }
   0x1 LB: > { %s1258_s13 = sadd.s32 4294967295, %s1228_s12   ;;  %p1041_p0 = scmp.ge.s32.totalorder %s1228_s12, 1  ;;  %s1228_s12 = sphi %s1252_s12, %s14_s12  }
   0x2   : > { %p136_p1 = scmp.lt.s32.totalorder %s1228_s12, 3 }
   0x4   : > { %p137_p2 = pnand %p1041_p0, %p136_p1 }
   0x5   : > { %s1042_s16 = sshll.u32 (!%p137_p2), %s1258_s13, 5  ;;  %p1082_p4 = scmp.ne.s32.totalorder (!%p137_p2), %s1258_s13, 0 }
   0x6   : > { %140 = sbr.rel (%p137_p2) target bundleno = 418 (0x1a2), region = 28  ;;  %p161_p3 = scmp.lt.s32.totalorder (!%p137_p2), %s1042_s16, 63 }
   0xb   : > { %v1202_v0 = vld [vmem:[%s1840_s1 + $0x18] sm:$0xff]   ;;  %v1203_v1 = vld [vmem:[%s1840_s1 + $0x10] sm:$0xff]   ;;  %s1858_s16 = smov (!%p161_p3, %s1042_s16), 63  ;;  %v1204_v2 = vld [vmem:[%s1840_s1 + $0x8] sm:$0xff]   ;;  %vm317_vm0 = vcmask 523264   ;;  %vm527_vm1 = vcmask 130048  }
   0xc   : > { %1144 = vmatprep.subr.bf16.mxu0 %v1202_v0  ;;  %1184 = vmatprep.subr.bf16.mxu1 %v1202_v0  ;;  %s1043_s21 = sshll.u32 %s1858_s16, 2  ;;  %v1205_v3 = vld [vmem:[%s1840_s1] sm:$0xff]   ;;  %s1045_s27 = sshll.u32 %s1858_s16, 3 }
   0xd   : > { %1145 = vmatpush3.bf16.msra.mxu0 %v1202_v0  ;;  %1188 = vmatpush3.bf16.msra.mxu1 %v1202_v0  ;;  %s1281_s26 = scalar_lea.vmem %s1839_s0, %s1043_s21  ;;  %s1319_s30 = scalar_lea.vmem %s1841_s2, %s1045_s27 }
   0xe   : > { %1146 = vmatprep.subr.bf16.mxu0 %v1203_v1  ;;  %1185 = vmatprep.subr.bf16.mxu1 %v1203_v1  ;;  %v1206_v4 = vld [vmem:[%s1281_s26] sm:$0xff]   ;;  %v1208_v6 = vld [vmem:[%s1281_s26 + $0x8] sm:$0xff]   ;;  %v1210_v8 = vld [vmem:[%s1281_s26 + $0x10] sm:$0xff]  }
   0xf   : > { %v1207_v5 = vld [vmem:[%s1281_s26 + $0x40] sm:$0xff]   ;;  %1152 = vmatprep.mubr.msk.bf16.mxu0 %vm317_vm0, %v1206_v4  ;;  %v1209_v7 = vld [vmem:[%s1281_s26 + $0x48] sm:$0xff]   ;;  %v1211_v9 = vld [vmem:[%s1281_s26 + $0x50] sm:$0xff]  }
  0x10   : > { %1168 = vmatprep.mubr.msk.bf16.mxu1 %vm317_vm0, %v1207_v5  ;;  %v1212_v10 = vld [vmem:[%s1281_s26 + $0x18] sm:$0xff]   ;;  %v1214_v12 = vld [vmem:[%s1281_s26 + $0x20] sm:$0xff]   ;;  %v1216_v14 = vld [vmem:[%s1281_s26 + $0x28] sm:$0xff]  }
  0x11   : > { %1147 = vmatpush3.bf16.msra.mxu0 %v1203_v1  ;;  %1189 = vmatpush3.bf16.msra.mxu1 %v1203_v1  ;;  %v1213_v11 = vld [vmem:[%s1281_s26 + $0x58] sm:$0xff]   ;;  %v1215_v13 = vld [vmem:[%s1281_s26 + $0x60] sm:$0xff]   ;;  %v1217_v15 = vld [vmem:[%s1281_s26 + $0x68] sm:$0xff]  }
  0x12   : > { %1148 = vmatprep.subr.bf16.mxu0 %v1204_v2  ;;  %1186 = vmatprep.subr.bf16.mxu1 %v1204_v2  ;;  %v1218_v16 = vld [vmem:[%s1281_s26 + $0x30] sm:$0xff]   ;;  %v1220_v18 = vld [vmem:[%s1281_s26 + $0x38] sm:$0xff]  }
  0x13   : > { %v1219_v17 = vld [vmem:[%s1281_s26 + $0x70] sm:$0xff]   ;;  %v1221_v19 = vld [vmem:[%s1281_s26 + $0x78] sm:$0xff]  }
  0x15   : > { %1149 = vmatpush3.bf16.msra.mxu0 %v1204_v2  ;;  %1190 = vmatpush3.bf16.msra.mxu1 %v1204_v2 }
  0x16   : > { %1150 = vmatprep.subr.bf16.mxu0 %v1205_v3  ;;  %1187 = vmatprep.subr.bf16.mxu1 %v1205_v3 }
  0x19   : > { %1151 = vmatpush3.bf16.msra.mxu0 %v1205_v3  ;;  %1191 = vmatpush3.bf16.msra.mxu1 %v1205_v3 }
  0x1c   : > { %1153 = vmatmul.mubr.msk.bf16.vlgmr.msra.gmra.mxu0 %vm317_vm0, %v1208_v6  ;;  %1169 = vmatmul.mubr.msk.bf16.vlgmr.msra.gmra.mxu1 %vm317_vm0, %v1209_v7 }
  0x1d   : > { %1156 = vmatprep.mubr.msk.bf16.mxu0 %vm317_vm0, %v1210_v8  ;;  %1172 = vmatprep.mubr.msk.bf16.mxu1 %vm317_vm0, %v1211_v9 }
  0x24   : > { %1157 = vmatmul.mubr.msk.bf16.gmra.mxu0 %vm317_vm0, %v1212_v10  ;;  %1173 = vmatmul.mubr.msk.bf16.gmra.mxu1 %vm317_vm0, %v1213_v11 }
  0x25   : > { %1160 = vmatprep.mubr.msk.bf16.mxu0 %vm317_vm0, %v1214_v12  ;;  %1176 = vmatprep.mubr.msk.bf16.mxu1 %vm317_vm0, %v1215_v13 }
  0x2c   : > { %1161 = vmatmul.mubr.msk.bf16.gmra.mxu0 %vm317_vm0, %v1216_v14  ;;  %1177 = vmatmul.mubr.msk.bf16.gmra.mxu1 %vm317_vm0, %v1217_v15 }
  0x2d   : > { %1164 = vmatprep.mubr.msk.bf16.mxu0 %vm317_vm0, %v1218_v16  ;;  %1180 = vmatprep.mubr.msk.bf16.mxu1 %vm317_vm0, %v1219_v17 }
  0x34   : > { %1165 = vmatmul.mubr.msk.bf16.gmra.mxu0 %vm317_vm0, %v1220_v18  ;;  %1181 = vmatmul.mubr.msk.bf16.gmra.mxu1 %vm317_vm0, %v1221_v19 }
  0xdc   : > { %v1321_v20 = vpop.f32.mrf.mxu0  ;;  %v1323_v21 = vpop.f32.mrf.mxu1 }
  0xdd   : > { %530 = vst.msk [vmem:[%s1319_s30 + $0x10] sm:$0xff] %vm527_vm1, %v1321_v20  ;;  %546 = vst.msk [vmem:[%s1319_s30 + $0x90] sm:$0xff] %vm527_vm1, %v1323_v21 }
  0xde   : > { %v1331_v22 = vpop.f32.mrf.mxu0  ;;  %v1333_v23 = vpop.f32.mrf.mxu1 }
  0xdf   : > { %528 = vst.msk [vmem:[%s1319_s30] sm:$0xff] %vm527_vm1, %v1331_v22  ;;  %544 = vst.msk [vmem:[%s1319_s30 + $0x80] sm:$0xff] %vm527_vm1, %v1333_v23 }
  0xe0   : > { %v1341_v24 = vpop.f32.mrf.mxu0  ;;  %v1343_v25 = vpop.f32.mrf.mxu1 }
  0xe1   : > { %531 = vst.msk [vmem:[%s1319_s30 + $0x18] sm:$0xff] %vm527_vm1, %v1341_v24  ;;  %547 = vst.msk [vmem:[%s1319_s30 + $0x98] sm:$0xff] %vm527_vm1, %v1343_v25 }
  0xe2   : > { %v1351_v26 = vpop.f32.mrf.mxu0  ;;  %v1353_v27 = vpop.f32.mrf.mxu1 }
  0xe3   : > { %529 = vst.msk [vmem:[%s1319_s30 + $0x8] sm:$0xff] %vm527_vm1, %v1351_v26  ;;  %545 = vst.msk [vmem:[%s1319_s30 + $0x88] sm:$0xff] %vm527_vm1, %v1353_v27 }
  0xe4   : > { %v1361_v28 = vpop.f32.mrf.mxu0  ;;  %v1363_v29 = vpop.f32.mrf.mxu1 }
  0xe5   : > { %534 = vst.msk [vmem:[%s1319_s30 + $0x30] sm:$0xff] %vm527_vm1, %v1361_v28  ;;  %550 = vst.msk [vmem:[%s1319_s30 + $0xb0] sm:$0xff] %vm527_vm1, %v1363_v29 }
  0xe6   : > { %v1371_v30 = vpop.f32.mrf.mxu0  ;;  %v1373_v31 = vpop.f32.mrf.mxu1 }
  0xe7   : > { %532 = vst.msk [vmem:[%s1319_s30 + $0x20] sm:$0xff] %vm527_vm1, %v1371_v30  ;;  %548 = vst.msk [vmem:[%s1319_s30 + $0xa0] sm:$0xff] %vm527_vm1, %v1373_v31 }
  0xe8   : > { %v1381_v32 = vpop.f32.mrf.mxu0  ;;  %v1383_v33 = vpop.f32.mrf.mxu1 }
  0xe9   : > { %535 = vst.msk [vmem:[%s1319_s30 + $0x38] sm:$0xff] %vm527_vm1, %v1381_v32  ;;  %551 = vst.msk [vmem:[%s1319_s30 + $0xb8] sm:$0xff] %vm527_vm1, %v1383_v33 }
  0xea   : > { %v1391_v34 = vpop.f32.mrf.mxu0  ;;  %v1393_v35 = vpop.f32.mrf.mxu1 }
  0xeb   : > { %533 = vst.msk [vmem:[%s1319_s30 + $0x28] sm:$0xff] %vm527_vm1, %v1391_v34  ;;  %549 = vst.msk [vmem:[%s1319_s30 + $0xa8] sm:$0xff] %vm527_vm1, %v1393_v35 }
  0xec   : > { %v1401_v36 = vpop.f32.mrf.mxu0  ;;  %v1403_v37 = vpop.f32.mrf.mxu1 }
  0xed   : > { %538 = vst.msk [vmem:[%s1319_s30 + $0x50] sm:$0xff] %vm527_vm1, %v1401_v36  ;;  %554 = vst.msk [vmem:[%s1319_s30 + $0xd0] sm:$0xff] %vm527_vm1, %v1403_v37 }
  0xee   : > { %v1411_v38 = vpop.f32.mrf.mxu0  ;;  %v1413_v39 = vpop.f32.mrf.mxu1 }
  0xef   : > { %536 = vst.msk [vmem:[%s1319_s30 + $0x40] sm:$0xff] %vm527_vm1, %v1411_v38  ;;  %552 = vst.msk [vmem:[%s1319_s30 + $0xc0] sm:$0xff] %vm527_vm1, %v1413_v39 }
  0xf0   : > { %v1421_v40 = vpop.f32.mrf.mxu0  ;;  %v1423_v41 = vpop.f32.mrf.mxu1 }
  0xf1   : > { %539 = vst.msk [vmem:[%s1319_s30 + $0x58] sm:$0xff] %vm527_vm1, %v1421_v40  ;;  %555 = vst.msk [vmem:[%s1319_s30 + $0xd8] sm:$0xff] %vm527_vm1, %v1423_v41 }
  0xf2   : > { %v1431_v42 = vpop.f32.mrf.mxu0  ;;  %v1433_v43 = vpop.f32.mrf.mxu1 }
  0xf3   : > { %537 = vst.msk [vmem:[%s1319_s30 + $0x48] sm:$0xff] %vm527_vm1, %v1431_v42  ;;  %553 = vst.msk [vmem:[%s1319_s30 + $0xc8] sm:$0xff] %vm527_vm1, %v1433_v43 }
  0xf4   : > { %v1441_v44 = vpop.f32.mrf.mxu0  ;;  %v1443_v45 = vpop.f32.mrf.mxu1 }
  0xf5   : > { %542 = vst.msk [vmem:[%s1319_s30 + $0x70] sm:$0xff] %vm527_vm1, %v1441_v44  ;;  %558 = vst.msk [vmem:[%s1319_s30 + $0xf0] sm:$0xff] %vm527_vm1, %v1443_v45 }
  0xf6   : > { %v1451_v46 = vpop.f32.mrf.mxu0  ;;  %v1453_v47 = vpop.f32.mrf.mxu1 }
  0xf7   : > { %540 = vst.msk [vmem:[%s1319_s30 + $0x60] sm:$0xff] %vm527_vm1, %v1451_v46  ;;  %556 = vst.msk [vmem:[%s1319_s30 + $0xe0] sm:$0xff] %vm527_vm1, %v1453_v47  ;;  %563 = sbr.rel (%p1082_p4) target bundleno = 330 (0x14a), region = 32 }
  0xf8   : > { %v1461_v48 = vpop.f32.mrf.mxu0  ;;  %v1463_v49 = vpop.f32.mrf.mxu1 }
  0xf9   : > { %543 = vst.msk [vmem:[%s1319_s30 + $0x78] sm:$0xff] %vm527_vm1, %v1461_v48  ;;  %559 = vst.msk [vmem:[%s1319_s30 + $0xf8] sm:$0xff] %vm527_vm1, %v1463_v49 }
  0xfa   : > { %v1471_v50 = vpop.f32.mrf.mxu0  ;;  %v1473_v51 = vpop.f32.mrf.mxu1 }
  0xfb   : > { %541 = vst.msk [vmem:[%s1319_s30 + $0x68] sm:$0xff] %vm527_vm1, %v1471_v50  ;;  %557 = vst.msk [vmem:[%s1319_s30 + $0xe8] sm:$0xff] %vm527_vm1, %v1473_v51 }
  0xfc   : > { %v564_v52 = vsel %vm527_vm1, %v1331_v22, 0.0  ;;  %v565_v53 = vsel %vm527_vm1, %v1351_v26, 0.0  ;;  %v567_v54 = vsel %vm527_vm1, %v1321_v20, 0.0  ;;  %v569_v56 = vsel %vm527_vm1, %v1341_v24, 0.0 }
  0xfd   : > { %v566_v55 = vadd.f32 %v565_v53, %v564_v52  ;;  %v571_v58 = vsel %vm527_vm1, %v1371_v30, 0.0  ;;  %v573_v60 = vsel %vm527_vm1, %v1391_v34, 0.0  ;;  %v575_v62 = vsel %vm527_vm1, %v1361_v28, 0.0 }
  0xfe   : > { %v577_v0 = vsel %vm527_vm1, %v1381_v32, 0.0  ;;  %v1230_v1 = vmov 0.0   ;;  %v579_v3 = vsel %vm527_vm1, %v1411_v38, 0.0  ;;  %v581_v5 = vsel %vm527_vm1, %v1431_v42, 0.0 }
  0xff   : > { %v568_v57 = vadd.f32 %v567_v54, %v566_v55  ;;  %1083 = vst.msk [vmem:[%s1842_s3 + $0x8] sm:$0xff] %vm527_vm1, %v1230_v1  ;;  %1084 = vst.msk [vmem:[%s1842_s3 + $0x10] sm:$0xff] %vm527_vm1, %v1230_v1  ;;  %v583_v7 = vsel %vm527_vm1, %v1401_v36, 0.0  ;;  %v585_v9 = vsel %vm527_vm1, %v1421_v40, 0.0  ;;  %v587_v11 = vsel %vm527_vm1, %v1451_v46, 0.0 }
 0x100   : > { %v589_v13 = vsel %vm527_vm1, %v1471_v50, 0.0  ;;  %v591_v15 = vsel %vm527_vm1, %v1441_v44, 0.0  ;;  %v593_v17 = vsel %vm527_vm1, %v1461_v48, 0.0  ;;  %v595_v19 = vsel %vm527_vm1, %v1333_v23, 0.0 }
 0x101   : > { %v570_v59 = vadd.f32 %v569_v56, %v568_v57  ;;  %v597_v53 = vsel %vm527_vm1, %v1353_v27, 0.0  ;;  %v599_v55 = vsel %vm527_vm1, %v1323_v21, 0.0  ;;  %v601_v57 = vsel %vm527_vm1, %v1343_v25, 0.0 }
 0x102   : > { %v609_v1 = vsel %vm527_vm1, %v1383_v33, 0.0 }
 0x103   : > { %v572_v61 = vadd.f32 %v571_v58, %v570_v59  ;;  %v603_v59 = vsel %vm527_vm1, %v1373_v31, 0.0 }
 0x105   : > { %v574_v63 = vadd.f32 %v573_v60, %v572_v61  ;;  %v605_v61 = vsel %vm527_vm1, %v1393_v35, 0.0 }
 0x107   : > { %v576_v2 = vadd.f32 %v575_v62, %v574_v63  ;;  %v607_v63 = vsel %vm527_vm1, %v1363_v29, 0.0 }
 0x109   : > { %v578_v4 = vadd.f32 %v577_v0, %v576_v2 }
 0x10b   : > { %v580_v6 = vadd.f32 %v579_v3, %v578_v4  ;;  %v611_v3 = vsel %vm527_vm1, %v1413_v39, 0.0 }
 0x10d   : > { %v582_v8 = vadd.f32 %v581_v5, %v580_v6  ;;  %v613_v5 = vsel %vm527_vm1, %v1433_v43, 0.0 }
 0x10f   : > { %v584_v10 = vadd.f32 %v583_v7, %v582_v8  ;;  %v615_v7 = vsel %vm527_vm1, %v1403_v37, 0.0 }
 0x111   : > { %v586_v12 = vadd.f32 %v585_v9, %v584_v10  ;;  %v617_v9 = vsel %vm527_vm1, %v1423_v41, 0.0 }
 0x113   : > { %v588_v14 = vadd.f32 %v587_v11, %v586_v12  ;;  %v619_v11 = vsel %vm527_vm1, %v1453_v47, 0.0 }
 0x115   : > { %v590_v16 = vadd.f32 %v589_v13, %v588_v14  ;;  %v621_v13 = vsel %vm527_vm1, %v1473_v51, 0.0 }
 0x117   : > { %v592_v18 = vadd.f32 %v591_v15, %v590_v16  ;;  %v623_v15 = vsel %vm527_vm1, %v1443_v45, 0.0 }
 0x119   : > { %v594_v52 = vadd.f32 %v593_v17, %v592_v18  ;;  %v625_v17 = vsel %vm527_vm1, %v1463_v49, 0.0 }
 0x11b   : > { %v596_v54 = vadd.f32 %v595_v19, %v594_v52 }
 0x11d   : > { %v598_v56 = vadd.f32 %v597_v53, %v596_v54 }
 0x11f   : > { %v600_v58 = vadd.f32 %v599_v55, %v598_v56 }
 0x121   : > { %v602_v60 = vadd.f32 %v601_v57, %v600_v58 }
 0x123   : > { %v604_v62 = vadd.f32 %v603_v59, %v602_v60 }
 0x125   : > { %v606_v0 = vadd.f32 %v605_v61, %v604_v62 }
 0x127   : > { %v608_v2 = vadd.f32 %v607_v63, %v606_v0 }
 0x129   : > { %v610_v4 = vadd.f32 %v609_v1, %v608_v2 }
 0x12b   : > { %v612_v6 = vadd.f32 %v611_v3, %v610_v4 }
 0x12d   : > { %v614_v8 = vadd.f32 %v613_v5, %v612_v6 }
 0x12f   : > { %v616_v10 = vadd.f32 %v615_v7, %v614_v8 }
 0x131   : > { %v618_v12 = vadd.f32 %v617_v9, %v616_v10 }
 0x133   : > { %v620_v14 = vadd.f32 %v619_v11, %v618_v12 }
 0x135   : > { %v622_v16 = vadd.f32 %v621_v13, %v620_v14 }
 0x137   : > { %v624_v18 = vadd.f32 %v623_v15, %v622_v16 }
 0x139   : > { %v626_v19 = vadd.f32 %v625_v17, %v624_v18 }
 0x13b   : > { %v627_v52 = vrot.slane %v626_v19, 4 }
 0x13d   : > { %v628_v53 = vadd.f32 %v627_v52, %v626_v19 }
 0x13f   : > { %v629_v54 = vrot.slane %v628_v53, 2 }
 0x141   : > { %v630_v55 = vadd.f32 %v629_v54, %v628_v53 }
 0x143   : > { %v631_v56 = vrot.slane %v630_v55, 1 }
 0x145   : > { %v632_v57 = vadd.f32 %v631_v56, %v630_v55 }
 0x147   : > { %v633_v58 = vmul.f32 0.00390625, %v632_v57 }
 0x149   : > { %634 = vst.msk [vmem:[%s1842_s3] sm:$0xff] %vm527_vm1, %v633_v58 }
 0x14a PF: > { %v640_v59 = vlaneseq  ;;  %s1085_s10 = sshll.u32 %s1258_s13, 8  ;;  %v1231_v58 = vmov 0.0  }
 0x14b   : > { %v1566_v0 = vstv %s1085_s10 }
 0x14c   : > { %v1558_v60 = vshrl.u32 %v640_v59, 7 }
 0x14e   : > { %v642_v61 = vsub.s32 0, %v1558_v60  ;;  %v679_v63 = vadd.s32 8, %v1558_v60  ;;  %v680_v1 = vadd.s32 16, %v1558_v60  ;;  %v681_v3 = vadd.s32 24, %v1558_v60 }
 0x14f   : > { %v682_v4 = vadd.s32 32, %v1558_v60  ;;  %v711_v5 = vadd.s32 %v1566_v0, %v1558_v60  ;;  %v683_v7 = vadd.s32 40, %v1558_v60  ;;  %v684_v8 = vadd.s32 48, %v1558_v60 }
 0x150   : > { %v639_v62 = vld [vmem:[%s1842_s3] sm:$0xff]  ;;  %v712_v6 = vadd.s32 %v1566_v0, %v679_v63  ;;  %v685_v9 = vadd.s32 56, %v1558_v60  ;;  %v686_v10 = vadd.s32 64, %v1558_v60  ;;  %v687_v11 = vadd.s32 72, %v1558_v60 }
 0x151   : > { %v1569_v2 = vrot.slane %v639_v62, %v642_v61  ;;  %v688_v12 = vadd.s32 80, %v1558_v60  ;;  %v1583_v13 = vadd.s32 88, %v1558_v60  ;;  %v713_v14 = vadd.s32 %v1566_v0, %v680_v1 }
 0x152   : > { %v1589_v16 = vadd.s32 96, %v1558_v60  ;;  %v1592_v17 = vadd.s32 104, %v1558_v60  ;;  %v1595_v18 = vadd.s32 112, %v1558_v60  ;;  %v714_v52 = vadd.s32 %v1566_v0, %v681_v3 }
 0x153   : > { %v644_v15 = vsub.f32 %v1331_v22, %v1569_v2  ;;  %v645_v19 = vsub.f32 %v1351_v26, %v1569_v2  ;;  %vm743_vm2 = vcmp.lt.s32.totalorder %v711_v5, 450  ;;  %vm744_vm3 = vcmp.lt.s32.totalorder %v712_v6, 450 }
 0x154   : > { %v646_v53 = vsub.f32 %v1321_v20, %v1569_v2  ;;  %v647_v22 = vsub.f32 %v1341_v24, %v1569_v2  ;;  %v648_v54 = vsub.f32 %v1371_v30, %v1569_v2  ;;  %v649_v55 = vsub.f32 %v1391_v34, %v1569_v2 }
 0x155   : > { %v650_v56 = vsub.f32 %v1361_v28, %v1569_v2  ;;  %v651_v26 = vsub.f32 %v1381_v32, %v1569_v2  ;;  %v715_v57 = vadd.s32 %v1566_v0, %v682_v4  ;;  %vm745_vm4 = vcmp.lt.s32.totalorder %v713_v14, 450 }
 0x156   : > { %v652_v20 = vsub.f32 %v1411_v38, %v1569_v2  ;;  %v653_v24 = vsub.f32 %v1431_v42, %v1569_v2  ;;  %v1086_v30 = vsel %vm743_vm2, 1.0, %v1231_v58  ;;  %v1087_v34 = vsel %vm744_vm3, 1.0, %v1231_v58 }
 0x157   : > { %v654_v28 = vsub.f32 %v1401_v36, %v1569_v2  ;;  %v716_v61 = vadd.s32 %v1566_v0, %v683_v7  ;;  %vm746_vm5 = vcmp.lt.s32.totalorder %v714_v52, 450  ;;  %v1088_v3 = vsel %vm745_vm4, 1.0, %v1231_v58 }
 0x158   : > { %v717_v4 = vadd.s32 %v1566_v0, %v684_v8  ;;  %vm747_vm6 = vcmp.lt.s32.totalorder %v715_v57, 450  ;;  %v839_v5 = vmul.f32 %v1086_v30, %v644_v15  ;;  %v840_v6 = vmul.f32 %v1087_v34, %v645_v19 }
 0x159   : > { %v1089_v63 = vsel %vm746_vm5, 1.0, %v1231_v58  ;;  %v718_v62 = vadd.s32 %v1566_v0, %v685_v9  ;;  %vm748_vm7 = vcmp.lt.s32.totalorder %v716_v61, 450  ;;  %v841_v8 = vmul.f32 %v1088_v3, %v646_v53 }
 0x15a   : > { %v719_v57 = vadd.s32 %v1566_v0, %v686_v10  ;;  %v1090_v30 = vsel %vm747_vm6, 1.0, %v1231_v58  ;;  %vm749_vm8 = vcmp.lt.s32.totalorder %v717_v4, 450  ;;  %v842_v34 = vmul.f32 %v1089_v63, %v647_v22 }
 0x15b   : > { %v871_v52 = vmul.f32 %v839_v5, %v839_v5  ;;  %v872_v14 = vmul.f32 %v840_v6, %v840_v6  ;;  %v720_v53 = vadd.s32 %v1566_v0, %v687_v11  ;;  %v1091_v61 = vsel %vm748_vm7, 1.0, %v1231_v58 }
 0x15c   : > { %vm750_vm9 = vcmp.lt.s32.totalorder %v718_v62, 450  ;;  %v843_v10 = vmul.f32 %v1090_v30, %v648_v54  ;;  %v873_v19 = vmul.f32 %v841_v8, %v841_v8  ;;  %v721_v63 = vadd.s32 %v1566_v0, %v688_v12 }
 0x15d   : > { %vm751_vm10 = vcmp.lt.s32.totalorder %v719_v57, 450  ;;  %v1092_v4 = vsel %vm749_vm8, 1.0, %v1231_v58  ;;  %v844_v1 = vmul.f32 %v1091_v61, %v649_v55  ;;  %v874_v9 = vmul.f32 %v842_v34, %v842_v34 }
 0x15e   : > { %v905_v15 = vadd.f32 %v840_v6, %v839_v5  ;;  %v906_v11 = vadd.f32 %v872_v14, %v871_v52  ;;  %v669_v7 = vsub.f32 %v1433_v43, %v1569_v2  ;;  %v722_v62 = vadd.s32 %v1566_v0, %v1583_v13 }
 0x15f   : > { %vm752_vm11 = vcmp.lt.s32.totalorder %v720_v53, 450  ;;  %v1093_v54 = vsel %vm750_vm9, 1.0, %v1231_v58  ;;  %v845_v30 = vmul.f32 %v1092_v4, %v650_v56  ;;  %v875_v22 = vmul.f32 %v843_v10, %v843_v10 }
 0x160   : > { %v907_v3 = vadd.f32 %v905_v15, %v841_v8  ;;  %v908_v12 = vadd.f32 %v906_v11, %v873_v19  ;;  %v670_v59 = vsub.f32 %v1403_v37, %v1569_v2  ;;  %v723_v55 = vadd.s32 %v1566_v0, %v1589_v16 }
 0x161   : > { %vm753_vm12 = vcmp.lt.s32.totalorder %v721_v63, 450  ;;  %v1094_v5 = vsel %vm751_vm10, 1.0, %v1231_v58  ;;  %v846_v13 = vmul.f32 %v1093_v54, %v651_v26  ;;  %v876_v6 = vmul.f32 %v844_v1, %v844_v1 }
 0x162   : > { %v909_v14 = vadd.f32 %v907_v3, %v842_v34  ;;  %v910_v56 = vadd.f32 %v908_v12, %v874_v9  ;;  %v693_v52 = vadd.s32 120, %v1558_v60  ;;  %v724_v8 = vadd.s32 %v1566_v0, %v1592_v17 }
 0x163   : > { %vm754_vm13 = vcmp.lt.s32.totalorder %v722_v62, 450  ;;  %v1095_v16 = vsel %vm752_vm11, 1.0, %v1231_v58  ;;  %v847_v15 = vmul.f32 %v1094_v5, %v652_v20  ;;  %v877_v19 = vmul.f32 %v845_v30, %v845_v30 }
 0x164   : > { %v911_v57 = vadd.f32 %v909_v14, %v843_v10  ;;  %v912_v32 = vadd.f32 %v910_v56, %v875_v22  ;;  %v694_v26 = vadd.s32 128, %v1558_v60  ;;  %v725_v34 = vadd.s32 %v1566_v0, %v1595_v18 }
 0x165   : > { %vm755_vm14 = vcmp.lt.s32.totalorder %v723_v55, 450  ;;  %v1096_v17 = vsel %vm753_vm12, 1.0, %v1231_v58  ;;  %v848_v9 = vmul.f32 %v1095_v16, %v653_v24  ;;  %v878_v53 = vmul.f32 %v846_v13, %v846_v13 }
 0x166   : > { %v913_v61 = vadd.f32 %v911_v57, %v844_v1  ;;  %v914_v38 = vadd.f32 %v912_v32, %v876_v6  ;;  %v695_v20 = vadd.s32 136, %v1558_v60  ;;  %v726_v3 = vadd.s32 %v1566_v0, %v693_v52 }
 0x167   : > { %vm756_vm15 = vcmp.lt.s32.totalorder %v724_v8, 450  ;;  %v1097_v10 = vsel %vm754_vm13, 1.0, %v1231_v58  ;;  %v849_v18 = vmul.f32 %v1096_v17, %v654_v28  ;;  %v879_v22 = vmul.f32 %v847_v15, %v847_v15 }
 0x168   : > { %v915_v63 = vadd.f32 %v913_v61, %v845_v30  ;;  %v916_v4 = vadd.f32 %v914_v38, %v877_v19  ;;  %v696_v42 = vadd.s32 144, %v1558_v60  ;;  %v727_v24 = vadd.s32 %v1566_v0, %v694_v26 }
 0x169   : > { %vm757_vm0 = vcmp.lt.s32.totalorder %v725_v34, 450  ;;  %v1098_v1 = vsel %vm755_vm14, 1.0, %v1231_v58  ;;  %v1843_v11 = vsub.f32 %v1421_v40, %v1569_v2  ;;  %v880_v54 = vmul.f32 %v848_v9, %v848_v9 }
 0x16a   : > { %v917_v12 = vadd.f32 %v915_v63, %v846_v13  ;;  %v918_v5 = vadd.f32 %v916_v4, %v878_v53  ;;  %v697_v36 = vadd.s32 152, %v1558_v60  ;;  %v728_v28 = vadd.s32 %v1566_v0, %v695_v20 }
 0x16b   : > { %v850_v62 = vmul.f32 %v1097_v10, %v1843_v11  ;;  %vm758_vm2 = vcmp.lt.s32.totalorder %v726_v3, 450  ;;  %v1099_v30 = vsel %vm756_vm15, 1.0, %v1231_v58  ;;  %v1844_v6 = vsub.f32 %v1451_v46, %v1569_v2 }
 0x16c   : > { %v881_v14 = vmul.f32 %v849_v18, %v849_v18  ;;  %v919_v56 = vadd.f32 %v917_v12, %v847_v15  ;;  %v920_v52 = vadd.f32 %v918_v5, %v879_v22  ;;  %v698_v40 = vadd.s32 160, %v1558_v60 }
 0x16d   : > { %v851_v55 = vmul.f32 %v1098_v1, %v1844_v6  ;;  %v729_v13 = vadd.s32 %v1566_v0, %v696_v42  ;;  %vm759_vm3 = vcmp.lt.s32.totalorder %v727_v24, 450  ;;  %v1100_v16 = vsel %vm757_vm0, 1.0, %v1231_v58 }
 0x16e   : > { %v1845_v19 = vsub.f32 %v1471_v50, %v1569_v2  ;;  %v882_v57 = vmul.f32 %v850_v62, %v850_v62  ;;  %v921_v32 = vadd.f32 %v919_v56, %v848_v9  ;;  %v922_v26 = vadd.f32 %v920_v52, %v880_v54 }
 0x16f   : > { %v699_v46 = vadd.s32 168, %v1558_v60  ;;  %v730_v15 = vadd.s32 %v1566_v0, %v697_v36  ;;  %vm760_vm4 = vcmp.lt.s32.totalorder %v728_v28, 450  ;;  %v1101_v17 = vsel %vm758_vm2, 1.0, %v1231_v58 }
 0x170   : > { %v852_v8 = vmul.f32 %v1099_v30, %v1845_v19  ;;  %v1846_v53 = vsub.f32 %v1441_v44, %v1569_v2  ;;  %v883_v61 = vmul.f32 %v851_v55, %v851_v55  ;;  %v923_v38 = vadd.f32 %v921_v32, %v849_v18 }
 0x171   : > { %v924_v20 = vadd.f32 %v922_v26, %v881_v14  ;;  %v700_v50 = vadd.s32 176, %v1558_v60  ;;  %v731_v9 = vadd.s32 %v1566_v0, %v698_v40  ;;  %vm761_vm5 = vcmp.lt.s32.totalorder %v729_v13, 450 }
 0x172   : > { %v853_v34 = vmul.f32 %v1100_v16, %v1846_v53  ;;  %v1102_v10 = vsel %vm759_vm3, 1.0, %v1231_v58  ;;  %v1847_v22 = vsub.f32 %v1461_v48, %v1569_v2  ;;  %v884_v63 = vmul.f32 %v852_v8, %v852_v8 }
 0x173   : > { %v925_v4 = vadd.f32 %v923_v38, %v850_v62  ;;  %v926_v42 = vadd.f32 %v924_v20, %v882_v57  ;;  %v701_v44 = vadd.s32 184, %v1558_v60  ;;  %v732_v18 = vadd.s32 %v1566_v0, %v699_v46 }
 0x174   : > { %v854_v3 = vmul.f32 %v1101_v17, %v1847_v22  ;;  %vm762_vm6 = vcmp.lt.s32.totalorder %v730_v15, 450  ;;  %v1103_v1 = vsel %vm760_vm4, 1.0, %v1231_v58  ;;  %v1848_v11 = vsub.f32 %v1333_v23, %v1569_v2 }
 0x175   : > { %v885_v54 = vmul.f32 %v853_v34, %v853_v34  ;;  %v927_v12 = vadd.f32 %v925_v4, %v851_v55  ;;  %v928_v5 = vadd.f32 %v926_v42, %v883_v61  ;;  %v702_v48 = vadd.s32 192, %v1558_v60 }
 0x176   : > { %v855_v24 = vmul.f32 %v1102_v10, %v1848_v11  ;;  %v733_v62 = vadd.s32 %v1566_v0, %v700_v50  ;;  %vm763_vm7 = vcmp.lt.s32.totalorder %v731_v9, 450  ;;  %v1104_v36 = vsel %vm761_vm5, 1.0, %v1231_v58 }
 0x177   : > { %v1849_v30 = vsub.f32 %v1353_v27, %v1569_v2  ;;  %v886_v6 = vmul.f32 %v854_v3, %v854_v3  ;;  %v929_v14 = vadd.f32 %v927_v12, %v852_v8  ;;  %v930_v56 = vadd.f32 %v928_v5, %v884_v63 }
 0x178   : > { %v703_v23 = vadd.s32 200, %v1558_v60  ;;  %v734_v55 = vadd.s32 %v1566_v0, %v701_v44  ;;  %vm764_vm8 = vcmp.lt.s32.totalorder %v732_v18, 450  ;;  %v1105_v52 = vsel %vm762_vm6, 1.0, %v1231_v58 }
 0x179   : > { %v856_v28 = vmul.f32 %v1103_v1, %v1849_v30  ;;  %v1850_v40 = vsub.f32 %v1323_v21, %v1569_v2  ;;  %v887_v16 = vmul.f32 %v855_v24, %v855_v24  ;;  %v931_v19 = vadd.f32 %v929_v14, %v853_v34 }
 0x17a   : > { %v932_v57 = vadd.f32 %v930_v56, %v885_v54  ;;  %v704_v27 = vadd.s32 208, %v1558_v60  ;;  %v735_v8 = vadd.s32 %v1566_v0, %v702_v48  ;;  %vm765_vm9 = vcmp.lt.s32.totalorder %v733_v62, 450 }
 0x17b   : > { %v857_v13 = vmul.f32 %v1104_v36, %v1850_v40  ;;  %v1106_v32 = vsel %vm763_vm7, 1.0, %v1231_v58  ;;  %v1851_v26 = vsub.f32 %v1343_v25, %v1569_v2  ;;  %v888_v15 = vmul.f32 %v856_v28, %v856_v28 }
 0x17c   : > { %v933_v17 = vadd.f32 %v931_v19, %v854_v3  ;;  %v934_v53 = vadd.f32 %v932_v57, %v886_v6  ;;  %v705_v21 = vadd.s32 216, %v1558_v60  ;;  %v736_v34 = vadd.s32 %v1566_v0, %v703_v23 }
 0x17d   : > { %v858_v46 = vmul.f32 %v1105_v52, %v1851_v26  ;;  %vm766_vm10 = vcmp.lt.s32.totalorder %v734_v55, 450  ;;  %v1107_v61 = vsel %vm764_vm8, 1.0, %v1231_v58  ;;  %v1852_v38 = vsub.f32 %v1373_v31, %v1569_v2 }
 0x17e   : > { %v889_v50 = vmul.f32 %v857_v13, %v857_v13  ;;  %v935_v9 = vadd.f32 %v933_v17, %v855_v24  ;;  %v936_v10 = vadd.f32 %v934_v53, %v887_v16  ;;  %v706_v25 = vadd.s32 224, %v1558_v60 }
 0x17f   : > { %v859_v20 = vmul.f32 %v1106_v32, %v1852_v38  ;;  %v737_v22 = vadd.s32 %v1566_v0, %v704_v27  ;;  %vm767_vm11 = vcmp.lt.s32.totalorder %v735_v8, 450  ;;  %v1108_v3 = vsel %vm765_vm9, 1.0, %v1231_v58 }
 0x180   : > { %v1853_v63 = vsub.f32 %v1393_v35, %v1569_v2  ;;  %v890_v42 = vmul.f32 %v858_v46, %v858_v46  ;;  %v937_v44 = vadd.f32 %v935_v9, %v856_v28  ;;  %v938_v18 = vadd.f32 %v936_v10, %v888_v15 }
 0x181   : > { %v707_v31 = vadd.s32 232, %v1558_v60  ;;  %v738_v1 = vadd.s32 %v1566_v0, %v705_v21  ;;  %vm768_vm12 = vcmp.lt.s32.totalorder %v736_v34, 450  ;;  %v1109_v11 = vsel %vm766_vm10, 1.0, %v1231_v58 }
 0x182   : > { %v860_v4 = vmul.f32 %v1107_v61, %v1853_v63  ;;  %v1854_v24 = vsub.f32 %v1363_v29, %v1569_v2  ;;  %v891_v12 = vmul.f32 %v859_v20, %v859_v20  ;;  %v939_v5 = vadd.f32 %v937_v44, %v857_v13 }
 0x183   : > { %v940_v48 = vadd.f32 %v938_v18, %v889_v50  ;;  %v708_v35 = vadd.s32 240, %v1558_v60  ;;  %v739_v62 = vadd.s32 %v1566_v0, %v706_v25  ;;  %vm769_vm13 = vcmp.lt.s32.totalorder %v737_v22, 450 }
 0x184   : > { %v861_v54 = vmul.f32 %v1108_v3, %v1854_v24  ;;  %v1110_v36 = vsel %vm767_vm11, 1.0, %v1231_v58  ;;  %v1855_v30 = vsub.f32 %v1383_v33, %v1569_v2  ;;  %v892_v6 = vmul.f32 %v860_v4, %v860_v4 }
 0x185   : > { %v941_v14 = vadd.f32 %v939_v5, %v858_v46  ;;  %v942_v56 = vadd.f32 %v940_v48, %v890_v42  ;;  %v709_v29 = vadd.s32 248, %v1558_v60  ;;  %v740_v23 = vadd.s32 %v1566_v0, %v707_v31 }
 0x186   : > { %v862_v28 = vmul.f32 %v1109_v11, %v1855_v30  ;;  %vm770_vm14 = vcmp.lt.s32.totalorder %v738_v1, 450  ;;  %v1111_v55 = vsel %vm768_vm12, 1.0, %v1231_v58  ;;  %v1856_v52 = vsub.f32 %v1413_v39, %v1569_v2 }
 0x187   : > { %v893_v13 = vmul.f32 %v861_v54, %v861_v54  ;;  %v943_v16 = vadd.f32 %v941_v14, %v859_v20  ;;  %v944_v19 = vadd.f32 %v942_v56, %v891_v12  ;;  %v671_v33 = vsub.f32 %v1423_v41, %v1569_v2 }
 0x188   : > { %v863_v40 = vmul.f32 %v1110_v36, %v1856_v52  ;;  %v741_v57 = vadd.s32 %v1566_v0, %v708_v35  ;;  %vm771_vm15 = vcmp.lt.s32.totalorder %v739_v62, 450  ;;  %v1112_v60 = vsel %vm769_vm13, 1.0, %v1231_v58  ;;  %v1120_v36 = vld [vmem:[%s1842_s3 + $0x10] sm:$0xff] }
 0x189   : > { %v864_v27 = vmul.f32 %v1111_v55, %v669_v7  ;;  %v894_v8 = vmul.f32 %v862_v28, %v862_v28  ;;  %v945_v32 = vadd.f32 %v943_v16, %v860_v4  ;;  %v946_v39 = vadd.f32 %v944_v19, %v892_v6 }
 0x18a   : > { %v672_v26 = vsub.f32 %v1453_v47, %v1569_v2  ;;  %v742_v46 = vadd.s32 %v1566_v0, %v709_v29  ;;  %vm772_vm0 = vcmp.lt.s32.totalorder %v740_v23, 450  ;;  %v1113_v41 = vsel %vm770_vm14, 1.0, %v1231_v58 }
 0x18b   : > { %v865_v15 = vmul.f32 %v1112_v60, %v670_v59  ;;  %v895_v17 = vmul.f32 %v863_v40, %v863_v40  ;;  %v947_v53 = vadd.f32 %v945_v32, %v861_v54  ;;  %v948_v43 = vadd.f32 %v946_v39, %v893_v13 }
 0x18c   : > { %v673_v7 = vsub.f32 %v1473_v51, %v1569_v2  ;;  %vm773_vm2 = vcmp.lt.s32.totalorder %v741_v57, 450  ;;  %v1114_v47 = vsel %vm771_vm15, 1.0, %v1231_v58  ;;  %v866_v21 = vmul.f32 %v1113_v41, %v671_v33 }
 0x18d   : > { %v896_v0 = vmul.f32 %v864_v27, %v864_v27  ;;  %v949_v34 = vadd.f32 %v947_v53, %v862_v28  ;;  %v950_v61 = vadd.f32 %v948_v43, %v894_v8  ;;  %v674_v38 = vsub.f32 %v1443_v45, %v1569_v2 }
 0x18e   : > { %vm774_vm3 = vcmp.lt.s32.totalorder %v742_v46, 450  ;;  %v1115_v37 = vsel %vm772_vm0, 1.0, %v1231_v58  ;;  %v867_v59 = vmul.f32 %v1114_v47, %v672_v26  ;;  %v897_v20 = vmul.f32 %v865_v15, %v865_v15 }
 0x18f   : > { %v951_v50 = vadd.f32 %v949_v34, %v863_v40  ;;  %v952_v9 = vadd.f32 %v950_v61, %v895_v17  ;;  %v675_v51 = vsub.f32 %v1463_v49, %v1569_v2  ;;  %v1116_v10 = vsel %vm773_vm2, 1.0, %v1231_v58 }
 0x190   : > { %v868_v25 = vmul.f32 %v1115_v37, %v673_v7  ;;  %v898_v22 = vmul.f32 %v866_v21, %v866_v21  ;;  %v1117_v4 = vsel %vm774_vm3, 1.0, %v1231_v58  ;;  %v869_v42 = vmul.f32 %v1116_v10, %v674_v38  ;;  %v1118_v58 = vld [vmem:[%s1842_s3 + $0x8] sm:$0xff] }
 0x191   : > { %v953_v3 = vadd.f32 %v951_v50, %v864_v27  ;;  %v954_v63 = vadd.f32 %v952_v9, %v896_v0  ;;  %v899_v45 = vmul.f32 %v867_v59, %v867_v59  ;;  %v870_v31 = vmul.f32 %v1117_v4, %v675_v51 }
 0x192   : > { %v900_v1 = vmul.f32 %v868_v25, %v868_v25  ;;  %v901_v54 = vmul.f32 %v869_v42, %v869_v42 }
 0x193   : > { %v955_v44 = vadd.f32 %v953_v3, %v865_v15  ;;  %v956_v18 = vadd.f32 %v954_v63, %v897_v20  ;;  %v902_v49 = vmul.f32 %v870_v31, %v870_v31 }
 0x195   : > { %v957_v11 = vadd.f32 %v955_v44, %v866_v21  ;;  %v958_v24 = vadd.f32 %v956_v18, %v898_v22 }
 0x197   : > { %v959_v12 = vadd.f32 %v957_v11, %v867_v59  ;;  %v960_v5 = vadd.f32 %v958_v24, %v899_v45 }
 0x199   : > { %v961_v2 = vadd.f32 %v959_v12, %v868_v25  ;;  %v962_v48 = vadd.f32 %v960_v5, %v900_v1 }
 0x19b   : > { %v963_v35 = vadd.f32 %v961_v2, %v869_v42  ;;  %v964_v62 = vadd.f32 %v962_v48, %v901_v54 }
 0x19d   : > { %v965_v30 = vadd.f32 %v963_v35, %v870_v31  ;;  %v966_v28 = vadd.f32 %v964_v62, %v902_v49 }
 0x19f   : > { %v969_v6 = vadd.f32 %v1118_v58, %v965_v30  ;;  %v973_v14 = vadd.f32 %v1120_v36, %v966_v28 }
 0x1a1   : > { %1119 = vst.msk [vmem:[%s1842_s3 + $0x8] sm:$0xff] %vm527_vm1, %v969_v6  ;;  %1121 = vst.msk [vmem:[%s1842_s3 + $0x10] sm:$0xff] %vm527_vm1, %v973_v14 }
 0x1a2 PF: > { %s14_s12 = sadd.s32 1, %s1228_s12  }
 0x1a3   : > { %p11_p5 = scmp.ge.s32.totalorder %s14_s12, 4  }
 0x1a5   :  { %13 = sbr.rel (!%p11_p5) target bundleno = 1 (0x1), region = 74 }

// kernel: bottleneck_forward.13
= control target key start
LH: loop header
LB: loop body
LE: loop exit
PB: predicated region body
PF: predicated region fallthrough
CT: control target
= control target key end

     0   :  { %s422_s12 = smov 0   ;;  %s613_s0 = inlined_call_operand.vmem [shape: f32[512,16], index: 0, kind: input, shape index: {}]   ;;  %s614_s1 = inlined_call_operand.vmem [shape: f32[1,16], index: 1, kind: input, shape index: {}]   ;;  %s615_s2 = inlined_call_operand.vmem [shape: f32[1,16], index: 2, kind: input, shape index: {}]   ;;  %s616_s3 = inlined_call_operand.vmem [shape: f32[512,16], index: 3, kind: output, shape index: {}]  }
   0x1 LB: > { %s373_s13 = sadd.s32 4294967295, %s400_s12   ;;  %p377_p0 = scmp.ge.s32.totalorder %s400_s12, 1  ;;  %s400_s12 = sphi %s422_s12, %s13_s12  }
   0x2   : > { %p138_p1 = scmp.lt.s32.totalorder %s400_s12, 3 }
   0x4   : > { %p139_p2 = pnand %p377_p0, %p138_p1 }
   0x5   : > { %s378_s14 = sshll.u32 (!%p139_p2), %s373_s13, 5 }
   0x6   : > { %142 = sbr.rel (%p139_p2) target bundleno = 38 (0x26), region = 32  ;;  %p163_p3 = scmp.lt.s32.totalorder (!%p139_p2), %s378_s14, 63 }
   0xb   : > { %s618_s14 = smov (!%p163_p3, %s378_s14), 63  ;;  %v433_v0 = vld [vmem:[%s614_s1] ss:$0 sm:$0xff]  ;;  %vm284_vm0 = vcmask 130048  }
   0xc   : > { %s379_s15 = sshll.u32 %s618_s14, 3  ;;  %v443_v1 = vld [vmem:[%s615_s2] ss:$0 sm:$0xff] }
   0xd   : > { %s438_s20 = scalar_lea.vmem %s613_s0, %s379_s15  ;;  %s457_s25 = scalar_lea.vmem %s616_s3, %s379_s15 }
   0xe   : > { %v174_v2 = vld [vmem:[%s438_s20] sm:$0xff]  ;;  %v175_v3 = vld [vmem:[%s438_s20 + $0x8] sm:$0xff]  ;;  %v176_v4 = vld [vmem:[%s438_s20 + $0x10] sm:$0xff] }
   0xf   : > { %v213_v5 = vmul.f32 %v433_v0, %v174_v2  ;;  %v214_v6 = vmul.f32 %v433_v0, %v175_v3  ;;  %v215_v7 = vmul.f32 %v433_v0, %v176_v4  ;;  %v177_v8 = vld [vmem:[%s438_s20 + $0x18] sm:$0xff]  ;;  %v178_v9 = vld [vmem:[%s438_s20 + $0x20] sm:$0xff]  ;;  %v179_v10 = vld [vmem:[%s438_s20 + $0x28] sm:$0xff] }
  0x10   : > { %v216_v11 = vmul.f32 %v433_v0, %v177_v8  ;;  %v217_v12 = vmul.f32 %v433_v0, %v178_v9  ;;  %v218_v13 = vmul.f32 %v433_v0, %v179_v10  ;;  %v180_v14 = vld [vmem:[%s438_s20 + $0x30] sm:$0xff]  ;;  %v181_v15 = vld [vmem:[%s438_s20 + $0x38] sm:$0xff]  ;;  %v182_v16 = vld [vmem:[%s438_s20 + $0x40] sm:$0xff] }
  0x11   : > { %v252_v17 = vadd.f32 %v443_v1, %v213_v5  ;;  %v253_v18 = vadd.f32 %v443_v1, %v214_v6  ;;  %v254_v19 = vadd.f32 %v443_v1, %v215_v7  ;;  %v219_v20 = vmul.f32 %v433_v0, %v180_v14  ;;  %v183_v21 = vld [vmem:[%s438_s20 + $0x48] sm:$0xff]  ;;  %v184_v22 = vld [vmem:[%s438_s20 + $0x50] sm:$0xff]  ;;  %v185_v23 = vld [vmem:[%s438_s20 + $0x58] sm:$0xff] }
  0x12   : > { %v255_v24 = vadd.f32 %v443_v1, %v216_v11  ;;  %v256_v25 = vadd.f32 %v443_v1, %v217_v12  ;;  %v257_v26 = vadd.f32 %v443_v1, %v218_v13  ;;  %v220_v27 = vmul.f32 %v433_v0, %v181_v15  ;;  %v186_v28 = vld [vmem:[%s438_s20 + $0x60] sm:$0xff]  ;;  %v187_v29 = vld [vmem:[%s438_s20 + $0x68] sm:$0xff]  ;;  %v188_v30 = vld [vmem:[%s438_s20 + $0x70] sm:$0xff] }
  0x13   : > { %285 = vst.msk [vmem:[%s457_s25] sm:$0xff] %vm284_vm0, %v252_v17  ;;  %286 = vst.msk [vmem:[%s457_s25 + $0x8] sm:$0xff] %vm284_vm0, %v253_v18  ;;  %v258_v31 = vadd.f32 %v443_v1, %v219_v20  ;;  %v221_v32 = vmul.f32 %v433_v0, %v182_v16  ;;  %v222_v33 = vmul.f32 %v433_v0, %v183_v21  ;;  %v189_v35 = vld [vmem:[%s438_s20 + $0x78] sm:$0xff]  ;;  %v190_v40 = vld [vmem:[%s438_s20 + $0x80] sm:$0xff] }
  0x14   : > { %287 = vst.msk [vmem:[%s457_s25 + $0x10] sm:$0xff] %vm284_vm0, %v254_v19  ;;  %v223_v34 = vmul.f32 %v433_v0, %v184_v22  ;;  %288 = vst.msk [vmem:[%s457_s25 + $0x18] sm:$0xff] %vm284_vm0, %v255_v24  ;;  %v259_v36 = vadd.f32 %v443_v1, %v220_v27  ;;  %v224_v37 = vmul.f32 %v433_v0, %v185_v23  ;;  %v191_v41 = vld [vmem:[%s438_s20 + $0x88] sm:$0xff]  ;;  %v192_v42 = vld [vmem:[%s438_s20 + $0x90] sm:$0xff] }
  0x15   : > { %289 = vst.msk [vmem:[%s457_s25 + $0x20] sm:$0xff] %vm284_vm0, %v256_v25  ;;  %290 = vst.msk [vmem:[%s457_s25 + $0x28] sm:$0xff] %vm284_vm0, %v257_v26  ;;  %v225_v38 = vmul.f32 %v433_v0, %v186_v28  ;;  %v226_v39 = vmul.f32 %v433_v0, %v187_v29  ;;  %v260_v43 = vadd.f32 %v443_v1, %v221_v32  ;;  %v193_v47 = vld [vmem:[%s438_s20 + $0x98] sm:$0xff]  ;;  %v194_v48 = vld [vmem:[%s438_s20 + $0xa0] sm:$0xff] }
  0x16   : > { %291 = vst.msk [vmem:[%s457_s25 + $0x30] sm:$0xff] %vm284_vm0, %v258_v31  ;;  %v261_v44 = vadd.f32 %v443_v1, %v222_v33  ;;  %v262_v45 = vadd.f32 %v443_v1, %v223_v34  ;;  %v227_v46 = vmul.f32 %v433_v0, %v188_v30  ;;  %v195_v49 = vld [vmem:[%s438_s20 + $0xa8] sm:$0xff]  ;;  %292 = vst.msk [vmem:[%s457_s25 + $0x38] sm:$0xff] %vm284_vm0, %v259_v36  ;;  %v196_v54 = vld [vmem:[%s438_s20 + $0xb0] sm:$0xff] }
  0x17   : > { %v263_v50 = vadd.f32 %v443_v1, %v224_v37  ;;  %v264_v51 = vadd.f32 %v443_v1, %v225_v38  ;;  %v265_v52 = vadd.f32 %v443_v1, %v226_v39  ;;  %v228_v53 = vmul.f32 %v433_v0, %v189_v35  ;;  %293 = vst.msk [vmem:[%s457_s25 + $0x40] sm:$0xff] %vm284_vm0, %v260_v43  ;;  %v197_v59 = vld [vmem:[%s438_s20 + $0xb8] sm:$0xff]  ;;  %v198_v2 = vld [vmem:[%s438_s20 + $0xc0] sm:$0xff]  ;;  %v199_v3 = vld [vmem:[%s438_s20 + $0xc8] sm:$0xff] }
  0x18   : > { %294 = vst.msk [vmem:[%s457_s25 + $0x48] sm:$0xff] %vm284_vm0, %v261_v44  ;;  %295 = vst.msk [vmem:[%s457_s25 + $0x50] sm:$0xff] %vm284_vm0, %v262_v45  ;;  %v266_v55 = vadd.f32 %v443_v1, %v227_v46  ;;  %v229_v56 = vmul.f32 %v433_v0, %v190_v40  ;;  %v230_v57 = vmul.f32 %v433_v0, %v191_v41  ;;  %v200_v4 = vld [vmem:[%s438_s20 + $0xd0] sm:$0xff]  ;;  %v201_v9 = vld [vmem:[%s438_s20 + $0xd8] sm:$0xff] }
  0x19   : > { %v231_v58 = vmul.f32 %v433_v0, %v192_v42  ;;  %296 = vst.msk [vmem:[%s457_s25 + $0x58] sm:$0xff] %vm284_vm0, %v263_v50  ;;  %297 = vst.msk [vmem:[%s457_s25 + $0x60] sm:$0xff] %vm284_vm0, %v264_v51  ;;  %v267_v60 = vadd.f32 %v443_v1, %v228_v53  ;;  %v232_v61 = vmul.f32 %v433_v0, %v193_v47  ;;  %v202_v10 = vld [vmem:[%s438_s20 + $0xe0] sm:$0xff]  ;;  %v203_v11 = vld [vmem:[%s438_s20 + $0xe8] sm:$0xff] }
  0x1a   : > { %298 = vst.msk [vmem:[%s457_s25 + $0x68] sm:$0xff] %vm284_vm0, %v265_v52  ;;  %v233_v62 = vmul.f32 %v433_v0, %v194_v48  ;;  %v234_v63 = vmul.f32 %v433_v0, %v195_v49  ;;  %299 = vst.msk [vmem:[%s457_s25 + $0x70] sm:$0xff] %vm284_vm0, %v266_v55  ;;  %v268_v5 = vadd.f32 %v443_v1, %v229_v56  ;;  %v204_v16 = vld [vmem:[%s438_s20 + $0xf0] sm:$0xff]  ;;  %v205_v21 = vld [vmem:[%s438_s20 + $0xf8] sm:$0xff] }
  0x1b   : > { %v269_v6 = vadd.f32 %v443_v1, %v230_v57  ;;  %v270_v7 = vadd.f32 %v443_v1, %v231_v58  ;;  %v235_v8 = vmul.f32 %v433_v0, %v196_v54  ;;  %300 = vst.msk [vmem:[%s457_s25 + $0x78] sm:$0xff] %vm284_vm0, %v267_v60  ;;  %v271_v12 = vadd.f32 %v443_v1, %v232_v61 }
  0x1c   : > { %v272_v13 = vadd.f32 %v443_v1, %v233_v62  ;;  %v273_v14 = vadd.f32 %v443_v1, %v234_v63  ;;  %v236_v15 = vmul.f32 %v433_v0, %v197_v59  ;;  %301 = vst.msk [vmem:[%s457_s25 + $0x80] sm:$0xff] %vm284_vm0, %v268_v5  ;;  %v237_v18 = vmul.f32 %v433_v0, %v198_v2 }
  0x1d   : > { %302 = vst.msk [vmem:[%s457_s25 + $0x88] sm:$0xff] %vm284_vm0, %v269_v6  ;;  %303 = vst.msk [vmem:[%s457_s25 + $0x90] sm:$0xff] %vm284_vm0, %v270_v7  ;;  %v274_v17 = vadd.f32 %v443_v1, %v235_v8  ;;  %v238_v19 = vmul.f32 %v433_v0, %v199_v3  ;;  %v239_v20 = vmul.f32 %v433_v0, %v200_v4 }
  0x1e   : > { %304 = vst.msk [vmem:[%s457_s25 + $0x98] sm:$0xff] %vm284_vm0, %v271_v12  ;;  %305 = vst.msk [vmem:[%s457_s25 + $0xa0] sm:$0xff] %vm284_vm0, %v272_v13  ;;  %v275_v22 = vadd.f32 %v443_v1, %v236_v15  ;;  %v240_v23 = vmul.f32 %v433_v0, %v201_v9  ;;  %v241_v24 = vmul.f32 %v433_v0, %v202_v10 }
  0x1f   : > { %306 = vst.msk [vmem:[%s457_s25 + $0xa8] sm:$0xff] %vm284_vm0, %v273_v14  ;;  %v242_v25 = vmul.f32 %v433_v0, %v203_v11  ;;  %307 = vst.msk [vmem:[%s457_s25 + $0xb0] sm:$0xff] %vm284_vm0, %v274_v17  ;;  %v276_v26 = vadd.f32 %v443_v1, %v237_v18  ;;  %v277_v27 = vadd.f32 %v443_v1, %v238_v19 }
  0x20   : > { %v278_v28 = vadd.f32 %v443_v1, %v239_v20  ;;  %v243_v29 = vmul.f32 %v433_v0, %v204_v16  ;;  %308 = vst.msk [vmem:[%s457_s25 + $0xb8] sm:$0xff] %vm284_vm0, %v275_v22  ;;  %v279_v30 = vadd.f32 %v443_v1, %v240_v23  ;;  %v280_v31 = vadd.f32 %v443_v1, %v241_v24 }
  0x21   : > { %v281_v32 = vadd.f32 %v443_v1, %v242_v25  ;;  %v244_v33 = vmul.f32 %v433_v0, %v205_v21  ;;  %309 = vst.msk [vmem:[%s457_s25 + $0xc0] sm:$0xff] %vm284_vm0, %v276_v26  ;;  %310 = vst.msk [vmem:[%s457_s25 + $0xc8] sm:$0xff] %vm284_vm0, %v277_v27 }
  0x22   : > { %311 = vst.msk [vmem:[%s457_s25 + $0xd0] sm:$0xff] %vm284_vm0, %v278_v28  ;;  %v282_v34 = vadd.f32 %v443_v1, %v243_v29  ;;  %312 = vst.msk [vmem:[%s457_s25 + $0xd8] sm:$0xff] %vm284_vm0, %v279_v30 }
  0x23   : > { %313 = vst.msk [vmem:[%s457_s25 + $0xe0] sm:$0xff] %vm284_vm0, %v280_v31  ;;  %314 = vst.msk [vmem:[%s457_s25 + $0xe8] sm:$0xff] %vm284_vm0, %v281_v32  ;;  %v283_v35 = vadd.f32 %v443_v1, %v244_v33 }
  0x24   : > { %315 = vst.msk [vmem:[%s457_s25 + $0xf0] sm:$0xff] %vm284_vm0, %v282_v34 }
  0x25   : > { %316 = vst.msk [vmem:[%s457_s25 + $0xf8] sm:$0xff] %vm284_vm0, %v283_v35 }
  0x26 PF: > { %s13_s12 = sadd.s32 1, %s400_s12  }
  0x27   : > { %p10_p4 = scmp.ge.s32.totalorder %s13_s12, 4  }
  0x29   :  { %12 = sbr.rel (!%p10_p4) target bundleno = 1 (0x1), region = 62 }

// kernel: bottleneck_forward.15
= control target key start
LH: loop header
LB: loop body
LE: loop exit
PB: predicated region body
PF: predicated region fallthrough
CT: control target
= control target key end

     0   :  { %s586_s15 = smov 0   ;;  %s819_s0 = inlined_call_operand.vmem [shape: f32[512,16], index: 0, kind: input, shape index: {}]   ;;  %s820_s1 = inlined_call_operand.vmem [shape: f32[1,16], index: 1, kind: input, shape index: {}]   ;;  %s821_s2 = inlined_call_operand.vmem [shape: f32[1,16], index: 2, kind: input, shape index: {}]   ;;  %s822_s3 = inlined_call_operand.vmem [shape: f32[512,16], index: 3, kind: input, shape index: {}]   ;;  %s823_s4 = inlined_call_operand.vmem [shape: f32[512,16], index: 4, kind: output, shape index: {}]  }
   0x1 LB: > { %s530_s16 = sadd.s32 4294967295, %s559_s15   ;;  %p534_p0 = scmp.ge.s32.totalorder %s559_s15, 1  ;;  %s559_s15 = sphi %s586_s15, %s14_s15  }
   0x2   : > { %p174_p1 = scmp.lt.s32.totalorder %s559_s15, 3 }
   0x4   : > { %p175_p2 = pnand %p534_p0, %p174_p1 }
   0x5   : > { %s535_s17 = sshll.u32 (!%p175_p2), %s530_s16, 5 }
   0x6   : > { %178 = sbr.rel (%p175_p2) target bundleno = 53 (0x35), region = 36  ;;  %p206_p3 = scmp.lt.s32.totalorder (!%p175_p2), %s535_s17, 63 }
   0xb   : > { %s825_s17 = smov (!%p206_p3, %s535_s17), 63  ;;  %v599_v0 = vld [vmem:[%s820_s1] ss:$0 sm:$0xff]  ;;  %vm429_vm0 = vcmask 130048  }
   0xc   : > { %s594_s18 = sshll.u32 %s825_s17, 3  ;;  %v617_v2 = vld [vmem:[%s821_s2] ss:$0 sm:$0xff] }
   0xd   : > { %s605_s23 = scalar_lea.vmem %s819_s0, %s594_s18  ;;  %s611_s26 = scalar_lea.vmem %s822_s3, %s594_s18 }
   0xe   : > { %v223_v1 = vld [vmem:[%s605_s23] sm:$0xff]  ;;  %v224_v3 = vld [vmem:[%s605_s23 + $0x8] sm:$0xff]  ;;  %v225_v7 = vld [vmem:[%s605_s23 + $0x10] sm:$0xff]  ;;  %s647_s5 = scalar_lea.vmem %s823_s4, %s594_s18 }
   0xf   : > { %v262_v4 = vmul.f32 %v599_v0, %v223_v1  ;;  %v333_v5 = vld [vmem:[%s611_s26] sm:$0xff]  ;;  %v263_v6 = vmul.f32 %v599_v0, %v224_v3  ;;  %v334_v8 = vld [vmem:[%s611_s26 + $0x8] sm:$0xff]  ;;  %v264_v9 = vmul.f32 %v599_v0, %v225_v7  ;;  %v226_v10 = vld [vmem:[%s605_s23 + $0x18] sm:$0xff] }
  0x10   : > { %v227_v11 = vld [vmem:[%s605_s23 + $0x20] sm:$0xff]  ;;  %v335_v14 = vld [vmem:[%s611_s26 + $0x10] sm:$0xff]  ;;  %v265_v15 = vmul.f32 %v599_v0, %v226_v10  ;;  %v336_v16 = vld [vmem:[%s611_s26 + $0x18] sm:$0xff] }
  0x11   : > { %v301_v12 = vadd.f32 %v617_v2, %v262_v4  ;;  %v302_v13 = vadd.f32 %v617_v2, %v263_v6  ;;  %v266_v17 = vmul.f32 %v599_v0, %v227_v11  ;;  %v228_v18 = vld [vmem:[%s605_s23 + $0x28] sm:$0xff]  ;;  %v303_v19 = vadd.f32 %v617_v2, %v264_v9  ;;  %v337_v20 = vld [vmem:[%s611_s26 + $0x20] sm:$0xff]  ;;  %v229_v22 = vld [vmem:[%s605_s23 + $0x30] sm:$0xff] }
  0x12   : > { %v267_v21 = vmul.f32 %v599_v0, %v228_v18  ;;  %v230_v23 = vld [vmem:[%s605_s23 + $0x38] sm:$0xff]  ;;  %v304_v26 = vadd.f32 %v617_v2, %v265_v15  ;;  %v338_v28 = vld [vmem:[%s611_s26 + $0x28] sm:$0xff]  ;;  %v268_v31 = vmul.f32 %v599_v0, %v229_v22  ;;  %v231_v33 = vld [vmem:[%s605_s23 + $0x40] sm:$0xff] }
  0x13   : > { %v365_v24 = vadd.f32 %v333_v5, %v301_v12  ;;  %v366_v25 = vadd.f32 %v334_v8, %v302_v13  ;;  %v305_v27 = vadd.f32 %v617_v2, %v266_v17  ;;  %v367_v29 = vadd.f32 %v335_v14, %v303_v19  ;;  %v232_v34 = vld [vmem:[%s605_s23 + $0x48] sm:$0xff]  ;;  %v339_v39 = vld [vmem:[%s611_s26 + $0x30] sm:$0xff]  ;;  %v340_v40 = vld [vmem:[%s611_s26 + $0x38] sm:$0xff] }
  0x14   : > { %v306_v30 = vadd.f32 %v617_v2, %v267_v21  ;;  %v269_v32 = vmul.f32 %v599_v0, %v230_v23  ;;  %v368_v37 = vadd.f32 %v336_v16, %v304_v26  ;;  %v233_v41 = vld [vmem:[%s605_s23 + $0x50] sm:$0xff]  ;;  %v307_v44 = vadd.f32 %v617_v2, %v268_v31  ;;  %v234_v46 = vld [vmem:[%s605_s23 + $0x58] sm:$0xff]  ;;  %v235_v47 = vld [vmem:[%s605_s23 + $0x60] sm:$0xff] }
  0x15   : > { %v397_v35 = vmax.f32 %v365_v24, 0.0  ;;  %v398_v36 = vmax.f32 %v366_v25, 0.0  ;;  %v369_v38 = vadd.f32 %v337_v20, %v305_v27  ;;  %v399_v42 = vmax.f32 %v367_v29, 0.0  ;;  %v236_v52 = vld [vmem:[%s605_s23 + $0x68] sm:$0xff]  ;;  %v341_v56 = vld [vmem:[%s611_s26 + $0x40] sm:$0xff]  ;;  %v343_v61 = vld [vmem:[%s611_s26 + $0x50] sm:$0xff] }
  0x16   : > { %v370_v43 = vadd.f32 %v338_v28, %v306_v30  ;;  %v308_v45 = vadd.f32 %v617_v2, %v269_v32  ;;  %v400_v48 = vmax.f32 %v368_v37, 0.0  ;;  %v270_v50 = vmul.f32 %v599_v0, %v231_v33  ;;  %v342_v57 = vld [vmem:[%s611_s26 + $0x48] sm:$0xff]  ;;  %v237_v1 = vld [vmem:[%s605_s23 + $0x70] sm:$0xff]  ;;  %v238_v3 = vld [vmem:[%s605_s23 + $0x78] sm:$0xff] }
  0x17   : > { %430 = vst.msk [vmem:[%s647_s5] sm:$0xff] %vm429_vm0, %v397_v35  ;;  %431 = vst.msk [vmem:[%s647_s5 + $0x8] sm:$0xff] %vm429_vm0, %v398_v36  ;;  %v401_v49 = vmax.f32 %v369_v38, 0.0  ;;  %v271_v51 = vmul.f32 %v599_v0, %v232_v34  ;;  %v371_v54 = vadd.f32 %v339_v39, %v307_v44  ;;  %v272_v58 = vmul.f32 %v599_v0, %v233_v41  ;;  %v344_v7 = vld [vmem:[%s611_s26 + $0x58] sm:$0xff]  ;;  %v345_v8 = vld [vmem:[%s611_s26 + $0x60] sm:$0xff] }
  0x18   : > { %432 = vst.msk [vmem:[%s647_s5 + $0x10] sm:$0xff] %vm429_vm0, %v399_v42  ;;  %v402_v53 = vmax.f32 %v370_v43, 0.0  ;;  %v372_v55 = vadd.f32 %v340_v40, %v308_v45  ;;  %433 = vst.msk [vmem:[%s647_s5 + $0x18] sm:$0xff] %vm429_vm0, %v400_v48  ;;  %v309_v59 = vadd.f32 %v617_v2, %v270_v50  ;;  %v273_v62 = vmul.f32 %v599_v0, %v234_v46  ;;  %v346_v14 = vld [vmem:[%s611_s26 + $0x68] sm:$0xff]  ;;  %v239_v19 = vld [vmem:[%s605_s23 + $0x80] sm:$0xff] }
  0x19   : > { %434 = vst.msk [vmem:[%s647_s5 + $0x20] sm:$0xff] %vm429_vm0, %v401_v49  ;;  %v310_v60 = vadd.f32 %v617_v2, %v271_v51  ;;  %v274_v63 = vmul.f32 %v599_v0, %v235_v47  ;;  %v403_v4 = vmax.f32 %v371_v54, 0.0  ;;  %v311_v6 = vadd.f32 %v617_v2, %v272_v58  ;;  %v240_v20 = vld [vmem:[%s605_s23 + $0x88] sm:$0xff]  ;;  %v347_v25 = vld [vmem:[%s611_s26 + $0x70] sm:$0xff]  ;;  %v348_v26 = vld [vmem:[%s611_s26 + $0x78] sm:$0xff] }
  0x1a   : > { %435 = vst.msk [vmem:[%s647_s5 + $0x28] sm:$0xff] %vm429_vm0, %v402_v53  ;;  %v404_v5 = vmax.f32 %v372_v55, 0.0  ;;  %v275_v9 = vmul.f32 %v599_v0, %v236_v52  ;;  %v373_v10 = vadd.f32 %v341_v56, %v309_v59  ;;  %v312_v12 = vadd.f32 %v617_v2, %v273_v62  ;;  %v241_v27 = vld [vmem:[%s605_s23 + $0x90] sm:$0xff]  ;;  %v242_v32 = vld [vmem:[%s605_s23 + $0x98] sm:$0xff]  ;;  %v243_v33 = vld [vmem:[%s605_s23 + $0xa0] sm:$0xff] }
  0x1b   : > { %v374_v11 = vadd.f32 %v342_v57, %v310_v60  ;;  %v313_v13 = vadd.f32 %v617_v2, %v274_v63  ;;  %436 = vst.msk [vmem:[%s647_s5 + $0x30] sm:$0xff] %vm429_vm0, %v403_v4  ;;  %v375_v15 = vadd.f32 %v343_v61, %v311_v6  ;;  %v276_v17 = vmul.f32 %v599_v0, %v237_v1  ;;  %v244_v38 = vld [vmem:[%s605_s23 + $0xa8] sm:$0xff]  ;;  %v349_v42 = vld [vmem:[%s611_s26 + $0x80] sm:$0xff]  ;;  %v351_v47 = vld [vmem:[%s611_s26 + $0x90] sm:$0xff] }
  0x1c   : > { %437 = vst.msk [vmem:[%s647_s5 + $0x38] sm:$0xff] %vm429_vm0, %v404_v5  ;;  %v314_v16 = vadd.f32 %v617_v2, %v275_v9  ;;  %v277_v18 = vmul.f32 %v599_v0, %v238_v3  ;;  %v405_v21 = vmax.f32 %v373_v10, 0.0  ;;  %v376_v23 = vadd.f32 %v344_v7, %v312_v12  ;;  %v350_v43 = vld [vmem:[%s611_s26 + $0x88] sm:$0xff]  ;;  %v245_v50 = vld [vmem:[%s605_s23 + $0xb0] sm:$0xff]  ;;  %v246_v51 = vld [vmem:[%s605_s23 + $0xb8] sm:$0xff] }
  0x1d   : > { %v406_v22 = vmax.f32 %v374_v11, 0.0  ;;  %v377_v24 = vadd.f32 %v345_v8, %v313_v13  ;;  %v407_v28 = vmax.f32 %v375_v15, 0.0  ;;  %v315_v30 = vadd.f32 %v617_v2, %v276_v17  ;;  %v352_v55 = vld [vmem:[%s611_s26 + $0x98] sm:$0xff]  ;;  %v353_v56 = vld [vmem:[%s611_s26 + $0xa0] sm:$0xff]  ;;  %v354_v62 = vld [vmem:[%s611_s26 + $0xa8] sm:$0xff] }
  0x1e   : > { %v378_v29 = vadd.f32 %v346_v14, %v314_v16  ;;  %v316_v31 = vadd.f32 %v617_v2, %v277_v18  ;;  %438 = vst.msk [vmem:[%s647_s5 + $0x40] sm:$0xff] %vm429_vm0, %v405_v21  ;;  %v408_v34 = vmax.f32 %v376_v23, 0.0  ;;  %v278_v36 = vmul.f32 %v599_v0, %v239_v19  ;;  %v247_v5 = vld [vmem:[%s605_s23 + $0xc0] sm:$0xff]  ;;  %v248_v6 = vld [vmem:[%s605_s23 + $0xc8] sm:$0xff]  ;;  %v355_v11 = vld [vmem:[%s611_s26 + $0xb0] sm:$0xff] }
  0x1f   : > { %439 = vst.msk [vmem:[%s647_s5 + $0x48] sm:$0xff] %vm429_vm0, %v406_v22  ;;  %v409_v35 = vmax.f32 %v377_v24, 0.0  ;;  %v279_v37 = vmul.f32 %v599_v0, %v240_v20  ;;  %440 = vst.msk [vmem:[%s647_s5 + $0x50] sm:$0xff] %vm429_vm0, %v407_v28  ;;  %v379_v40 = vadd.f32 %v347_v25, %v315_v30  ;;  %v280_v44 = vmul.f32 %v599_v0, %v241_v27  ;;  %v356_v12 = vld [vmem:[%s611_s26 + $0xb8] sm:$0xff]  ;;  %v249_v13 = vld [vmem:[%s605_s23 + $0xd0] sm:$0xff] }
  0x20   : > { %v410_v39 = vmax.f32 %v378_v29, 0.0  ;;  %v380_v41 = vadd.f32 %v348_v26, %v316_v31  ;;  %441 = vst.msk [vmem:[%s647_s5 + $0x58] sm:$0xff] %vm429_vm0, %v408_v34  ;;  %v317_v45 = vadd.f32 %v617_v2, %v278_v36  ;;  %v281_v48 = vmul.f32 %v599_v0, %v242_v32  ;;  %v250_v18 = vld [vmem:[%s605_s23 + $0xd8] sm:$0xff]  ;;  %v251_v19 = vld [vmem:[%s605_s23 + $0xe0] sm:$0xff]  ;;  %v252_v24 = vld [vmem:[%s605_s23 + $0xe8] sm:$0xff] }
  0x21   : > { %442 = vst.msk [vmem:[%s647_s5 + $0x60] sm:$0xff] %vm429_vm0, %v409_v35  ;;  %v318_v46 = vadd.f32 %v617_v2, %v279_v37  ;;  %v282_v49 = vmul.f32 %v599_v0, %v243_v33  ;;  %v411_v52 = vmax.f32 %v379_v40, 0.0  ;;  %v319_v54 = vadd.f32 %v617_v2, %v280_v44  ;;  %v357_v28 = vld [vmem:[%s611_s26 + $0xc0] sm:$0xff]  ;;  %v358_v29 = vld [vmem:[%s611_s26 + $0xc8] sm:$0xff]  ;;  %v359_v33 = vld [vmem:[%s611_s26 + $0xd0] sm:$0xff] }
  0x22   : > { %443 = vst.msk [vmem:[%s647_s5 + $0x68] sm:$0xff] %vm429_vm0, %v410_v39  ;;  %v412_v53 = vmax.f32 %v380_v41, 0.0  ;;  %v283_v57 = vmul.f32 %v599_v0, %v244_v38  ;;  %v381_v58 = vadd.f32 %v349_v42, %v317_v45  ;;  %v320_v60 = vadd.f32 %v617_v2, %v281_v48  ;;  %v253_v36 = vld [vmem:[%s605_s23 + $0xf0] sm:$0xff]  ;;  %v254_v37 = vld [vmem:[%s605_s23 + $0xf8] sm:$0xff]  ;;  %v361_v42 = vld [vmem:[%s611_s26 + $0xe0] sm:$0xff] }
  0x23   : > { %v382_v59 = vadd.f32 %v350_v43, %v318_v46  ;;  %v321_v61 = vadd.f32 %v617_v2, %v282_v49  ;;  %444 = vst.msk [vmem:[%s647_s5 + $0x70] sm:$0xff] %vm429_vm0, %v411_v52  ;;  %v383_v63 = vadd.f32 %v351_v47, %v319_v54  ;;  %v284_v3 = vmul.f32 %v599_v0, %v245_v50  ;;  %v360_v41 = vld [vmem:[%s611_s26 + $0xd8] sm:$0xff]  ;;  %v362_v48 = vld [vmem:[%s611_s26 + $0xe8] sm:$0xff] }
  0x24   : > { %445 = vst.msk [vmem:[%s647_s5 + $0x78] sm:$0xff] %vm429_vm0, %v412_v53  ;;  %v322_v1 = vadd.f32 %v617_v2, %v283_v57  ;;  %v285_v4 = vmul.f32 %v599_v0, %v246_v51  ;;  %v413_v7 = vmax.f32 %v381_v58, 0.0  ;;  %v384_v9 = vadd.f32 %v352_v55, %v320_v60  ;;  %v363_v57 = vld [vmem:[%s611_s26 + $0xf0] sm:$0xff]  ;;  %v364_v58 = vld [vmem:[%s611_s26 + $0xf8] sm:$0xff] }
  0x25   : > { %v414_v8 = vmax.f32 %v382_v59, 0.0  ;;  %v385_v10 = vadd.f32 %v353_v56, %v321_v61  ;;  %v415_v14 = vmax.f32 %v383_v63, 0.0  ;;  %v323_v16 = vadd.f32 %v617_v2, %v284_v3 }
  0x26   : > { %v386_v15 = vadd.f32 %v354_v62, %v322_v1  ;;  %v324_v17 = vadd.f32 %v617_v2, %v285_v4  ;;  %446 = vst.msk [vmem:[%s647_s5 + $0x80] sm:$0xff] %vm429_vm0, %v413_v7  ;;  %v416_v20 = vmax.f32 %v384_v9, 0.0  ;;  %v286_v22 = vmul.f32 %v599_v0, %v247_v5 }
  0x27   : > { %447 = vst.msk [vmem:[%s647_s5 + $0x88] sm:$0xff] %vm429_vm0, %v414_v8  ;;  %v417_v21 = vmax.f32 %v385_v10, 0.0  ;;  %v287_v23 = vmul.f32 %v599_v0, %v248_v6  ;;  %448 = vst.msk [vmem:[%s647_s5 + $0x90] sm:$0xff] %vm429_vm0, %v415_v14  ;;  %v387_v26 = vadd.f32 %v355_v11, %v323_v16  ;;  %v288_v30 = vmul.f32 %v599_v0, %v249_v13 }
  0x28   : > { %v418_v25 = vmax.f32 %v386_v15, 0.0  ;;  %v388_v27 = vadd.f32 %v356_v12, %v324_v17  ;;  %449 = vst.msk [vmem:[%s647_s5 + $0x98] sm:$0xff] %vm429_vm0, %v416_v20  ;;  %v325_v31 = vadd.f32 %v617_v2, %v286_v22  ;;  %v289_v34 = vmul.f32 %v599_v0, %v250_v18 }
  0x29   : > { %450 = vst.msk [vmem:[%s647_s5 + $0xa0] sm:$0xff] %vm429_vm0, %v417_v21  ;;  %v326_v32 = vadd.f32 %v617_v2, %v287_v23  ;;  %v290_v35 = vmul.f32 %v599_v0, %v251_v19  ;;  %v419_v38 = vmax.f32 %v387_v26, 0.0  ;;  %v327_v40 = vadd.f32 %v617_v2, %v288_v30 }
  0x2a   : > { %451 = vst.msk [vmem:[%s647_s5 + $0xa8] sm:$0xff] %vm429_vm0, %v418_v25  ;;  %v420_v39 = vmax.f32 %v388_v27, 0.0  ;;  %v291_v43 = vmul.f32 %v599_v0, %v252_v24  ;;  %v389_v44 = vadd.f32 %v357_v28, %v325_v31  ;;  %v328_v46 = vadd.f32 %v617_v2, %v289_v34 }
  0x2b   : > { %v390_v45 = vadd.f32 %v358_v29, %v326_v32  ;;  %v329_v47 = vadd.f32 %v617_v2, %v290_v35  ;;  %452 = vst.msk [vmem:[%s647_s5 + $0xb0] sm:$0xff] %vm429_vm0, %v419_v38  ;;  %v391_v49 = vadd.f32 %v359_v33, %v327_v40  ;;  %v292_v51 = vmul.f32 %v599_v0, %v253_v36 }
  0x2c   : > { %453 = vst.msk [vmem:[%s647_s5 + $0xb8] sm:$0xff] %vm429_vm0, %v420_v39  ;;  %v330_v50 = vadd.f32 %v617_v2, %v291_v43  ;;  %v293_v52 = vmul.f32 %v599_v0, %v254_v37  ;;  %v421_v53 = vmax.f32 %v389_v44, 0.0  ;;  %v392_v55 = vadd.f32 %v360_v41, %v328_v46 }
  0x2d   : > { %v422_v54 = vmax.f32 %v390_v45, 0.0  ;;  %v393_v56 = vadd.f32 %v361_v42, %v329_v47  ;;  %v423_v59 = vmax.f32 %v391_v49, 0.0  ;;  %v331_v61 = vadd.f32 %v617_v2, %v292_v51 }
  0x2e   : > { %v394_v60 = vadd.f32 %v362_v48, %v330_v50  ;;  %v332_v62 = vadd.f32 %v617_v2, %v293_v52  ;;  %454 = vst.msk [vmem:[%s647_s5 + $0xc0] sm:$0xff] %vm429_vm0, %v421_v53  ;;  %v424_v0 = vmax.f32 %v392_v55, 0.0 }
  0x2f   : > { %455 = vst.msk [vmem:[%s647_s5 + $0xc8] sm:$0xff] %vm429_vm0, %v422_v54  ;;  %v425_v63 = vmax.f32 %v393_v56, 0.0  ;;  %456 = vst.msk [vmem:[%s647_s5 + $0xd0] sm:$0xff] %vm429_vm0, %v423_v59  ;;  %v395_v3 = vadd.f32 %v363_v57, %v331_v61 }
  0x30   : > { %v426_v1 = vmax.f32 %v394_v60, 0.0  ;;  %v396_v4 = vadd.f32 %v364_v58, %v332_v62  ;;  %457 = vst.msk [vmem:[%s647_s5 + $0xd8] sm:$0xff] %vm429_vm0, %v424_v0 }
  0x31   : > { %458 = vst.msk [vmem:[%s647_s5 + $0xe0] sm:$0xff] %vm429_vm0, %v425_v63  ;;  %v427_v5 = vmax.f32 %v395_v3, 0.0 }
  0x32   : > { %459 = vst.msk [vmem:[%s647_s5 + $0xe8] sm:$0xff] %vm429_vm0, %v426_v1  ;;  %v428_v6 = vmax.f32 %v396_v4, 0.0 }
  0x33   : > { %460 = vst.msk [vmem:[%s647_s5 + $0xf0] sm:$0xff] %vm429_vm0, %v427_v5 }
  0x34   : > { %461 = vst.msk [vmem:[%s647_s5 + $0xf8] sm:$0xff] %vm429_vm0, %v428_v6 }
  0x35 PF: > { %s14_s15 = sadd.s32 1, %s559_s15  }
  0x36   : > { %p11_p4 = scmp.ge.s32.totalorder %s14_s15, 4  }
  0x38   :  { %13 = sbr.rel (!%p11_p4) target bundleno = 1 (0x1), region = 69 }

</bundles_post_ra>
